<compile_context>
chip_gen: v5e
topology: v5e:2x2
jax: 0.10.0
libtpu: 0.0.40
codegen_flags: <defaults>
</compile_context>

<pallas_src>
import functools

import numpy as np
import jax
import jax.numpy as jnp
from jax.experimental import pallas as pl
from jax.experimental.pallas import tpu as pltpu

MARGIN0 = 32   # zero lane-margin around the conv1 padded-grid input (>= W+3)
MARGIN1 = 12   # zero lane-margin around the conv2 padded-grid input (>= W/2+3)


# ----------------------------- fused kernel -----------------------------

def _fused_forward_kernel(nb, H, W,
                          x_ref, w1_ref, b1_ref, s1_ref, w2_ref, b2_ref,
                          s2_ref, wf1_ref, bf1_ref, wf2_ref, bf2_ref,
                          o_ref,
                          im1_ref, y1_ref, p1_ref, im2_ref, y2_ref,
                          p2t_ref, fcin_ref):
    f32, bf16 = jnp.float32, jnp.bfloat16
    Q = W + 2                         # conv1 padded-grid row stride
    A1 = (H + 2) * Q                  # conv1 padded-grid area per image
    M1 = nb * A1                      # conv1 lanes (all images of this step)
    H2, W2 = H // 2, W // 2
    Q2 = W2 + 2                       # conv2 padded-grid row stride
    A2 = (H2 + 2) * Q2
    M2 = nb * A2
    H4, W4 = H2 // 2, W2 // 2
    KP = H4 * W4                      # spatial positions per image entering fc1
    L1 = M1 - (Q + 1)                 # pool1 shifted-slice length
    L2 = M2 - (Q2 + 1)                # pool2 shifted-slice length
    taps = [(dh, dw) for dh in range(3) for dw in range(3)]

    # ---- conv1 (3x3, pad 1) + ReLU: im2col by 9 contiguous lane-slices, 1 matmul
    for t, (dh, dw) in enumerate(taps):
        off = MARGIN0 + (dh - 1) * Q + (dw - 1)
        im1_ref[8 * t:8 * (t + 1), :] = x_ref[0, :, off:off + M1]
    y1 = jnp.dot(w1_ref[...], im1_ref[...], preferred_element_type=f32)
    y1_ref[...] = jnp.maximum(y1 + b1_ref[...], 0.0).astype(bf16)

    # ---- maxpool 2x2/2: max of 4 offset slices, then selection-matmul compaction
    # (output lands on the zero-ringed/zero-margined conv2 padded grid, ring and
    #  margin lanes become exact zeros -> conv2's "padding" needs no zero fills).
    m1 = jnp.maximum(
        jnp.maximum(y1_ref[:, 0:L1], y1_ref[:, 1:1 + L1]),
        jnp.maximum(y1_ref[:, Q:Q + L1], y1_ref[:, Q + 1:Q + 1 + L1]))
    p1 = jnp.dot(m1, s1_ref[...], preferred_element_type=f32)
    p1_ref[...] = p1.astype(bf16)

    # ---- conv2 (3x3, pad 1) + ReLU: same single-matmul im2col scheme (K=144)
    for t, (dh, dw) in enumerate(taps):
        off = MARGIN1 + (dh - 1) * Q2 + (dw - 1)
        im2_ref[16 * t:16 * (t + 1), :] = p1_ref[:, off:off + M2]
    y2 = jnp.dot(w2_ref[...], im2_ref[...], preferred_element_type=f32)
    y2_ref[...] = jnp.maximum(y2 + b2_ref[...], 0.0).astype(bf16)

    # ---- maxpool 2x2/2 + layout flip: the NT selection matmul compacts the pool
    # and transposes to rows=(image, h4, w4), cols=channel in one MXU push.
    m2 = jnp.maximum(
        jnp.maximum(y2_ref[:, 0:L2], y2_ref[:, 1:1 + L2]),
        jnp.maximum(y2_ref[:, Q2:Q2 + L2], y2_ref[:, Q2 + 1:Q2 + 1 + L2]))
    p2t_ref[...] = jax.lax.dot_general(
        s2_ref[...], m2, dimension_numbers=(((1,), (1,)), ((), ())),
        preferred_element_type=f32)

    # ---- flatten to (images, 512): tiny static row copies (fc1 weights were
    # pre-permuted to this (h4, w4, c) order, preserving PyTorch NCHW flatten).
    for k in range(KP):
        for n in range(nb):
            fcin_ref[n:n + 1, 32 * k:32 * (k + 1)] = (
                p2t_ref[n * KP + k:n * KP + k + 1, :])

    # ---- fc1 + ReLU (single (nb, 512) @ (512, 128) matmul), fc2 (VPU reduce)
    h1 = jnp.dot(fcin_ref[...].astype(bf16), wf1_ref[...],
                 preferred_element_type=f32)
    h1 = jnp.maximum(h1 + bf1_ref[...], 0.0)
    # nn.Sigmoid exists in __init__ but is not applied in forward(); matched.
    o_ref[...] = jnp.sum(h1 * wf2_ref[...], axis=-1, keepdims=True) + bf2_ref[...]


# ----------------------------- parameter prep -----------------------------

def init_params(key, H, W):
    """Random parameters in PyTorch conventions (OIHW convs, (out, in) linears)."""
    keys = jax.random.split(key, 8)
    fc1_in = 32 * (H // 4) * (W // 4)
    return {
        "w1": 0.05 * jax.random.normal(keys[0], (16, 3, 3, 3), jnp.float32),
        "b1": 0.05 * jax.random.normal(keys[1], (16,), jnp.float32),
        "w2": 0.05 * jax.random.normal(keys[2], (32, 16, 3, 3), jnp.float32),
        "b2": 0.05 * jax.random.normal(keys[3], (32,), jnp.float32),
        "fc1_w": 0.05 * jax.random.normal(keys[4], (128, fc1_in), jnp.float32),
        "fc1_b": 0.05 * jax.random.normal(keys[5], (128,), jnp.float32),
        "fc2_w": 0.05 * jax.random.normal(keys[6], (1, 128), jnp.float32),
        "fc2_b": 0.05 * jax.random.normal(keys[7], (1,), jnp.float32),
    }


def prepare_params(p, H, W, nb):
    """One-time prep: permute/pad PyTorch weights and build the 0/1 selection
    matrices used to compact the max-pool results on the MXU."""
    f32, bf16 = jnp.float32, jnp.bfloat16
    H2, W2, H4, W4 = H // 2, W // 2, H // 4, W // 4
    Q, Q2 = W + 2, W2 + 2
    A1, A2 = (H + 2) * Q, (H2 + 2) * Q2
    M1, M2 = nb * A1, nb * A2
    L1, L2 = M1 - (Q + 1), M2 - (Q2 + 1)
    P1W = M2 + 2 * MARGIN1

    # Conv taps concatenated along K (tap-major, channel-minor); conv1 Cin padded
    # 3 -> 8 so every im2col block store is an aligned 8-sublane store.
    w1t = jnp.transpose(p["w1"], (2, 3, 1, 0))                  # (dh, dw, c, o)
    w1t = jnp.pad(w1t, ((0, 0), (0, 0), (0, 5), (0, 0)))        # c: 3 -> 8
    w1p = jnp.transpose(w1t.reshape(72, 16)).astype(bf16)       # (16, 72)
    w2p = jnp.transpose(
        jnp.transpose(p["w2"], (2, 3, 1, 0)).reshape(144, 32)).astype(bf16)  # (32,144)
    b1 = p["b1"].reshape(16, 1).astype(f32)
    b2 = p["b2"].reshape(32, 1).astype(f32)

    # pool1 selection: pick each 2x2 max (computed at odd,odd positions of the
    # conv1 padded grid) and scatter into the interior of the conv2 padded grid;
    # ring + margin columns stay all-zero => exact zero padding for conv2.
    s1 = np.zeros((L1, P1W), np.float32)
    for n in range(nb):
        for i in range(H2):
            for j in range(W2):
                q = n * A1 + (2 * i + 1) * Q + (2 * j + 1)
                r = MARGIN1 + n * A2 + (i + 1) * Q2 + (j + 1)
                s1[q, r] = 1.0
    s1 = jnp.asarray(s1, bf16)

    # pool2 selection (+ layout flip): output rows = (image, h4, w4), cols = channel.
    s2 = np.zeros((nb * H4 * W4, L2), np.float32)
    for n in range(nb):
        for i in range(H4):
            for j in range(W4):
                q = n * A2 + (2 * i + 1) * Q2 + (2 * j + 1)
                s2[n * H4 * W4 + i * W4 + j, q] = 1.0
    s2 = jnp.asarray(s2, bf16)

    # fc1: PyTorch flattens NCHW (c, h4, w4); the kernel flattens (h4*W4+w4, c),
    # so permute the weight rows once -> single runtime matmul, no transpose.
    wf = p["fc1_w"].reshape(128, 32, H4, W4)
    wf1 = jnp.transpose(wf, (2, 3, 1, 0)).reshape(H4 * W4 * 32, 128).astype(bf16)
    bf1 = p["fc1_b"].reshape(1, 128).astype(f32)
    wf2 = p["fc2_w"].reshape(1, 128).astype(f32)
    bf2 = p["fc2_b"].reshape(1, 1).astype(f32)
    return (w1p, b1, s1, w2p, b2, s2, wf1, bf1, wf2, bf2)


# ----------------------------- forward wrapper -----------------------------

@functools.partial(jax.jit, static_argnames=("nb",))
def binary_classifier_cnn(x_nchw, kernel_params, nb):
    (w1p, b1, s1, w2p, b2, s2, wf1, bf1, wf2, bf2) = kernel_params
    N, C, H, W = x_nchw.shape
    assert C == 3 and H % 4 == 0 and W % 4 == 0 and N % nb == 0
    assert W + 3 <= MARGIN0 and (W // 2) + 3 <= MARGIN1
    nsteps = N // nb
    Q, Q2 = W + 2, (W // 2) + 2
    A1, A2 = (H + 2) * Q, ((H // 2) + 2) * Q2
    M1, M2 = nb * A1, nb * A2
    H4, W4 = H // 4, W // 4
    F = 32 * H4 * W4
    L1, L2 = M1 - (Q + 1), M2 - (Q2 + 1)
    LB = M1 + 2 * MARGIN0
    P1W = M2 + 2 * MARGIN1

    # Boundary layout plumbing (pure XLA): fold the conv1 zero padding and the
    # 3->8 channel padding into the input, flatten each padded image into lanes,
    # concatenate the images of one grid step along lanes, add zero lane-margins
    # so every in-kernel conv tap is a plain contiguous slice.
    xp = jnp.pad(x_nchw.astype(jnp.float32), ((0, 0), (0, 5), (1, 1), (1, 1)))
    xp = xp.reshape(nsteps, nb, 8, A1)
    xp = jnp.transpose(xp, (0, 2, 1, 3)).reshape(nsteps, 8, M1)
    xp = jnp.pad(xp, ((0, 0), (0, 0), (MARGIN0, MARGIN0))).astype(jnp.bfloat16)

    out = pl.pallas_call(
        functools.partial(_fused_forward_kernel, nb, H, W),
        out_shape=jax.ShapeDtypeStruct((N, 1), jnp.float32),
        grid=(nsteps,),
        in_specs=[
            pl.BlockSpec((1, 8, LB), lambda s: (s, 0, 0)),       # batch-block of images
            pl.BlockSpec((16, 72), lambda s: (0, 0)),            # conv1 taps (K-fused)
            pl.BlockSpec((16, 1), lambda s: (0, 0)),
            pl.BlockSpec((L1, P1W), lambda s: (0, 0)),           # pool1 selection
            pl.BlockSpec((32, 144), lambda s: (0, 0)),           # conv2 taps (K-fused)
            pl.BlockSpec((32, 1), lambda s: (0, 0)),
            pl.BlockSpec((nb * H4 * W4, L2), lambda s: (0, 0)),  # pool2 selection
            pl.BlockSpec((F, 128), lambda s: (0, 0)),            # fc1 (pre-permuted)
            pl.BlockSpec((1, 128), lambda s: (0, 0)),
            pl.BlockSpec((1, 128), lambda s: (0, 0)),            # fc2 row
            pl.BlockSpec((1, 1), lambda s: (0, 0)),
        ],
        out_specs=pl.BlockSpec((nb, 1), lambda s: (s, 0)),
        scratch_shapes=[
            pltpu.VMEM((72, M1), jnp.bfloat16),             # conv1 im2col (K x M)
            pltpu.VMEM((16, M1), jnp.bfloat16),             # conv1 output, padded grid
            pltpu.VMEM((16, P1W), jnp.bfloat16),            # pool1 output, padded grid
            pltpu.VMEM((144, M2), jnp.bfloat16),            # conv2 im2col (K x M)
            pltpu.VMEM((32, M2), jnp.bfloat16),             # conv2 output, padded grid
            pltpu.VMEM((nb * H4 * W4, 32), jnp.float32),    # pool2 out (rows=n,h4,w4)
            pltpu.VMEM((nb, F), jnp.float32),               # fc1 input rows
        ],
        compiler_params=pltpu.CompilerParams(
            dimension_semantics=("parallel",),
        ),
    )(xp, w1p, b1, s1, w2p, b2, s2, wf1, bf1, wf2, bf2)
    return out                                              # (N, 1) logits


# ----------------------------- main -----------------------------

if __name__ == "__main__":
    key = jax.random.PRNGKey(0)
    k_x, k_p = jax.random.split(key)

    N, C, H, W = 2, 3, 16, 16
    NB = N   # whole batch per grid step (v5e/v6e); use N//2 for larger N on v7x
    x = jax.random.normal(k_x, (N, C, H, W), jnp.float32)

    torch_style_params = init_params(k_p, H, W)
    kp = prepare_params(torch_style_params, H, W, NB)   # one-time weight/selection prep

    out = binary_classifier_cnn(x, kp, NB)
    out = jax.block_until_ready(out)
    assert out.shape == (N, 1), out.shape
    print("KERNEL_OK")
</pallas_src>

<mosaic_0001>
module attributes {stable_mosaic.version = 11 : i64} {
  func.func @_fused_forward_kernel(%arg0: i32, %arg1: memref<1x8x712xbf16, #tpu.memory_space<vmem>>, %arg2: memref<16x72xbf16, #tpu.memory_space<vmem>>, %arg3: memref<16x1xf32, #tpu.memory_space<vmem>>, %arg4: memref<629x224xbf16, #tpu.memory_space<vmem>>, %arg5: memref<32x144xbf16, #tpu.memory_space<vmem>>, %arg6: memref<32x1xf32, #tpu.memory_space<vmem>>, %arg7: memref<32x189xbf16, #tpu.memory_space<vmem>>, %arg8: memref<512x128xbf16, #tpu.memory_space<vmem>>, %arg9: memref<1x128xf32, #tpu.memory_space<vmem>>, %arg10: memref<1x128xf32, #tpu.memory_space<vmem>>, %arg11: memref<1x1xf32, #tpu.memory_space<vmem>>, %arg12: memref<2x1xf32, #tpu.memory_space<vmem>>, %arg13: memref<72x648xbf16, #tpu.memory_space<vmem>>, %arg14: memref<16x648xbf16, #tpu.memory_space<vmem>>, %arg15: memref<16x224xbf16, #tpu.memory_space<vmem>>, %arg16: memref<144x200xbf16, #tpu.memory_space<vmem>>, %arg17: memref<32x200xbf16, #tpu.memory_space<vmem>>, %arg18: memref<32x32xf32, #tpu.memory_space<vmem>>, %arg19: memref<2x512xf32, #tpu.memory_space<vmem>>) attributes {dimension_semantics = [#tpu.dimension_semantics<parallel>], iteration_bounds = array<i64: 1>, scalar_prefetch = 0 : i64, scratch_operands = 7 : i64, tpu.core_type = #tpu.core_type<tc>, window_params = [{transform_indices = @transform_0, window_bounds = array<i64: 1, 8, 712>}, {pipeline_mode = #tpu.pipeline_mode<synchronous>, transform_indices = @transform_1, window_bounds = array<i64: 16, 72>}, {pipeline_mode = #tpu.pipeline_mode<synchronous>, transform_indices = @transform_2, window_bounds = array<i64: 16, 1>}, {pipeline_mode = #tpu.pipeline_mode<synchronous>, transform_indices = @transform_3, window_bounds = array<i64: 629, 224>}, {pipeline_mode = #tpu.pipeline_mode<synchronous>, transform_indices = @transform_4, window_bounds = array<i64: 32, 144>}, {pipeline_mode = #tpu.pipeline_mode<synchronous>, transform_indices = @transform_5, window_bounds = array<i64: 32, 1>}, {pipeline_mode = #tpu.pipeline_mode<synchronous>, transform_indices = @transform_6, window_bounds = array<i64: 32, 189>}, {pipeline_mode = #tpu.pipeline_mode<synchronous>, transform_indices = @transform_7, window_bounds = array<i64: 512, 128>}, {pipeline_mode = #tpu.pipeline_mode<synchronous>, transform_indices = @transform_8, window_bounds = array<i64: 1, 128>}, {pipeline_mode = #tpu.pipeline_mode<synchronous>, transform_indices = @transform_9, window_bounds = array<i64: 1, 128>}, {pipeline_mode = #tpu.pipeline_mode<synchronous>, transform_indices = @transform_10, window_bounds = array<i64: 1, 1>}, {transform_indices = @transform_11, window_bounds = array<i64: 2, 1>}]} {
    %c0 = arith.constant 0 : index
    %c0_0 = arith.constant 0 : index
    %c13 = arith.constant 13 : index
    %0 = vector.load %arg1[%c0, %c0_0, %c13] : memref<1x8x712xbf16, #tpu.memory_space<vmem>>, vector<1x8x648xbf16>
    %1 = vector.shape_cast %0 : vector<1x8x648xbf16> to vector<8x648xbf16>
    %c0_1 = arith.constant 0 : index
    %c0_2 = arith.constant 0 : index
    %2 = vector.load %arg13[%c0_1, %c0_2] : memref<72x648xbf16, #tpu.memory_space<vmem>>, vector<8x648xbf16>
    tpu.vector_store %arg13[%c0_1, %c0_2], %1 {strides = array<i32>} : memref<72x648xbf16, #tpu.memory_space<vmem>>, vector<8x648xbf16>,
    %c0_3 = arith.constant 0 : index
    %c0_4 = arith.constant 0 : index
    %c14 = arith.constant 14 : index
    %3 = vector.load %arg1[%c0_3, %c0_4, %c14] : memref<1x8x712xbf16, #tpu.memory_space<vmem>>, vector<1x8x648xbf16>
    %4 = vector.shape_cast %3 : vector<1x8x648xbf16> to vector<8x648xbf16>
    %c8 = arith.constant 8 : index
    %c0_5 = arith.constant 0 : index
    %5 = vector.load %arg13[%c8, %c0_5] : memref<72x648xbf16, #tpu.memory_space<vmem>>, vector<8x648xbf16>
    tpu.vector_store %arg13[%c8, %c0_5], %4 {strides = array<i32>} : memref<72x648xbf16, #tpu.memory_space<vmem>>, vector<8x648xbf16>,
    %c0_6 = arith.constant 0 : index
    %c0_7 = arith.constant 0 : index
    %c15 = arith.constant 15 : index
    %6 = vector.load %arg1[%c0_6, %c0_7, %c15] : memref<1x8x712xbf16, #tpu.memory_space<vmem>>, vector<1x8x648xbf16>
    %7 = vector.shape_cast %6 : vector<1x8x648xbf16> to vector<8x648xbf16>
    %c16 = arith.constant 16 : index
    %c0_8 = arith.constant 0 : index
    %8 = vector.load %arg13[%c16, %c0_8] : memref<72x648xbf16, #tpu.memory_space<vmem>>, vector<8x648xbf16>
    tpu.vector_store %arg13[%c16, %c0_8], %7 {strides = array<i32>} : memref<72x648xbf16, #tpu.memory_space<vmem>>, vector<8x648xbf16>,
    %c0_9 = arith.constant 0 : index
    %c0_10 = arith.constant 0 : index
    %c31 = arith.constant 31 : index
    %9 = vector.load %arg1[%c0_9, %c0_10, %c31] : memref<1x8x712xbf16, #tpu.memory_space<vmem>>, vector<1x8x648xbf16>
    %10 = vector.shape_cast %9 : vector<1x8x648xbf16> to vector<8x648xbf16>
    %c24 = arith.constant 24 : index
    %c0_11 = arith.constant 0 : index
    %11 = vector.load %arg13[%c24, %c0_11] : memref<72x648xbf16, #tpu.memory_space<vmem>>, vector<8x648xbf16>
    tpu.vector_store %arg13[%c24, %c0_11], %10 {strides = array<i32>} : memref<72x648xbf16, #tpu.memory_space<vmem>>, vector<8x648xbf16>,
    %c0_12 = arith.constant 0 : index
    %c0_13 = arith.constant 0 : index
    %c32 = arith.constant 32 : index
    %12 = vector.load %arg1[%c0_12, %c0_13, %c32] : memref<1x8x712xbf16, #tpu.memory_space<vmem>>, vector<1x8x648xbf16>
    %13 = vector.shape_cast %12 : vector<1x8x648xbf16> to vector<8x648xbf16>
    %c32_14 = arith.constant 32 : index
    %c0_15 = arith.constant 0 : index
    %14 = vector.load %arg13[%c32_14, %c0_15] : memref<72x648xbf16, #tpu.memory_space<vmem>>, vector<8x648xbf16>
    tpu.vector_store %arg13[%c32_14, %c0_15], %13 {strides = array<i32>} : memref<72x648xbf16, #tpu.memory_space<vmem>>, vector<8x648xbf16>,
    %c0_16 = arith.constant 0 : index
    %c0_17 = arith.constant 0 : index
    %c33 = arith.constant 33 : index
    %15 = vector.load %arg1[%c0_16, %c0_17, %c33] : memref<1x8x712xbf16, #tpu.memory_space<vmem>>, vector<1x8x648xbf16>
    %16 = vector.shape_cast %15 : vector<1x8x648xbf16> to vector<8x648xbf16>
    %c40 = arith.constant 40 : index
    %c0_18 = arith.constant 0 : index
    %17 = vector.load %arg13[%c40, %c0_18] : memref<72x648xbf16, #tpu.memory_space<vmem>>, vector<8x648xbf16>
    tpu.vector_store %arg13[%c40, %c0_18], %16 {strides = array<i32>} : memref<72x648xbf16, #tpu.memory_space<vmem>>, vector<8x648xbf16>,
    %c0_19 = arith.constant 0 : index
    %c0_20 = arith.constant 0 : index
    %c49 = arith.constant 49 : index
    %18 = vector.load %arg1[%c0_19, %c0_20, %c49] : memref<1x8x712xbf16, #tpu.memory_space<vmem>>, vector<1x8x648xbf16>
    %19 = vector.shape_cast %18 : vector<1x8x648xbf16> to vector<8x648xbf16>
    %c48 = arith.constant 48 : index
    %c0_21 = arith.constant 0 : index
    %20 = vector.load %arg13[%c48, %c0_21] : memref<72x648xbf16, #tpu.memory_space<vmem>>, vector<8x648xbf16>
    tpu.vector_store %arg13[%c48, %c0_21], %19 {strides = array<i32>} : memref<72x648xbf16, #tpu.memory_space<vmem>>, vector<8x648xbf16>,
    %c0_22 = arith.constant 0 : index
    %c0_23 = arith.constant 0 : index
    %c50 = arith.constant 50 : index
    %21 = vector.load %arg1[%c0_22, %c0_23, %c50] : memref<1x8x712xbf16, #tpu.memory_space<vmem>>, vector<1x8x648xbf16>
    %22 = vector.shape_cast %21 : vector<1x8x648xbf16> to vector<8x648xbf16>
    %c56 = arith.constant 56 : index
    %c0_24 = arith.constant 0 : index
    %23 = vector.load %arg13[%c56, %c0_24] : memref<72x648xbf16, #tpu.memory_space<vmem>>, vector<8x648xbf16>
    tpu.vector_store %arg13[%c56, %c0_24], %22 {strides = array<i32>} : memref<72x648xbf16, #tpu.memory_space<vmem>>, vector<8x648xbf16>,
    %c0_25 = arith.constant 0 : index
    %c0_26 = arith.constant 0 : index
    %c51 = arith.constant 51 : index
    %24 = vector.load %arg1[%c0_25, %c0_26, %c51] : memref<1x8x712xbf16, #tpu.memory_space<vmem>>, vector<1x8x648xbf16>
    %25 = vector.shape_cast %24 : vector<1x8x648xbf16> to vector<8x648xbf16>
    %c64 = arith.constant 64 : index
    %c0_27 = arith.constant 0 : index
    %26 = vector.load %arg13[%c64, %c0_27] : memref<72x648xbf16, #tpu.memory_space<vmem>>, vector<8x648xbf16>
    tpu.vector_store %arg13[%c64, %c0_27], %25 {strides = array<i32>} : memref<72x648xbf16, #tpu.memory_space<vmem>>, vector<8x648xbf16>,
    %c0_28 = arith.constant 0 : index
    %c0_29 = arith.constant 0 : index
    %27 = vector.load %arg2[%c0_28, %c0_29] : memref<16x72xbf16, #tpu.memory_space<vmem>>, vector<16x72xbf16>
    %c0_30 = arith.constant 0 : index
    %c0_31 = arith.constant 0 : index
    %28 = vector.load %arg13[%c0_30, %c0_31] : memref<72x648xbf16, #tpu.memory_space<vmem>>, vector<72x648xbf16>
    %cst = arith.constant dense<0.000000e+00> : vector<16x648xf32>
    %29 = tpu.matmul %27, %28, %cst {dimension_numbers = #tpu.dot_dimension_numbers<[1], [0], [0], [1], [0, 0, 1, 1], [], []>} : vector<16x72xbf16>, vector<72x648xbf16>, vector<16x648xf32> -> vector<16x648xf32>
    %c0_32 = arith.constant 0 : index
    %c0_33 = arith.constant 0 : index
    %30 = vector.load %arg3[%c0_32, %c0_33] : memref<16x1xf32, #tpu.memory_space<vmem>>, vector<16x1xf32>
    %31 = vector.broadcast %30 : vector<16x1xf32> to vector<16x648xf32>
    %32 = arith.addf %29, %31 : vector<16x648xf32>
    %cst_34 = arith.constant 0.000000e+00 : f32
    %33 = vector.broadcast %cst_34 : f32 to vector<16x648xf32>
    %34 = arith.maximumf %32, %33 : vector<16x648xf32>
    %35 = arith.truncf %34 : vector<16x648xf32> to vector<16x648xbf16>
    %c0_35 = arith.constant 0 : index
    %c0_36 = arith.constant 0 : index
    %36 = vector.load %arg14[%c0_35, %c0_36] : memref<16x648xbf16, #tpu.memory_space<vmem>>, vector<16x648xbf16>
    tpu.vector_store %arg14[%c0_35, %c0_36], %35 {strides = array<i32>} : memref<16x648xbf16, #tpu.memory_space<vmem>>, vector<16x648xbf16>,
    %c0_37 = arith.constant 0 : index
    %c0_38 = arith.constant 0 : index
    %37 = vector.load %arg14[%c0_37, %c0_38] : memref<16x648xbf16, #tpu.memory_space<vmem>>, vector<16x629xbf16>
    %c0_39 = arith.constant 0 : index
    %c1 = arith.constant 1 : index
    %38 = vector.load %arg14[%c0_39, %c1] : memref<16x648xbf16, #tpu.memory_space<vmem>>, vector<16x629xbf16>
    %39 = arith.maximumf %37, %38 : vector<16x629xbf16>
    %c0_40 = arith.constant 0 : index
    %c18 = arith.constant 18 : index
    %40 = vector.load %arg14[%c0_40, %c18] : memref<16x648xbf16, #tpu.memory_space<vmem>>, vector<16x629xbf16>
    %c0_41 = arith.constant 0 : index
    %c19 = arith.constant 19 : index
    %41 = vector.load %arg14[%c0_41, %c19] : memref<16x648xbf16, #tpu.memory_space<vmem>>, vector<16x629xbf16>
    %42 = arith.maximumf %40, %41 : vector<16x629xbf16>
    %43 = arith.maximumf %39, %42 : vector<16x629xbf16>
    %c0_42 = arith.constant 0 : index
    %c0_43 = arith.constant 0 : index
    %44 = vector.load %arg4[%c0_42, %c0_43] : memref<629x224xbf16, #tpu.memory_space<vmem>>, vector<629x224xbf16>
    %cst_44 = arith.constant dense<0.000000e+00> : vector<16x224xf32>
    %45 = tpu.matmul %43, %44, %cst_44 {dimension_numbers = #tpu.dot_dimension_numbers<[1], [0], [0], [1], [0, 0, 1, 1], [], []>} : vector<16x629xbf16>, vector<629x224xbf16>, vector<16x224xf32> -> vector<16x224xf32>
    %46 = arith.truncf %45 : vector<16x224xf32> to vector<16x224xbf16>
    %c0_45 = arith.constant 0 : index
    %c0_46 = arith.constant 0 : index
    %47 = vector.load %arg15[%c0_45, %c0_46] : memref<16x224xbf16, #tpu.memory_space<vmem>>, vector<16x224xbf16>
    tpu.vector_store %arg15[%c0_45, %c0_46], %46 {strides = array<i32>} : memref<16x224xbf16, #tpu.memory_space<vmem>>, vector<16x224xbf16>,
    %c0_47 = arith.constant 0 : index
    %c1_48 = arith.constant 1 : index
    %48 = vector.load %arg15[%c0_47, %c1_48] : memref<16x224xbf16, #tpu.memory_space<vmem>>, vector<16x200xbf16>
    %c0_49 = arith.constant 0 : index
    %c0_50 = arith.constant 0 : index
    %49 = vector.load %arg16[%c0_49, %c0_50] : memref<144x200xbf16, #tpu.memory_space<vmem>>, vector<16x200xbf16>
    tpu.vector_store %arg16[%c0_49, %c0_50], %48 {strides = array<i32>} : memref<144x200xbf16, #tpu.memory_space<vmem>>, vector<16x200xbf16>,
    %c0_51 = arith.constant 0 : index
    %c2 = arith.constant 2 : index
    %50 = vector.load %arg15[%c0_51, %c2] : memref<16x224xbf16, #tpu.memory_space<vmem>>, vector<16x200xbf16>
    %c16_52 = arith.constant 16 : index
    %c0_53 = arith.constant 0 : index
    %51 = vector.load %arg16[%c16_52, %c0_53] : memref<144x200xbf16, #tpu.memory_space<vmem>>, vector<16x200xbf16>
    tpu.vector_store %arg16[%c16_52, %c0_53], %50 {strides = array<i32>} : memref<144x200xbf16, #tpu.memory_space<vmem>>, vector<16x200xbf16>,
    %c0_54 = arith.constant 0 : index
    %c3 = arith.constant 3 : index
    %52 = vector.load %arg15[%c0_54, %c3] : memref<16x224xbf16, #tpu.memory_space<vmem>>, vector<16x200xbf16>
    %c32_55 = arith.constant 32 : index
    %c0_56 = arith.constant 0 : index
    %53 = vector.load %arg16[%c32_55, %c0_56] : memref<144x200xbf16, #tpu.memory_space<vmem>>, vector<16x200xbf16>
    tpu.vector_store %arg16[%c32_55, %c0_56], %52 {strides = array<i32>} : memref<144x200xbf16, #tpu.memory_space<vmem>>, vector<16x200xbf16>,
    %c0_57 = arith.constant 0 : index
    %c11 = arith.constant 11 : index
    %54 = vector.load %arg15[%c0_57, %c11] : memref<16x224xbf16, #tpu.memory_space<vmem>>, vector<16x200xbf16>
    %c48_58 = arith.constant 48 : index
    %c0_59 = arith.constant 0 : index
    %55 = vector.load %arg16[%c48_58, %c0_59] : memref<144x200xbf16, #tpu.memory_space<vmem>>, vector<16x200xbf16>
    tpu.vector_store %arg16[%c48_58, %c0_59], %54 {strides = array<i32>} : memref<144x200xbf16, #tpu.memory_space<vmem>>, vector<16x200xbf16>,
    %c0_60 = arith.constant 0 : index
    %c12 = arith.constant 12 : index
    %56 = vector.load %arg15[%c0_60, %c12] : memref<16x224xbf16, #tpu.memory_space<vmem>>, vector<16x200xbf16>
    %c64_61 = arith.constant 64 : index
    %c0_62 = arith.constant 0 : index
    %57 = vector.load %arg16[%c64_61, %c0_62] : memref<144x200xbf16, #tpu.memory_space<vmem>>, vector<16x200xbf16>
    tpu.vector_store %arg16[%c64_61, %c0_62], %56 {strides = array<i32>} : memref<144x200xbf16, #tpu.memory_space<vmem>>, vector<16x200xbf16>,
    %c0_63 = arith.constant 0 : index
    %c13_64 = arith.constant 13 : index
    %58 = vector.load %arg15[%c0_63, %c13_64] : memref<16x224xbf16, #tpu.memory_space<vmem>>, vector<16x200xbf16>
    %c80 = arith.constant 80 : index
    %c0_65 = arith.constant 0 : index
    %59 = vector.load %arg16[%c80, %c0_65] : memref<144x200xbf16, #tpu.memory_space<vmem>>, vector<16x200xbf16>
    tpu.vector_store %arg16[%c80, %c0_65], %58 {strides = array<i32>} : memref<144x200xbf16, #tpu.memory_space<vmem>>, vector<16x200xbf16>,
    %c0_66 = arith.constant 0 : index
    %c21 = arith.constant 21 : index
    %60 = vector.load %arg15[%c0_66, %c21] : memref<16x224xbf16, #tpu.memory_space<vmem>>, vector<16x200xbf16>
    %c96 = arith.constant 96 : index
    %c0_67 = arith.constant 0 : index
    %61 = vector.load %arg16[%c96, %c0_67] : memref<144x200xbf16, #tpu.memory_space<vmem>>, vector<16x200xbf16>
    tpu.vector_store %arg16[%c96, %c0_67], %60 {strides = array<i32>} : memref<144x200xbf16, #tpu.memory_space<vmem>>, vector<16x200xbf16>,
    %c0_68 = arith.constant 0 : index
    %c22 = arith.constant 22 : index
    %62 = vector.load %arg15[%c0_68, %c22] : memref<16x224xbf16, #tpu.memory_space<vmem>>, vector<16x200xbf16>
    %c112 = arith.constant 112 : index
    %c0_69 = arith.constant 0 : index
    %63 = vector.load %arg16[%c112, %c0_69] : memref<144x200xbf16, #tpu.memory_space<vmem>>, vector<16x200xbf16>
    tpu.vector_store %arg16[%c112, %c0_69], %62 {strides = array<i32>} : memref<144x200xbf16, #tpu.memory_space<vmem>>, vector<16x200xbf16>,
    %c0_70 = arith.constant 0 : index
    %c23 = arith.constant 23 : index
    %64 = vector.load %arg15[%c0_70, %c23] : memref<16x224xbf16, #tpu.memory_space<vmem>>, vector<16x200xbf16>
    %c128 = arith.constant 128 : index
    %c0_71 = arith.constant 0 : index
    %65 = vector.load %arg16[%c128, %c0_71] : memref<144x200xbf16, #tpu.memory_space<vmem>>, vector<16x200xbf16>
    tpu.vector_store %arg16[%c128, %c0_71], %64 {strides = array<i32>} : memref<144x200xbf16, #tpu.memory_space<vmem>>, vector<16x200xbf16>,
    %c0_72 = arith.constant 0 : index
    %c0_73 = arith.constant 0 : index
    %66 = vector.load %arg5[%c0_72, %c0_73] : memref<32x144xbf16, #tpu.memory_space<vmem>>, vector<32x144xbf16>
    %c0_74 = arith.constant 0 : index
    %c0_75 = arith.constant 0 : index
    %67 = vector.load %arg16[%c0_74, %c0_75] : memref<144x200xbf16, #tpu.memory_space<vmem>>, vector<144x200xbf16>
    %cst_76 = arith.constant dense<0.000000e+00> : vector<32x200xf32>
    %68 = tpu.matmul %66, %67, %cst_76 {dimension_numbers = #tpu.dot_dimension_numbers<[1], [0], [0], [1], [0, 0, 1, 1], [], []>} : vector<32x144xbf16>, vector<144x200xbf16>, vector<32x200xf32> -> vector<32x200xf32>
    %c0_77 = arith.constant 0 : index
    %c0_78 = arith.constant 0 : index
    %69 = vector.load %arg6[%c0_77, %c0_78] : memref<32x1xf32, #tpu.memory_space<vmem>>, vector<32x1xf32>
    %70 = vector.broadcast %69 : vector<32x1xf32> to vector<32x200xf32>
    %71 = arith.addf %68, %70 : vector<32x200xf32>
    %cst_79 = arith.constant 0.000000e+00 : f32
    %72 = vector.broadcast %cst_79 : f32 to vector<32x200xf32>
    %73 = arith.maximumf %71, %72 : vector<32x200xf32>
    %74 = arith.truncf %73 : vector<32x200xf32> to vector<32x200xbf16>
    %c0_80 = arith.constant 0 : index
    %c0_81 = arith.constant 0 : index
    %75 = vector.load %arg17[%c0_80, %c0_81] : memref<32x200xbf16, #tpu.memory_space<vmem>>, vector<32x200xbf16>
    tpu.vector_store %arg17[%c0_80, %c0_81], %74 {strides = array<i32>} : memref<32x200xbf16, #tpu.memory_space<vmem>>, vector<32x200xbf16>,
    %c0_82 = arith.constant 0 : index
    %c0_83 = arith.constant 0 : index
    %76 = vector.load %arg17[%c0_82, %c0_83] : memref<32x200xbf16, #tpu.memory_space<vmem>>, vector<32x189xbf16>
    %c0_84 = arith.constant 0 : index
    %c1_85 = arith.constant 1 : index
    %77 = vector.load %arg17[%c0_84, %c1_85] : memref<32x200xbf16, #tpu.memory_space<vmem>>, vector<32x189xbf16>
    %78 = arith.maximumf %76, %77 : vector<32x189xbf16>
    %c0_86 = arith.constant 0 : index
    %c10 = arith.constant 10 : index
    %79 = vector.load %arg17[%c0_86, %c10] : memref<32x200xbf16, #tpu.memory_space<vmem>>, vector<32x189xbf16>
    %c0_87 = arith.constant 0 : index
    %c11_88 = arith.constant 11 : index
    %80 = vector.load %arg17[%c0_87, %c11_88] : memref<32x200xbf16, #tpu.memory_space<vmem>>, vector<32x189xbf16>
    %81 = arith.maximumf %79, %80 : vector<32x189xbf16>
    %82 = arith.maximumf %78, %81 : vector<32x189xbf16>
    %c0_89 = arith.constant 0 : index
    %c0_90 = arith.constant 0 : index
    %83 = vector.load %arg7[%c0_89, %c0_90] : memref<32x189xbf16, #tpu.memory_space<vmem>>, vector<32x189xbf16>
    %cst_91 = arith.constant dense<0.000000e+00> : vector<32x32xf32>
    %84 = tpu.matmul %83, %82, %cst_91 {dimension_numbers = #tpu.dot_dimension_numbers<[1], [1], [0], [0], [0, 0, 1, 0], [], []>} : vector<32x189xbf16>, vector<32x189xbf16>, vector<32x32xf32> -> vector<32x32xf32>
    %c0_92 = arith.constant 0 : index
    %c0_93 = arith.constant 0 : index
    %85 = vector.load %arg18[%c0_92, %c0_93] : memref<32x32xf32, #tpu.memory_space<vmem>>, vector<32x32xf32>
    tpu.vector_store %arg18[%c0_92, %c0_93], %84 {strides = array<i32>} : memref<32x32xf32, #tpu.memory_space<vmem>>, vector<32x32xf32>,
    %c0_94 = arith.constant 0 : index
    %c0_95 = arith.constant 0 : index
    %86 = vector.load %arg18[%c0_94, %c0_95] : memref<32x32xf32, #tpu.memory_space<vmem>>, vector<1x32xf32>
    %c0_96 = arith.constant 0 : index
    %c0_97 = arith.constant 0 : index
    %87 = vector.load %arg19[%c0_96, %c0_97] : memref<2x512xf32, #tpu.memory_space<vmem>>, vector<1x32xf32>
    tpu.vector_store %arg19[%c0_96, %c0_97], %86 {strides = array<i32>} : memref<2x512xf32, #tpu.memory_space<vmem>>, vector<1x32xf32>,
    %c16_98 = arith.constant 16 : index
    %c0_99 = arith.constant 0 : index
    %88 = vector.load %arg18[%c16_98, %c0_99] : memref<32x32xf32, #tpu.memory_space<vmem>>, vector<1x32xf32>
    %c1_100 = arith.constant 1 : index
    %c0_101 = arith.constant 0 : index
    %89 = vector.load %arg19[%c1_100, %c0_101] : memref<2x512xf32, #tpu.memory_space<vmem>>, vector<1x32xf32>
    tpu.vector_store %arg19[%c1_100, %c0_101], %88 {strides = array<i32>} : memref<2x512xf32, #tpu.memory_space<vmem>>, vector<1x32xf32>,
    %c1_102 = arith.constant 1 : index
    %c0_103 = arith.constant 0 : index
    %90 = vector.load %arg18[%c1_102, %c0_103] : memref<32x32xf32, #tpu.memory_space<vmem>>, vector<1x32xf32>
    %c0_104 = arith.constant 0 : index
    %c32_105 = arith.constant 32 : index
    %91 = vector.load %arg19[%c0_104, %c32_105] : memref<2x512xf32, #tpu.memory_space<vmem>>, vector<1x32xf32>
    tpu.vector_store %arg19[%c0_104, %c32_105], %90 {strides = array<i32>} : memref<2x512xf32, #tpu.memory_space<vmem>>, vector<1x32xf32>,
    %c17 = arith.constant 17 : index
    %c0_106 = arith.constant 0 : index
    %92 = vector.load %arg18[%c17, %c0_106] : memref<32x32xf32, #tpu.memory_space<vmem>>, vector<1x32xf32>
    %c1_107 = arith.constant 1 : index
    %c32_108 = arith.constant 32 : index
    %93 = vector.load %arg19[%c1_107, %c32_108] : memref<2x512xf32, #tpu.memory_space<vmem>>, vector<1x32xf32>
    tpu.vector_store %arg19[%c1_107, %c32_108], %92 {strides = array<i32>} : memref<2x512xf32, #tpu.memory_space<vmem>>, vector<1x32xf32>,
    %c2_109 = arith.constant 2 : index
    %c0_110 = arith.constant 0 : index
    %94 = vector.load %arg18[%c2_109, %c0_110] : memref<32x32xf32, #tpu.memory_space<vmem>>, vector<1x32xf32>
    %c0_111 = arith.constant 0 : index
    %c64_112 = arith.constant 64 : index
    %95 = vector.load %arg19[%c0_111, %c64_112] : memref<2x512xf32, #tpu.memory_space<vmem>>, vector<1x32xf32>
    tpu.vector_store %arg19[%c0_111, %c64_112], %94 {strides = array<i32>} : memref<2x512xf32, #tpu.memory_space<vmem>>, vector<1x32xf32>,
    %c18_113 = arith.constant 18 : index
    %c0_114 = arith.constant 0 : index
    %96 = vector.load %arg18[%c18_113, %c0_114] : memref<32x32xf32, #tpu.memory_space<vmem>>, vector<1x32xf32>
    %c1_115 = arith.constant 1 : index
    %c64_116 = arith.constant 64 : index
    %97 = vector.load %arg19[%c1_115, %c64_116] : memref<2x512xf32, #tpu.memory_space<vmem>>, vector<1x32xf32>
    tpu.vector_store %arg19[%c1_115, %c64_116], %96 {strides = array<i32>} : memref<2x512xf32, #tpu.memory_space<vmem>>, vector<1x32xf32>,
    %c3_117 = arith.constant 3 : index
    %c0_118 = arith.constant 0 : index
    %98 = vector.load %arg18[%c3_117, %c0_118] : memref<32x32xf32, #tpu.memory_space<vmem>>, vector<1x32xf32>
    %c0_119 = arith.constant 0 : index
    %c96_120 = arith.constant 96 : index
    %99 = vector.load %arg19[%c0_119, %c96_120] : memref<2x512xf32, #tpu.memory_space<vmem>>, vector<1x32xf32>
    tpu.vector_store %arg19[%c0_119, %c96_120], %98 {strides = array<i32>} : memref<2x512xf32, #tpu.memory_space<vmem>>, vector<1x32xf32>,
    %c19_121 = arith.constant 19 : index
    %c0_122 = arith.constant 0 : index
    %100 = vector.load %arg18[%c19_121, %c0_122] : memref<32x32xf32, #tpu.memory_space<vmem>>, vector<1x32xf32>
    %c1_123 = arith.constant 1 : index
    %c96_124 = arith.constant 96 : index
    %101 = vector.load %arg19[%c1_123, %c96_124] : memref<2x512xf32, #tpu.memory_space<vmem>>, vector<1x32xf32>
    tpu.vector_store %arg19[%c1_123, %c96_124], %100 {strides = array<i32>} : memref<2x512xf32, #tpu.memory_space<vmem>>, vector<1x32xf32>,
    %c4 = arith.constant 4 : index
    %c0_125 = arith.constant 0 : index
    %102 = vector.load %arg18[%c4, %c0_125] : memref<32x32xf32, #tpu.memory_space<vmem>>, vector<1x32xf32>
    %c0_126 = arith.constant 0 : index
    %c128_127 = arith.constant 128 : index
    %103 = vector.load %arg19[%c0_126, %c128_127] : memref<2x512xf32, #tpu.memory_space<vmem>>, vector<1x32xf32>
    tpu.vector_store %arg19[%c0_126, %c128_127], %102 {strides = array<i32>} : memref<2x512xf32, #tpu.memory_space<vmem>>, vector<1x32xf32>,
    %c20 = arith.constant 20 : index
    %c0_128 = arith.constant 0 : index
    %104 = vector.load %arg18[%c20, %c0_128] : memref<32x32xf32, #tpu.memory_space<vmem>>, vector<1x32xf32>
    %c1_129 = arith.constant 1 : index
    %c128_130 = arith.constant 128 : index
    %105 = vector.load %arg19[%c1_129, %c128_130] : memref<2x512xf32, #tpu.memory_space<vmem>>, vector<1x32xf32>
    tpu.vector_store %arg19[%c1_129, %c128_130], %104 {strides = array<i32>} : memref<2x512xf32, #tpu.memory_space<vmem>>, vector<1x32xf32>,
    %c5 = arith.constant 5 : index
    %c0_131 = arith.constant 0 : index
    %106 = vector.load %arg18[%c5, %c0_131] : memref<32x32xf32, #tpu.memory_space<vmem>>, vector<1x32xf32>
    %c0_132 = arith.constant 0 : index
    %c160 = arith.constant 160 : index
    %107 = vector.load %arg19[%c0_132, %c160] : memref<2x512xf32, #tpu.memory_space<vmem>>, vector<1x32xf32>
    tpu.vector_store %arg19[%c0_132, %c160], %106 {strides = array<i32>} : memref<2x512xf32, #tpu.memory_space<vmem>>, vector<1x32xf32>,
    %c21_133 = arith.constant 21 : index
    %c0_134 = arith.constant 0 : index
    %108 = vector.load %arg18[%c21_133, %c0_134] : memref<32x32xf32, #tpu.memory_space<vmem>>, vector<1x32xf32>
    %c1_135 = arith.constant 1 : index
    %c160_136 = arith.constant 160 : index
    %109 = vector.load %arg19[%c1_135, %c160_136] : memref<2x512xf32, #tpu.memory_space<vmem>>, vector<1x32xf32>
    tpu.vector_store %arg19[%c1_135, %c160_136], %108 {strides = array<i32>} : memref<2x512xf32, #tpu.memory_space<vmem>>, vector<1x32xf32>,
    %c6 = arith.constant 6 : index
    %c0_137 = arith.constant 0 : index
    %110 = vector.load %arg18[%c6, %c0_137] : memref<32x32xf32, #tpu.memory_space<vmem>>, vector<1x32xf32>
    %c0_138 = arith.constant 0 : index
    %c192 = arith.constant 192 : index
    %111 = vector.load %arg19[%c0_138, %c192] : memref<2x512xf32, #tpu.memory_space<vmem>>, vector<1x32xf32>
    tpu.vector_store %arg19[%c0_138, %c192], %110 {strides = array<i32>} : memref<2x512xf32, #tpu.memory_space<vmem>>, vector<1x32xf32>,
    %c22_139 = arith.constant 22 : index
    %c0_140 = arith.constant 0 : index
    %112 = vector.load %arg18[%c22_139, %c0_140] : memref<32x32xf32, #tpu.memory_space<vmem>>, vector<1x32xf32>
    %c1_141 = arith.constant 1 : index
    %c192_142 = arith.constant 192 : index
    %113 = vector.load %arg19[%c1_141, %c192_142] : memref<2x512xf32, #tpu.memory_space<vmem>>, vector<1x32xf32>
    tpu.vector_store %arg19[%c1_141, %c192_142], %112 {strides = array<i32>} : memref<2x512xf32, #tpu.memory_space<vmem>>, vector<1x32xf32>,
    %c7 = arith.constant 7 : index
    %c0_143 = arith.constant 0 : index
    %114 = vector.load %arg18[%c7, %c0_143] : memref<32x32xf32, #tpu.memory_space<vmem>>, vector<1x32xf32>
    %c0_144 = arith.constant 0 : index
    %c224 = arith.constant 224 : index
    %115 = vector.load %arg19[%c0_144, %c224] : memref<2x512xf32, #tpu.memory_space<vmem>>, vector<1x32xf32>
    tpu.vector_store %arg19[%c0_144, %c224], %114 {strides = array<i32>} : memref<2x512xf32, #tpu.memory_space<vmem>>, vector<1x32xf32>,
    %c23_145 = arith.constant 23 : index
    %c0_146 = arith.constant 0 : index
    %116 = vector.load %arg18[%c23_145, %c0_146] : memref<32x32xf32, #tpu.memory_space<vmem>>, vector<1x32xf32>
    %c1_147 = arith.constant 1 : index
    %c224_148 = arith.constant 224 : index
    %117 = vector.load %arg19[%c1_147, %c224_148] : memref<2x512xf32, #tpu.memory_space<vmem>>, vector<1x32xf32>
    tpu.vector_store %arg19[%c1_147, %c224_148], %116 {strides = array<i32>} : memref<2x512xf32, #tpu.memory_space<vmem>>, vector<1x32xf32>,
    %c8_149 = arith.constant 8 : index
    %c0_150 = arith.constant 0 : index
    %118 = vector.load %arg18[%c8_149, %c0_150] : memref<32x32xf32, #tpu.memory_space<vmem>>, vector<1x32xf32>
    %c0_151 = arith.constant 0 : index
    %c256 = arith.constant 256 : index
    %119 = vector.load %arg19[%c0_151, %c256] : memref<2x512xf32, #tpu.memory_space<vmem>>, vector<1x32xf32>
    tpu.vector_store %arg19[%c0_151, %c256], %118 {strides = array<i32>} : memref<2x512xf32, #tpu.memory_space<vmem>>, vector<1x32xf32>,
    %c24_152 = arith.constant 24 : index
    %c0_153 = arith.constant 0 : index
    %120 = vector.load %arg18[%c24_152, %c0_153] : memref<32x32xf32, #tpu.memory_space<vmem>>, vector<1x32xf32>
    %c1_154 = arith.constant 1 : index
    %c256_155 = arith.constant 256 : index
    %121 = vector.load %arg19[%c1_154, %c256_155] : memref<2x512xf32, #tpu.memory_space<vmem>>, vector<1x32xf32>
    tpu.vector_store %arg19[%c1_154, %c256_155], %120 {strides = array<i32>} : memref<2x512xf32, #tpu.memory_space<vmem>>, vector<1x32xf32>,
    %c9 = arith.constant 9 : index
    %c0_156 = arith.constant 0 : index
    %122 = vector.load %arg18[%c9, %c0_156] : memref<32x32xf32, #tpu.memory_space<vmem>>, vector<1x32xf32>
    %c0_157 = arith.constant 0 : index
    %c288 = arith.constant 288 : index
    %123 = vector.load %arg19[%c0_157, %c288] : memref<2x512xf32, #tpu.memory_space<vmem>>, vector<1x32xf32>
    tpu.vector_store %arg19[%c0_157, %c288], %122 {strides = array<i32>} : memref<2x512xf32, #tpu.memory_space<vmem>>, vector<1x32xf32>,
    %c25 = arith.constant 25 : index
    %c0_158 = arith.constant 0 : index
    %124 = vector.load %arg18[%c25, %c0_158] : memref<32x32xf32, #tpu.memory_space<vmem>>, vector<1x32xf32>
    %c1_159 = arith.constant 1 : index
    %c288_160 = arith.constant 288 : index
    %125 = vector.load %arg19[%c1_159, %c288_160] : memref<2x512xf32, #tpu.memory_space<vmem>>, vector<1x32xf32>
    tpu.vector_store %arg19[%c1_159, %c288_160], %124 {strides = array<i32>} : memref<2x512xf32, #tpu.memory_space<vmem>>, vector<1x32xf32>,
    %c10_161 = arith.constant 10 : index
    %c0_162 = arith.constant 0 : index
    %126 = vector.load %arg18[%c10_161, %c0_162] : memref<32x32xf32, #tpu.memory_space<vmem>>, vector<1x32xf32>
    %c0_163 = arith.constant 0 : index
    %c320 = arith.constant 320 : index
    %127 = vector.load %arg19[%c0_163, %c320] : memref<2x512xf32, #tpu.memory_space<vmem>>, vector<1x32xf32>
    tpu.vector_store %arg19[%c0_163, %c320], %126 {strides = array<i32>} : memref<2x512xf32, #tpu.memory_space<vmem>>, vector<1x32xf32>,
    %c26 = arith.constant 26 : index
    %c0_164 = arith.constant 0 : index
    %128 = vector.load %arg18[%c26, %c0_164] : memref<32x32xf32, #tpu.memory_space<vmem>>, vector<1x32xf32>
    %c1_165 = arith.constant 1 : index
    %c320_166 = arith.constant 320 : index
    %129 = vector.load %arg19[%c1_165, %c320_166] : memref<2x512xf32, #tpu.memory_space<vmem>>, vector<1x32xf32>
    tpu.vector_store %arg19[%c1_165, %c320_166], %128 {strides = array<i32>} : memref<2x512xf32, #tpu.memory_space<vmem>>, vector<1x32xf32>,
    %c11_167 = arith.constant 11 : index
    %c0_168 = arith.constant 0 : index
    %130 = vector.load %arg18[%c11_167, %c0_168] : memref<32x32xf32, #tpu.memory_space<vmem>>, vector<1x32xf32>
    %c0_169 = arith.constant 0 : index
    %c352 = arith.constant 352 : index
    %131 = vector.load %arg19[%c0_169, %c352] : memref<2x512xf32, #tpu.memory_space<vmem>>, vector<1x32xf32>
    tpu.vector_store %arg19[%c0_169, %c352], %130 {strides = array<i32>} : memref<2x512xf32, #tpu.memory_space<vmem>>, vector<1x32xf32>,
    %c27 = arith.constant 27 : index
    %c0_170 = arith.constant 0 : index
    %132 = vector.load %arg18[%c27, %c0_170] : memref<32x32xf32, #tpu.memory_space<vmem>>, vector<1x32xf32>
    %c1_171 = arith.constant 1 : index
    %c352_172 = arith.constant 352 : index
    %133 = vector.load %arg19[%c1_171, %c352_172] : memref<2x512xf32, #tpu.memory_space<vmem>>, vector<1x32xf32>
    tpu.vector_store %arg19[%c1_171, %c352_172], %132 {strides = array<i32>} : memref<2x512xf32, #tpu.memory_space<vmem>>, vector<1x32xf32>,
    %c12_173 = arith.constant 12 : index
    %c0_174 = arith.constant 0 : index
    %134 = vector.load %arg18[%c12_173, %c0_174] : memref<32x32xf32, #tpu.memory_space<vmem>>, vector<1x32xf32>
    %c0_175 = arith.constant 0 : index
    %c384 = arith.constant 384 : index
    %135 = vector.load %arg19[%c0_175, %c384] : memref<2x512xf32, #tpu.memory_space<vmem>>, vector<1x32xf32>
    tpu.vector_store %arg19[%c0_175, %c384], %134 {strides = array<i32>} : memref<2x512xf32, #tpu.memory_space<vmem>>, vector<1x32xf32>,
    %c28 = arith.constant 28 : index
    %c0_176 = arith.constant 0 : index
    %136 = vector.load %arg18[%c28, %c0_176] : memref<32x32xf32, #tpu.memory_space<vmem>>, vector<1x32xf32>
    %c1_177 = arith.constant 1 : index
    %c384_178 = arith.constant 384 : index
    %137 = vector.load %arg19[%c1_177, %c384_178] : memref<2x512xf32, #tpu.memory_space<vmem>>, vector<1x32xf32>
    tpu.vector_store %arg19[%c1_177, %c384_178], %136 {strides = array<i32>} : memref<2x512xf32, #tpu.memory_space<vmem>>, vector<1x32xf32>,
    %c13_179 = arith.constant 13 : index
    %c0_180 = arith.constant 0 : index
    %138 = vector.load %arg18[%c13_179, %c0_180] : memref<32x32xf32, #tpu.memory_space<vmem>>, vector<1x32xf32>
    %c0_181 = arith.constant 0 : index
    %c416 = arith.constant 416 : index
    %139 = vector.load %arg19[%c0_181, %c416] : memref<2x512xf32, #tpu.memory_space<vmem>>, vector<1x32xf32>
    tpu.vector_store %arg19[%c0_181, %c416], %138 {strides = array<i32>} : memref<2x512xf32, #tpu.memory_space<vmem>>, vector<1x32xf32>,
    %c29 = arith.constant 29 : index
    %c0_182 = arith.constant 0 : index
    %140 = vector.load %arg18[%c29, %c0_182] : memref<32x32xf32, #tpu.memory_space<vmem>>, vector<1x32xf32>
    %c1_183 = arith.constant 1 : index
    %c416_184 = arith.constant 416 : index
    %141 = vector.load %arg19[%c1_183, %c416_184] : memref<2x512xf32, #tpu.memory_space<vmem>>, vector<1x32xf32>
    tpu.vector_store %arg19[%c1_183, %c416_184], %140 {strides = array<i32>} : memref<2x512xf32, #tpu.memory_space<vmem>>, vector<1x32xf32>,
    %c14_185 = arith.constant 14 : index
    %c0_186 = arith.constant 0 : index
    %142 = vector.load %arg18[%c14_185, %c0_186] : memref<32x32xf32, #tpu.memory_space<vmem>>, vector<1x32xf32>
    %c0_187 = arith.constant 0 : index
    %c448 = arith.constant 448 : index
    %143 = vector.load %arg19[%c0_187, %c448] : memref<2x512xf32, #tpu.memory_space<vmem>>, vector<1x32xf32>
    tpu.vector_store %arg19[%c0_187, %c448], %142 {strides = array<i32>} : memref<2x512xf32, #tpu.memory_space<vmem>>, vector<1x32xf32>,
    %c30 = arith.constant 30 : index
    %c0_188 = arith.constant 0 : index
    %144 = vector.load %arg18[%c30, %c0_188] : memref<32x32xf32, #tpu.memory_space<vmem>>, vector<1x32xf32>
    %c1_189 = arith.constant 1 : index
    %c448_190 = arith.constant 448 : index
    %145 = vector.load %arg19[%c1_189, %c448_190] : memref<2x512xf32, #tpu.memory_space<vmem>>, vector<1x32xf32>
    tpu.vector_store %arg19[%c1_189, %c448_190], %144 {strides = array<i32>} : memref<2x512xf32, #tpu.memory_space<vmem>>, vector<1x32xf32>,
    %c15_191 = arith.constant 15 : index
    %c0_192 = arith.constant 0 : index
    %146 = vector.load %arg18[%c15_191, %c0_192] : memref<32x32xf32, #tpu.memory_space<vmem>>, vector<1x32xf32>
    %c0_193 = arith.constant 0 : index
    %c480 = arith.constant 480 : index
    %147 = vector.load %arg19[%c0_193, %c480] : memref<2x512xf32, #tpu.memory_space<vmem>>, vector<1x32xf32>
    tpu.vector_store %arg19[%c0_193, %c480], %146 {strides = array<i32>} : memref<2x512xf32, #tpu.memory_space<vmem>>, vector<1x32xf32>,
    %c31_194 = arith.constant 31 : index
    %c0_195 = arith.constant 0 : index
    %148 = vector.load %arg18[%c31_194, %c0_195] : memref<32x32xf32, #tpu.memory_space<vmem>>, vector<1x32xf32>
    %c1_196 = arith.constant 1 : index
    %c480_197 = arith.constant 480 : index
    %149 = vector.load %arg19[%c1_196, %c480_197] : memref<2x512xf32, #tpu.memory_space<vmem>>, vector<1x32xf32>
    tpu.vector_store %arg19[%c1_196, %c480_197], %148 {strides = array<i32>} : memref<2x512xf32, #tpu.memory_space<vmem>>, vector<1x32xf32>,
    %c0_198 = arith.constant 0 : index
    %c0_199 = arith.constant 0 : index
    %150 = vector.load %arg19[%c0_198, %c0_199] : memref<2x512xf32, #tpu.memory_space<vmem>>, vector<2x512xf32>
    %151 = arith.truncf %150 : vector<2x512xf32> to vector<2x512xbf16>
    %c0_200 = arith.constant 0 : index
    %c0_201 = arith.constant 0 : index
    %152 = vector.load %arg8[%c0_200, %c0_201] : memref<512x128xbf16, #tpu.memory_space<vmem>>, vector<512x128xbf16>
    %cst_202 = arith.constant dense<0.000000e+00> : vector<2x128xf32>
    %153 = tpu.matmul %151, %152, %cst_202 {dimension_numbers = #tpu.dot_dimension_numbers<[1], [0], [0], [1], [0, 0, 1, 1], [], []>} : vector<2x512xbf16>, vector<512x128xbf16>, vector<2x128xf32> -> vector<2x128xf32>
    %c0_203 = arith.constant 0 : index
    %c0_204 = arith.constant 0 : index
    %154 = vector.load %arg9[%c0_203, %c0_204] : memref<1x128xf32, #tpu.memory_space<vmem>>, vector<1x128xf32>
    %155 = vector.broadcast %154 : vector<1x128xf32> to vector<2x128xf32>
    %156 = arith.addf %153, %155 : vector<2x128xf32>
    %cst_205 = arith.constant 0.000000e+00 : f32
    %157 = vector.broadcast %cst_205 : f32 to vector<2x128xf32>
    %158 = arith.maximumf %156, %157 : vector<2x128xf32>
    %c0_206 = arith.constant 0 : index
    %c0_207 = arith.constant 0 : index
    %159 = vector.load %arg10[%c0_206, %c0_207] : memref<1x128xf32, #tpu.memory_space<vmem>>, vector<1x128xf32>
    %160 = vector.broadcast %159 : vector<1x128xf32> to vector<2x128xf32>
    %161 = arith.mulf %158, %160 : vector<2x128xf32>
    %cst_208 = arith.constant dense<0.000000e+00> : vector<2xf32>
    %162 = vector.multi_reduction <add>, %161, %cst_208 [1] : vector<2x128xf32> to vector<2xf32>
    %163 = vector.shape_cast %162 : vector<2xf32> to vector<2x1xf32>
    %c0_209 = arith.constant 0 : index
    %c0_210 = arith.constant 0 : index
    %164 = vector.load %arg11[%c0_209, %c0_210] : memref<1x1xf32, #tpu.memory_space<vmem>>, vector<1x1xf32>
    %165 = vector.broadcast %164 : vector<1x1xf32> to vector<2x1xf32>
    %166 = arith.addf %163, %165 : vector<2x1xf32>
    %c0_211 = arith.constant 0 : index
    %c0_212 = arith.constant 0 : index
    %167 = vector.load %arg12[%c0_211, %c0_212] : memref<2x1xf32, #tpu.memory_space<vmem>>, vector<2x1xf32>
    tpu.vector_store %arg12[%c0_211, %c0_212], %166 {strides = array<i32>} : memref<2x1xf32, #tpu.memory_space<vmem>>, vector<2x1xf32>,
    return
  }
  func.func @transform_0(%arg0: i32) -> (i32, i32, i32) {
    %c0_i32 = arith.constant 0 : i32
    %c0_i32_0 = arith.constant 0 : i32
    %c0_i32_1 = arith.constant 0 : i32
    return %arg0, %c0_i32, %c0_i32_0 : i32, i32, i32
  }
  func.func @transform_1(%arg0: i32) -> (i32, i32) {
    %c0_i32 = arith.constant 0 : i32
    %c0_i32_0 = arith.constant 0 : i32
    %c0_i32_1 = arith.constant 0 : i32
    return %c0_i32, %c0_i32_0 : i32, i32
  }
  func.func @transform_2(%arg0: i32) -> (i32, i32) {
    %c0_i32 = arith.constant 0 : i32
    %c0_i32_0 = arith.constant 0 : i32
    %c0_i32_1 = arith.constant 0 : i32
    return %c0_i32, %c0_i32_0 : i32, i32
  }
  func.func @transform_3(%arg0: i32) -> (i32, i32) {
    %c0_i32 = arith.constant 0 : i32
    %c0_i32_0 = arith.constant 0 : i32
    %c0_i32_1 = arith.constant 0 : i32
    return %c0_i32, %c0_i32_0 : i32, i32
  }
  func.func @transform_4(%arg0: i32) -> (i32, i32) {
    %c0_i32 = arith.constant 0 : i32
    %c0_i32_0 = arith.constant 0 : i32
    %c0_i32_1 = arith.constant 0 : i32
    return %c0_i32, %c0_i32_0 : i32, i32
  }
  func.func @transform_5(%arg0: i32) -> (i32, i32) {
    %c0_i32 = arith.constant 0 : i32
    %c0_i32_0 = arith.constant 0 : i32
    %c0_i32_1 = arith.constant 0 : i32
    return %c0_i32, %c0_i32_0 : i32, i32
  }
  func.func @transform_6(%arg0: i32) -> (i32, i32) {
    %c0_i32 = arith.constant 0 : i32
    %c0_i32_0 = arith.constant 0 : i32
    %c0_i32_1 = arith.constant 0 : i32
    return %c0_i32, %c0_i32_0 : i32, i32
  }
  func.func @transform_7(%arg0: i32) -> (i32, i32) {
    %c0_i32 = arith.constant 0 : i32
    %c0_i32_0 = arith.constant 0 : i32
    %c0_i32_1 = arith.constant 0 : i32
    return %c0_i32, %c0_i32_0 : i32, i32
  }
  func.func @transform_8(%arg0: i32) -> (i32, i32) {
    %c0_i32 = arith.constant 0 : i32
    %c0_i32_0 = arith.constant 0 : i32
    %c0_i32_1 = arith.constant 0 : i32
    return %c0_i32, %c0_i32_0 : i32, i32
  }
  func.func @transform_9(%arg0: i32) -> (i32, i32) {
    %c0_i32 = arith.constant 0 : i32
    %c0_i32_0 = arith.constant 0 : i32
    %c0_i32_1 = arith.constant 0 : i32
    return %c0_i32, %c0_i32_0 : i32, i32
  }
  func.func @transform_10(%arg0: i32) -> (i32, i32) {
    %c0_i32 = arith.constant 0 : i32
    %c0_i32_0 = arith.constant 0 : i32
    %c0_i32_1 = arith.constant 0 : i32
    return %c0_i32, %c0_i32_0 : i32, i32
  }
  func.func @transform_11(%arg0: i32) -> (i32, i32) {
    %c0_i32 = arith.constant 0 : i32
    %c0_i32_0 = arith.constant 0 : i32
    return %arg0, %c0_i32 : i32, i32
  }
}

</mosaic_0001>

<bundles_post_ra>
// kernel: binary_classifier_cnn.1
= control target key start
LH: loop header
LB: loop body
LE: loop exit
PB: predicated region body
PF: predicated region fallthrough
CT: control target
= control target key end

     0   :  { %s3508_s19 = smov 77   ;;  %s3509_s20 = smov 78   ;;  %vm56_vm0 = vcmask 1043456   ;;  %vm250_vm1 = vcmask 637952   ;;  %vm69_vm2 = vcmask 64516   ;;  %vm277_vm4 = vcmask 629760   ;;  %s4757_s0 = inlined_call_operand.vmem [shape: bf16[1,8,712], index: 0, kind: input, shape index: {}]   ;;  %s4758_s2 = inlined_call_operand.vmem [shape: f32[16,1], index: 2, kind: input, shape index: {}]   ;;  %s4759_s1 = inlined_call_operand.vmem [shape: bf16[16,72], index: 1, kind: input, shape index: {}]   ;;  %s4760_s3 = inlined_call_operand.vmem [shape: bf16[629,224], index: 3, kind: input, shape index: {}]   ;;  %s4761_s5 = inlined_call_operand.vmem [shape: f32[32,1], index: 5, kind: input, shape index: {}]   ;;  %s4762_s4 = inlined_call_operand.vmem [shape: bf16[32,144], index: 4, kind: input, shape index: {}]   ;;  %s4763_s6 = inlined_call_operand.vmem [shape: bf16[32,189], index: 6, kind: input, shape index: {}]   ;;  %s4764_s8 = inlined_call_operand.vmem [shape: f32[1,128], index: 8, kind: input, shape index: {}]   ;;  %s4765_s7 = inlined_call_operand.vmem [shape: bf16[512,128], index: 7, kind: input, shape index: {}]   ;;  %s4766_s9 = inlined_call_operand.vmem [shape: f32[1,128], index: 9, kind: input, shape index: {}]   ;;  %s4767_s10 = inlined_call_operand.<no memory space> [shape: f32[1,1], index: 10, kind: input, shape index: {}]   ;;  %s4768_s11 = inlined_call_operand.vmem [shape: f32[2,1], index: 11, kind: output, shape index: {}]  }
   0x1   :  { %v261_v0 = vld [vmem:[%s4757_s0] sm:$0xff]  ;;  %s3510_s21 = smov 79   ;;  %v262_v1 = vld [vmem:[%s4757_s0 + $0x8] sm:$0xff]  ;;  %s3511_s24 = smov 95   ;;  %v263_v2 = vld [vmem:[%s4757_s0 + $0x10] sm:$0xff]  ;;  %vm223_vm5 = vcmask 646144  }
   0x2   :  { %267 = vrot.lane.b32.xlu0 %v261_v0, %s3508_s19  ;;  %240 = vrot.lane.b32.xlu2 %v261_v0, %s3509_s20  ;;  %s3512_s25 = smov 96   ;;  %s3513_s26 = smov 113   ;;  %vm3620_vm3 = vmor %vm69_vm2, %vm56_vm0  ;;  %vm169_vm6 = vcmask 785408   ;;  %vm196_vm7 = vcmask 777216   ;;  %vm115_vm8 = vcmask 924672   ;;  %vm142_vm9 = vcmask 793600  }
   0x3   :  { %213 = vrot.lane.b32.xlu1 %v261_v0, %s3510_s21  ;;  %s3514_s29 = smov 97   ;;  %s3515_s30 = smov 114   ;;  %vm58_vm10 = vcmask 941056   ;;  %vm88_vm11 = vcmask 932864   ;;  %vm469_vm12 = vcmask 588800   ;;  %vm645_vm13 = vcmask 1039360  }
   0x4   :  { %s3516_s12 = smov 115   ;;  %s3519_s17 = smov 110   ;;  %vm1286_vm14 = vcmask 1041408   ;;  %vm1287_vm15 = vcmask 1042432   ;;  %vm1282_vm2 = vcmask 957440  }
   0x5   :  { %s3522_s15 = smov 107   ;;  %s3524_s16 = smov 117  }
   0x6   :  { %s3525_s18 = smov 125  }
   0xa   :  { %269 = vrot.lane.b32.xlu0 %v262_v1, %s3508_s19  ;;  %242 = vrot.lane.b32.xlu2 %v262_v1, %s3509_s20 }
   0xb   :  { %215 = vrot.lane.b32.xlu1 %v262_v1, %s3510_s21 }
  0x12   :  { %186 = vrot.lane.b32.xlu2 %v261_v0, %s3511_s24  ;;  %159 = vrot.lane.b32.xlu0 %v261_v0, %s3512_s25 }
  0x13   :  { %161 = vrot.lane.b32.xlu1 %v262_v1, %s3512_s25 }
  0x1a   :  { %188 = vrot.lane.b32.xlu0 %v262_v1, %s3511_s24  ;;  %107 = vrot.lane.b32.xlu2 %v262_v1, %s3513_s26 }
  0x1b   :  { %105 = vrot.lane.b32.xlu1 %v261_v0, %s3513_s26 }
  0x22   :  { %132 = vrot.lane.b32.xlu0 %v261_v0, %s3514_s29  ;;  %271 = vrot.lane.b32.xlu2 %v263_v2, %s3508_s19  ;;  %s3526_s19 = smov 126  }
  0x23   :  { %134 = vrot.lane.b32.xlu1 %v262_v1, %s3514_s29 }
  0x2a   :  { %78 = vrot.lane.b32.xlu2 %v261_v0, %s3515_s30  ;;  %47 = vrot.lane.b32.xlu0 %v261_v0, %s3516_s12 }
  0x2b   :  { %49 = vrot.lane.b32.xlu1 %v262_v1, %s3516_s12 }
  0x32   :  { %244 = vrot.lane.b32.xlu2 %v263_v2, %s3509_s20  ;;  %80 = vrot.lane.b32.xlu0 %v262_v1, %s3515_s30  ;;  %s3527_s20 = smov 105  }
  0x33   :  { %217 = vrot.lane.b32.xlu1 %v263_v2, %s3510_s21 }
  0x3a   :  { %109 = vrot.lane.b32.xlu2 %v263_v2, %s3513_s26  ;;  %163 = vrot.lane.b32.xlu0 %v263_v2, %s3512_s25 }
  0x3b   :  { %190 = vrot.lane.b32.xlu1 %v263_v2, %s3511_s24 }
  0x42   :  { %136 = vrot.lane.b32.xlu0 %v263_v2, %s3514_s29  ;;  %82 = vrot.lane.b32.xlu2 %v263_v2, %s3515_s30 }
  0x43   :  { %51 = vrot.lane.b32.xlu1 %v263_v2, %s3516_s12 }
  0x5c   :  { %v241_v3 = vpop.permute.xlu2 %240 }
  0x5d   :  { %v246_v4 = vrot.slane %v241_v3, 4 }
  0x64   :  { %v3606_v5 = vpop.permute.xlu2 %242 }
  0x65   :  { %v247_v6 = vrot.slane %v3606_v5, 4 }
  0x67   :  { %v249_v7 = vsel %vm56_vm0, %v246_v4, %v247_v6 }
  0x68   :  { %v251_v8 = vsel %vm250_vm1, %v241_v3, %v249_v7 }
  0x69   :  { %258 = vst [vmem:[#allocation2 + $0xa8] sm:$0xff] %v251_v8 }
  0x6c   :  { %v3613_v9 = vpop.permute.xlu2 %186 }
  0x6d   :  { %v192_v54 = vrot.slane %v3613_v9, 4 }
  0x70   :  { %v3235_v44 = vld [vmem:[#allocation2 + $0xa4] sm:$0xf0]  ;;  %v2635_v48 = vld [vmem:[#allocation2 + $0xa8] sm:$0xf0] }
  0x74   :  { %v268_v10 = vpop.permute.xlu0 %267  ;;  %v3615_v11 = vpop.permute.xlu2 %107 }
  0x75   :  { %v214_v12 = vpop.permute.xlu1 %213  ;;  %v273_v15 = vrot.slane %v268_v10, 4  ;;  %v112_v51 = vrot.slane %v3615_v11, 4 }
  0x76   :  { %v219_v20 = vrot.slane %v214_v12, 4 }
  0x7c   :  { %v270_v13 = vpop.permute.xlu0 %269  ;;  %v272_v14 = vpop.permute.xlu2 %271 }
  0x7d   :  { %v274_v16 = vrot.slane %v270_v13, 4  ;;  %v3617_v17 = vpop.permute.xlu1 %215  ;;  %v275_v19 = vrot.slane %v272_v14, 4 }
  0x7e   :  { %v220_v21 = vrot.slane %v3617_v17, 4 }
  0x7f   :  { %v276_v22 = vsel %vm56_vm0, %v273_v15, %v274_v16  ;;  %v279_v23 = vsel %vm56_vm0, %v274_v16, %v275_v19  ;;  %v281_v24 = vsel %vm277_vm4, %v272_v14, %v275_v19 }
  0x80   :  { %v222_v25 = vsel %vm56_vm0, %v219_v20, %v220_v21  ;;  %v278_v26 = vsel %vm277_vm4, %v268_v10, %v276_v22  ;;  %v3630_v27 = vsel %vm277_vm4, %v270_v13, %v279_v23  ;;  %287 = vst.msk [vmem:[#allocation2 + $0xd0] sm:$0xff] %vm3620_vm3, %v281_v24 }
  0x81   :  { %v224_v28 = vsel %vm223_vm5, %v214_v12, %v222_v25  ;;  %v409_v29 = vunpack.c.l.b16 %v278_v26  ;;  %v410_v30 = vunpack.c.h.b16 %v278_v26  ;;  %v411_v31 = vunpack.c.l.b16 %v3630_v27 }
  0x82   :  { %231 = vst [vmem:[#allocation2 + $0x90] sm:$0xff] %v224_v28 }
  0x83   :  { %v439_v32 = vpack.c.b16 %v409_v29, %v409_v29  ;;  %v440_v33 = vpack.c.b16 %v410_v30, %v410_v30  ;;  %v441_v34 = vpack.c.b16 %v411_v31, %v411_v31  ;;  %v317_v29 = vld [vmem:[%s4758_s2] sm:$0xff]  ;;  %v3517_v31 = vmov 0  }
  0x84   :  { %v160_v35 = vpop.permute.xlu0 %159  ;;  %v3636_v36 = vpop.permute.xlu2 %78  ;;  %3397 = vset.pattern.permute.xlu0 %v3517_v31  ;;  %3398 = vset.pattern.permute.xlu1 %v3517_v31 }
  0x85   :  { %v3638_v37 = vpop.permute.xlu1 %161  ;;  %v165_v38 = vrot.slane %v160_v35, 4  ;;  %v474_v39 = vsel %vm56_vm0, %v439_v32, 0  ;;  %v477_v40 = vsel %vm56_vm0, %v440_v33, 0  ;;  %v480_v42 = vsel %vm56_vm0, %v441_v34, 0  ;;  %321 = vperm.xlu0 %3397, %v317_v29   ;;  %3464 = vset.pattern.permute.xlu2 %v3517_v31 }
  0x86   :  { %v166_v41 = vrot.slane %v3638_v37, 4  ;;  %494 = vmatpush.bf16.msra.mxu0 %v474_v39  ;;  %508 = vmatpush.bf16.msra.mxu1 %v477_v40 }
  0x87   :  { %522 = vmatpush.bf16.msra.mxu2 %v480_v42 }
  0x88   :  { %v168_v43 = vsel %vm56_vm0, %v165_v38, %v166_v41 }
  0x89   :  { %v170_v45 = vsel %vm169_vm6, %v160_v35, %v168_v43  ;;  %v2633_v46 = vld [vmem:[#allocation2 + $0x90] sm:$0xf]  ;;  %v3232_v47 = vld [vmem:[#allocation2 + $0x94] sm:$0xf] }
  0x8a   :  { %177 = vst [vmem:[#allocation2 + $0x60] sm:$0xff] %v170_v45  ;;  %v2634_v49 = vor.u32 %v3235_v44, %v2633_v46  ;;  %v2638_v50 = vor.u32 %v3232_v47, %v2635_v48  ;;  %v84_v44 = vrot.slane %v3636_v36, 4 }
  0x8c   :  { %v3649_v52 = vpop.permute.xlu0 %188  ;;  %v245_v53 = vpop.permute.xlu2 %244  ;;  %495 = vmatpush.bf16.msra.mxu0 %v2634_v49  ;;  %509 = vmatpush.bf16.msra.mxu1 %v2638_v50 }
  0x8d   :  { %v193_v55 = vrot.slane %v3649_v52, 4  ;;  %v106_v56 = vpop.permute.xlu1 %105  ;;  %v248_v57 = vrot.slane %v245_v53, 4 }
  0x8e   :  { %v111_v58 = vrot.slane %v106_v56, 4 }
  0x8f   :  { %v195_v59 = vsel %vm56_vm0, %v192_v54, %v193_v55  ;;  %v252_v60 = vsel %vm56_vm0, %v247_v6, %v248_v57  ;;  %v254_v61 = vsel %vm250_vm1, %v245_v53, %v248_v57  ;;  %v3708_v57 = vld [vmem:[#allocation2 + $0xd0] sm:$0xff] }
  0x90   :  { %v197_v62 = vsel %vm196_vm7, %v3613_v9, %v195_v59  ;;  %v114_v63 = vsel %vm56_vm0, %v111_v58, %v112_v51  ;;  %v253_v0 = vsel %vm250_vm1, %v3606_v5, %v252_v60  ;;  %260 = vst.msk [vmem:[#allocation2 + $0xb8] sm:$0xff] %vm3620_vm3, %v254_v61  ;;  %v414_v60 = vunpack.c.h.b16 %v3708_v57 }
  0x91   :  { %204 = vst [vmem:[#allocation2 + $0x78] sm:$0xff] %v197_v62  ;;  %v116_v1 = vsel %vm115_vm8, %v106_v56, %v114_v63  ;;  %v2609_v10 = vld [vmem:[#allocation2 + $0x60] sm:$0xf]  ;;  %v3226_v12 = vld [vmem:[#allocation2 + $0x64] sm:$0xf]  ;;  %vm772_vm1 = vcmask 900096  }
  0x92   :  { %123 = vst [vmem:[#allocation2 + $0x30] sm:$0xff] %v116_v1 }
  0x93   :  { %259 = vst [vmem:[#allocation2 + $0xb0] sm:$0xff] %v253_v0 }
  0x94   :  { %v133_v2 = vpop.permute.xlu0 %132  ;;  %v110_v3 = vpop.permute.xlu2 %109 }
  0x95   :  { %v138_v4 = vrot.slane %v133_v2, 4  ;;  %v3668_v6 = vpop.permute.xlu1 %134  ;;  %v113_v7 = vrot.slane %v110_v3, 4 }
  0x96   :  { %v139_v8 = vrot.slane %v3668_v6, 4 }
  0x97   :  { %v117_v9 = vsel %vm56_vm0, %v112_v51, %v113_v7  ;;  %v119_v5 = vsel %vm115_vm8, %v110_v3, %v113_v7 }
  0x98   :  { %v141_v13 = vsel %vm56_vm0, %v138_v4, %v139_v8  ;;  %v118_v14 = vsel %vm115_vm8, %v3615_v11, %v117_v9  ;;  %125 = vst.msk [vmem:[#allocation2 + $0x40] sm:$0xff] %vm3620_vm3, %v119_v5  ;;  %v3229_v15 = vld [vmem:[#allocation2 + $0x74] sm:$0xf0]  ;;  %v2611_v16 = vld [vmem:[#allocation2 + $0x78] sm:$0xf0]  ;;  %vm1522_vm8 = vcmask 949248  }
  0x99   :  { %v143_v19 = vsel %vm142_vm9, %v133_v2, %v141_v13  ;;  %124 = vst [vmem:[#allocation2 + $0x38] sm:$0xff] %v118_v14  ;;  %v2610_v20 = vor.u32 %v3229_v15, %v2609_v10  ;;  %v2614_v22 = vor.u32 %v3226_v12, %v2611_v16  ;;  %v2585_v33 = vld [vmem:[#allocation2 + $0x30] sm:$0xf]  ;;  %v3220_v38 = vld [vmem:[#allocation2 + $0x34] sm:$0xf]  ;;  %v3734_v14 = vld [vmem:[%s4759_s1] sm:$0xff] }
  0x9a   :  { %150 = vst [vmem:[#allocation2 + $0x48] sm:$0xff] %v143_v19  ;;  %v3236_v3 = vld [vmem:[#allocation2 + $0xac] sm:$0xf0]  ;;  %v2651_v19 = vld [vmem:[#allocation2 + $0xb8] sm:$0xf0]  ;;  %s3518_s1 = smov 127  }
  0x9b   :  { %496 = vmatpush.bf16.msra.mxu0 %v2610_v20  ;;  %510 = vmatpush.bf16.msra.mxu1 %v2614_v22 }
  0x9c   :  { %v48_v23 = vpop.permute.xlu0 %47  ;;  %v83_v24 = vpop.permute.xlu2 %82 }
  0x9d   :  { %v3681_v25 = vpop.permute.xlu1 %49  ;;  %v53_v26 = vrot.slane %v48_v23, 4  ;;  %v86_v28 = vrot.slane %v83_v24, 4 }
  0x9e   :  { %v54_v11 = vrot.slane %v3681_v25, 4 }
  0x9f   :  { %v92_v30 = vsel %vm88_vm11, %v83_v24, %v86_v28 }
  0xa0   :  { %v57_v32 = vsel %vm56_vm0, %v53_v26, %v54_v11  ;;  %98 = vst.msk [vmem:[#allocation2 + $0x28] sm:$0xff] %vm3620_vm3, %v92_v30 }
  0xa1   :  { %v59_v34 = vsel %vm58_vm10, %v48_v23, %v57_v32  ;;  %v3223_v35 = vld [vmem:[#allocation2 + $0x44] sm:$0xf0]  ;;  %v2587_v39 = vld [vmem:[#allocation2 + $0x48] sm:$0xf0] }
  0xa2   :  { %66 = vst [vmem:[#allocation2] sm:$0xff] %v59_v34  ;;  %v2586_v40 = vor.u32 %v3223_v35, %v2585_v33  ;;  %v2590_v42 = vor.u32 %v3220_v38, %v2587_v39 }
  0xa4   :  { %497 = vmatpush.bf16.msra.mxu0 %v2586_v40  ;;  %511 = vmatpush.bf16.msra.mxu1 %v2590_v42  ;;  %v81_v43 = vpop.permute.xlu0 %80 }
  0xa5   :  { %v218_v45 = vpop.permute.xlu1 %217  ;;  %v85_v46 = vrot.slane %v81_v43, 4 }
  0xa6   :  { %v221_v47 = vrot.slane %v218_v45, 4 }
  0xa7   :  { %v87_v48 = vsel %vm56_vm0, %v84_v44, %v85_v46  ;;  %v90_v49 = vsel %vm56_vm0, %v85_v46, %v86_v28  ;;  %v2643_v28 = vld [vmem:[#allocation2 + $0xb0] sm:$0xf0]  ;;  %v3222_v46 = vld [vmem:[#allocation2 + $0x44] sm:$0xf] }
  0xa8   :  { %v225_v50 = vsel %vm56_vm0, %v220_v21, %v221_v47  ;;  %v227_v51 = vsel %vm223_vm5, %v218_v45, %v221_v47  ;;  %v89_v53 = vsel %vm88_vm11, %v3636_v36, %v87_v48  ;;  %v91_v56 = vsel %vm88_vm11, %v81_v43, %v90_v49  ;;  %v318_v21 = vld [vmem:[%s4758_s2 + $0x8] sm:$0xff]  ;;  %v2593_v49 = vld [vmem:[#allocation2 + $0x38] sm:$0xf]  ;;  %s3523_s2 = smov 116  }
  0xa9   :  { %v226_v54 = vsel %vm223_vm5, %v3617_v17, %v225_v50  ;;  %233 = vst.msk [vmem:[#allocation2 + $0xa0] sm:$0xff] %vm3620_vm3, %v227_v51  ;;  %326 = vperm.xlu1 %3398, %v318_v21   ;;  %v412_v17 = vunpack.c.h.b16 %v3630_v27  ;;  %v2561_v27 = vld [vmem:[#allocation2] sm:$0xf]  ;;  %v413_v48 = vunpack.c.l.b16 %v3708_v57  ;;  %v2579_v51 = vld [vmem:[#allocation2 + $0x28] sm:$0xf0]  ;;  %vm1457_vm5 = vcmask 588804  }
  0xaa   :  { %232 = vst [vmem:[#allocation2 + $0x98] sm:$0xff] %v226_v54  ;;  %v3221_v54 = vld [vmem:[#allocation2 + $0x3c] sm:$0xf]  ;;  %vm1471_vm11 = vcmask 1031168  }
  0xab   :  { %96 = vst [vmem:[#allocation2 + $0x18] sm:$0xff] %v89_v53  ;;  %v442_v9 = vpack.c.b16 %v412_v17, %v412_v17 }
  0xac   :  { %97 = vst [vmem:[#allocation2 + $0x20] sm:$0xff] %v91_v56  ;;  %v164_v58 = vpop.permute.xlu0 %163 }
  0xad   :  { %v191_v36 = vpop.permute.xlu1 %190  ;;  %v167_v59 = vrot.slane %v164_v58, 4  ;;  %v483_v22 = vsel %vm56_vm0, %v442_v9, 0  ;;  %v2601_v9 = vld [vmem:[#allocation2 + $0x40] sm:$0xf] }
  0xae   :  { %v194_v61 = vrot.slane %v191_v36, 4 }
  0xaf   :  { %v171_v62 = vsel %vm56_vm0, %v166_v41, %v167_v59  ;;  %v173_v63 = vsel %vm169_vm6, %v164_v58, %v167_v59  ;;  %v3214_v41 = vld [vmem:[#allocation2 + $0x4] sm:$0xf] }
  0xb0   :  { %v198_v0 = vsel %vm56_vm0, %v193_v55, %v194_v61  ;;  %v200_v1 = vsel %vm196_vm7, %v191_v36, %v194_v61  ;;  %v172_v2 = vsel %vm169_vm6, %v3638_v37, %v171_v62  ;;  %179 = vst.msk [vmem:[#allocation2 + $0x70] sm:$0xff] %vm3620_vm3, %v173_v63  ;;  %v444_v55 = vpack.c.b16 %v414_v60, %v414_v60  ;;  %v3234_v16 = vld [vmem:[#allocation2 + $0xa4] sm:$0xf]  ;;  %vm4452_vm6 = vmor %vm1457_vm5, %vm56_vm0 }
  0xb1   :  { %v199_v4 = vsel %vm196_vm7, %v3649_v52, %v198_v0  ;;  %206 = vst.msk [vmem:[#allocation2 + $0x88] sm:$0xff] %vm3620_vm3, %v200_v1  ;;  %v2641_v7 = vld [vmem:[#allocation2 + $0x98] sm:$0xf]  ;;  %v3233_v15 = vld [vmem:[#allocation2 + $0x9c] sm:$0xf]  ;;  %v2654_v32 = vor.u32 %v3234_v16, %v2651_v19  ;;  %v443_v60 = vpack.c.b16 %v413_v48, %v413_v48  ;;  %vm1572_vm7 = vcmask 867328  }
  0xb2   :  { %205 = vst [vmem:[#allocation2 + $0x80] sm:$0xff] %v199_v4  ;;  %v3217_v5 = vld [vmem:[#allocation2 + $0x14] sm:$0xf0]  ;;  %v2563_v10 = vld [vmem:[#allocation2 + $0x18] sm:$0xf0]  ;;  %v2642_v12 = vor.u32 %v3236_v3, %v2641_v7  ;;  %v489_v23 = vsel %vm56_vm0, %v444_v55, 0  ;;  %v2646_v31 = vor.u32 %v3233_v15, %v2643_v28 }
  0xb3   :  { %178 = vst [vmem:[#allocation2 + $0x68] sm:$0xff] %v172_v2  ;;  %v2562_v37 = vor.u32 %v3217_v5, %v2561_v27  ;;  %v2566_v13 = vor.u32 %v3214_v41, %v2563_v10  ;;  %v3218_v61 = vld [vmem:[#allocation2 + $0x1c] sm:$0xf0]  ;;  %v2571_v62 = vld [vmem:[#allocation2 + $0x20] sm:$0xf0]  ;;  %v486_v0 = vsel %vm56_vm0, %v443_v60, 0 }
  0xb4   :  { %523 = vmatpush.bf16.msra.mxu2 %v2642_v12  ;;  %v137_v52 = vpop.permute.xlu0 %136  ;;  %v2649_v1 = vld [vmem:[#allocation2 + $0xa0] sm:$0xf]  ;;  %v3237_v2 = vld [vmem:[#allocation2 + $0xb4] sm:$0xf0]  ;;  %v3219_v10 = vld [vmem:[#allocation2 + $0x24] sm:$0xf0] }
  0xb5   :  { %498 = vmatpush.bf16.msra.mxu0 %v2562_v37  ;;  %512 = vmatpush.bf16.msra.mxu1 %v2566_v13  ;;  %v52_v20 = vpop.permute.xlu1 %51  ;;  %v140_v24 = vrot.slane %v137_v52, 4  ;;  %v2650_v27 = vor.u32 %v3237_v2, %v2649_v1  ;;  %vm2080_vm5 = vcmask 1041152  }
  0xb6   :  { %v55_v26 = vrot.slane %v52_v20, 4 }
  0xb7   :  { %v144_v29 = vsel %vm56_vm0, %v139_v8, %v140_v24  ;;  %v146_v30 = vsel %vm142_vm9, %v137_v52, %v140_v24  ;;  %v3228_v8 = vld [vmem:[#allocation2 + $0x74] sm:$0xf]  ;;  %v2625_v3 = vld [vmem:[#allocation2 + $0x70] sm:$0xf] }
  0xb8   :  { %v60_v33 = vsel %vm56_vm0, %v54_v11, %v55_v26  ;;  %v62_v34 = vsel %vm58_vm10, %v52_v20, %v55_v26  ;;  %v145_v35 = vsel %vm142_vm9, %v3668_v6, %v144_v29  ;;  %152 = vst.msk [vmem:[#allocation2 + $0x58] sm:$0xff] %vm3620_vm3, %v146_v30  ;;  %2655 = vmatmul.msk.bf16.vlgmr.msra.gmra.mxu0 %vm469_vm12, %v3734_v14  ;;  %v2627_v38 = vld [vmem:[#allocation2 + $0x88] sm:$0xf0]  ;;  %v3231_v4 = vld [vmem:[#allocation2 + $0x84] sm:$0xf0]  ;;  %vm1488_vm9 = vcmask 1022976  }
  0xb9   :  { %536 = vmatpush.bf16.msrb.mxu0 %v483_v22  ;;  %564 = vmatpush.bf16.msrb.mxu1 %v489_v23  ;;  %v61_v39 = vsel %vm58_vm10, %v3681_v25, %v60_v33  ;;  %71 = vst.msk [vmem:[#allocation2 + $0x10] sm:$0xff] %vm3620_vm3, %v62_v34  ;;  %v3230_v11 = vld [vmem:[#allocation2 + $0x7c] sm:$0xf0]  ;;  %v2619_v40 = vld [vmem:[#allocation2 + $0x80] sm:$0xf0]  ;;  %v2630_v45 = vor.u32 %v3228_v8, %v2627_v38 }
  0xba   :  { %2656 = vmatmul.msk.bf16.vlgmr.msra.gmra.mxu1 %vm469_vm12, %v3734_v14  ;;  %67 = vst [vmem:[#allocation2 + $0x8] sm:$0xff] %v61_v39  ;;  %v2617_v6 = vld [vmem:[#allocation2 + $0x68] sm:$0xf]  ;;  %v3227_v42 = vld [vmem:[#allocation2 + $0x6c] sm:$0xf]  ;;  %v2626_v41 = vor.u32 %v3231_v4, %v2625_v3 }
  0xbb   :  { %151 = vst [vmem:[#allocation2 + $0x50] sm:$0xff] %v145_v35  ;;  %v2618_v43 = vor.u32 %v3230_v11, %v2617_v6  ;;  %v2622_v44 = vor.u32 %v3227_v42, %v2619_v40 }
  0xbd   :  { %537 = vmatpush.bf16.msrb.mxu0 %v2646_v31  ;;  %565 = vmatpush.bf16.msrb.mxu1 %v2654_v32 }
  0xbe   :  { %524 = vmatpush.bf16.msra.mxu2 %v2618_v43 }
  0xbf   :  { %v2603_v47 = vld [vmem:[#allocation2 + $0x58] sm:$0xf0]  ;;  %v3225_v7 = vld [vmem:[#allocation2 + $0x54] sm:$0xf0] }
  0xc0   :  { %v2606_v25 = vor.u32 %v3222_v46, %v2603_v47  ;;  %v3216_v50 = vld [vmem:[#allocation2 + $0x14] sm:$0xf]  ;;  %v2602_v55 = vor.u32 %v3225_v7, %v2601_v9  ;;  %v2577_v5 = vld [vmem:[#allocation2 + $0x10] sm:$0xf] }
  0xc1   :  { %538 = vmatpush.bf16.msrb.mxu0 %v2622_v44  ;;  %566 = vmatpush.bf16.msrb.mxu1 %v2630_v45  ;;  %v2582_v36 = vor.u32 %v3216_v50, %v2579_v51  ;;  %v2569_v59 = vld [vmem:[#allocation2 + $0x8] sm:$0xf]  ;;  %v3215_v17 = vld [vmem:[#allocation2 + $0xc] sm:$0xf]  ;;  %v2578_v12 = vor.u32 %v3219_v10, %v2577_v5 }
  0xc2   :  { %v3224_v53 = vld [vmem:[#allocation2 + $0x4c] sm:$0xf0]  ;;  %v2595_v56 = vld [vmem:[#allocation2 + $0x50] sm:$0xf0]  ;;  %v2570_v63 = vor.u32 %v3218_v61, %v2569_v59  ;;  %v2574_v57 = vor.u32 %v3215_v17, %v2571_v62 }
  0xc3   :  { %v2594_v21 = vor.u32 %v3224_v53, %v2593_v49  ;;  %v2598_v58 = vor.u32 %v3221_v54, %v2595_v56 }
  0xc5   :  { %567 = vmatpush.bf16.msrb.mxu1 %v2606_v25  ;;  %525 = vmatpush.bf16.msra.mxu2 %v2594_v21 }
  0xc6   :  { %539 = vmatpush.bf16.msrb.mxu0 %v2598_v58 }
  0xc9   :  { %568 = vmatpush.bf16.msrb.mxu1 %v2582_v36  ;;  %526 = vmatpush.bf16.msra.mxu2 %v2570_v63 }
  0xca   :  { %540 = vmatpush.bf16.msrb.mxu0 %v2574_v57 }
  0xcc   :  { %2660 = vmatmul.msk.bf16.vlgmr.msrb.gmra.mxu1 %vm469_vm12, %v3734_v14  ;;  %2657 = vmatmul.msk.bf16.vlgmr.msra.gmra.mxu2 %vm469_vm12, %v3734_v14 }
  0xcd   :  { %2658 = vmatmul.msk.bf16.vlgmr.msrb.gmra.mxu0 %vm469_vm12, %v3734_v14 }
  0xce   :  { %550 = vmatpush.bf16.msra.mxu0 %v486_v0 }
  0xd2   :  { %551 = vmatpush.bf16.msra.mxu0 %v2650_v27 }
  0xd6   :  { %552 = vmatpush.bf16.msra.mxu0 %v2626_v41 }
  0xda   :  { %553 = vmatpush.bf16.msra.mxu0 %v2602_v55 }
  0xde   :  { %554 = vmatpush.bf16.msra.mxu0 %v2578_v12 }
  0xe1   :  { %2659 = vmatmul.msk.bf16.vlgmr.msra.gmra.mxu0 %vm469_vm12, %v3734_v14  ;;  %vm1589_vm12 = vcmask 859136  }
  0xf7   :  { %v322_v37 = vpop.permute.xlu0 %321 }
 0x11b   :  { %v327_v22 = vpop.permute.xlu1 %326 }
 0x135   :  { %v500_v13 = vpop.f32.mrf.mxu0 }
 0x136   :  { %v3768_v15 = vadd.f32 %v500_v13, %v322_v37 }
 0x137   :  { %v514_v52 = vpop.f32.mrf.mxu1 }
 0x138   :  { %v3770_v16 = vadd.f32 %v514_v52, %v322_v37  ;;  %v575_v19 = vmax.f32 %v3768_v15, 0.0 }
 0x13a   :  { %v576_v20 = vmax.f32 %v3770_v16, 0.0 }
 0x13c   :  { %v3399_v14 = vpack.i.bf16 %v576_v20, %v575_v19 }
 0x13d   :  { %v502_v23 = vpop.f32.mrf.mxu0 }
 0x13e   :  { %v3774_v26 = vadd.f32 %v502_v23, %v327_v22  ;;  %3400 = vrot.lane.b32.xlu2 %v3399_v14, %s3518_s1 }
 0x13f   :  { %v516_v24 = vpop.f32.mrf.mxu1 }
 0x140   :  { %v3776_v28 = vadd.f32 %v516_v24, %v327_v22  ;;  %v581_v29 = vmax.f32 %v3774_v26, 0.0  ;;  %v2719_v26 = vld [vmem:[%s4760_s3 + $0x70] sm:$0xf] }
 0x142   :  { %v582_v30 = vmax.f32 %v3776_v28, 0.0 }
 0x149   :  { %v570_v39 = vpop.f32.mrf.mxu1 }
 0x14a   :  { %v542_v31 = vpop.f32.mrf.mxu0  ;;  %v571_v40 = vadd.f32 %v570_v39, %v322_v37  ;;  %v2711_v39 = vld [vmem:[%s4760_s3 + $0x60] sm:$0xf] }
 0x14b   :  { %v543_v32 = vadd.f32 %v542_v31, %v322_v37  ;;  %v3253_v31 = vld [vmem:[%s4760_s3 + $0x74] sm:$0xf0] }
 0x14c   :  { %v580_v47 = vmax.f32 %v571_v40, 0.0 }
 0x14d   :  { %v3787_v8 = vmax.f32 %v543_v32, 0.0  ;;  %v2775_v32 = vld [vmem:[%s4760_s3 + $0xe0] sm:$0xf] }
 0x14f   :  { %v528_v33 = vpop.f32.mrf.mxu2 }
 0x150   :  { %v3785_v34 = vadd.f32 %v528_v33, %v322_v37  ;;  %v3267_v33 = vld [vmem:[%s4760_s3 + $0xe4] sm:$0xf0] }
 0x151   :  { %v572_v49 = vpop.f32.mrf.mxu1 }
 0x152   :  { %v544_v35 = vpop.f32.mrf.mxu0  ;;  %v577_v38 = vmax.f32 %v3785_v34, 0.0  ;;  %v573_v54 = vadd.f32 %v572_v49, %v327_v22  ;;  %v3249_v49 = vld [vmem:[%s4760_s3 + $0x54] sm:$0xf0]  ;;  %v3283_v34 = vld [vmem:[%s4760_s3 + $0x164] sm:$0xf0] }
 0x153   :  { %v545_v11 = vadd.f32 %v544_v35, %v327_v22  ;;  %v2720_v35 = vor.u32 %v3253_v31, %v2719_v26 }
 0x154   :  { %v3404_v43 = vpack.i.bf16 %v581_v29, %v577_v38  ;;  %v586_v58 = vmax.f32 %v573_v54, 0.0 }
 0x155   :  { %v3796_v44 = vmax.f32 %v545_v11, 0.0  ;;  %v3251_v11 = vld [vmem:[%s4760_s3 + $0x64] sm:$0xf0]  ;;  %1296 = vmatpush.bf16.msrb.mxu2 %v2720_v35  ;;  %v2839_v35 = vld [vmem:[%s4760_s3 + $0x160] sm:$0xf] }
 0x156   :  { %3405 = vrot.lane.b32.xlu1 %v3404_v43, %s3518_s1 }
 0x157   :  { %v530_v6 = vpop.f32.mrf.mxu2  ;;  %v3414_v51 = vpack.i.bf16 %v3796_v44, %v3787_v8 }
 0x158   :  { %v3790_v42 = vadd.f32 %v530_v6, %v327_v22  ;;  %v2776_v6 = vor.u32 %v3267_v33, %v2775_v32  ;;  %v2743_v33 = vld [vmem:[%s4760_s3 + $0xa0] sm:$0xf] }
 0x159   :  { %3415 = vrot.lane.b32.xlu0 %v3414_v51, %s3518_s1 }
 0x15a   :  { %v583_v45 = vmax.f32 %v3790_v42, 0.0 }
 0x15c   :  { %v3409_v53 = vpack.i.bf16 %v583_v45, %v582_v30 }
 0x15e   :  { %v556_v46 = vpop.f32.mrf.mxu0  ;;  %3410 = vrot.lane.b32.xlu2 %v3409_v53, %s3518_s1 }
 0x15f   :  { %v557_v25 = vadd.f32 %v556_v46, %v322_v37  ;;  %v2712_v46 = vor.u32 %v3251_v11, %v2711_v39  ;;  %v3259_v39 = vld [vmem:[%s4760_s3 + $0xa4] sm:$0xf0]  ;;  %v2903_v11 = vld [vmem:[%s4760_s3 + $0x1e0] sm:$0xf] }
 0x161   :  { %v579_v48 = vmax.f32 %v557_v25, 0.0  ;;  %v3265_v25 = vld [vmem:[%s4760_s3 + $0xd4] sm:$0xf0]  ;;  %1297 = vmatpush.bf16.msrb.mxu2 %v2712_v46 }
 0x163   :  { %v589_v50 = vpack.c.bf16 %v580_v47, %v579_v48  ;;  %v2767_v47 = vld [vmem:[%s4760_s3 + $0xd0] sm:$0xf] }
 0x164   :  { %v2703_v48 = vld [vmem:[%s4760_s3 + $0x50] sm:$0xf]  ;;  %v2768_v54 = vor.u32 %v3265_v25, %v2767_v47  ;;  %v2679_v25 = vld [vmem:[%s4760_s3 + $0x20] sm:$0xf] }
 0x165   :  { %595 = vst.msk [vmem:[#allocation3 + $0x10] sm:$0xff] %vm3620_vm3, %v589_v50 }
 0x166   :  { %v558_v56 = vpop.f32.mrf.mxu0 }
 0x167   :  { %v559_v21 = vadd.f32 %v558_v56, %v327_v22  ;;  %v2704_v56 = vor.u32 %v3249_v49, %v2703_v48  ;;  %v3243_v48 = vld [vmem:[%s4760_s3 + $0x24] sm:$0xf0]  ;;  %v3994_v49 = vld [vmem:[%s4760_s3 + $0x270] sm:$0x77] }
 0x169   :  { %v585_v36 = vmax.f32 %v559_v21, 0.0  ;;  %v2759_v21 = vld [vmem:[%s4760_s3 + $0xc0] sm:$0xf]  ;;  %1298 = vmatpush.bf16.msrb.mxu2 %v2704_v56  ;;  %v3281_v56 = vld [vmem:[%s4760_s3 + $0x154] sm:$0xf0] }
 0x16b   :  { %v592_v59 = vpack.c.bf16 %v586_v58, %v585_v36  ;;  %v3263_v58 = vld [vmem:[%s4760_s3 + $0xc4] sm:$0xf0]  ;;  %v2695_v36 = vld [vmem:[%s4760_s3 + $0x40] sm:$0xf] }
 0x16c   :  { %v3810_v17 = vld [vmem:[#allocation3 + $0x10] sm:$0xff] }
 0x16d   :  { %598 = vst.msk [vmem:[#allocation3 + $0x28] sm:$0xff] %vm3620_vm3, %v592_v59  ;;  %v682_v61 = vunpack.c.l.bf16 %v3810_v17  ;;  %v683_v63 = vunpack.c.h.bf16 %v3810_v17  ;;  %v3858_v15 = vld [vmem:[#allocation3 + $0x10] sm:$0xf]  ;;  %v3247_v59 = vld [vmem:[%s4760_s3 + $0x44] sm:$0xf0]  ;;  %v2840_v17 = vor.u32 %v3283_v34, %v2839_v35  ;;  %vm1438_vm3 = vcmask 785412  }
 0x16e   :  { %v3239_v35 = vld [vmem:[%s4760_s3 + $0x4] sm:$0xf0]  ;;  %vm1439_vm4 = vmor %vm1438_vm3, %vm56_vm0  ;;  %vm1555_vm0 = vcmask 875520   ;;  %vm2054_vm3 = vcmask 516352  }
 0x174   :  { %v3812_v60 = vld [vmem:[#allocation3 + $0x28] sm:$0xff] }
 0x175   :  { %v684_v62 = vunpack.c.l.bf16 %v3812_v60  ;;  %v685_v57 = vunpack.c.h.bf16 %v3812_v60  ;;  %v3854_v14 = vld [vmem:[#allocation3 + $0x28] sm:$0xf]  ;;  %v2735_v60 = vld [vmem:[%s4760_s3 + $0x90] sm:$0xf] }
 0x176   :  { %v614_v16 = vunpack.c.l.bf16 %v3854_v14 }
 0x177   :  { %v3419_v0 = vpack.i.bf16 %v684_v62, %v682_v61  ;;  %v3424_v18 = vpack.i.bf16 %v685_v57, %v683_v63 }
 0x179   :  { %3420 = vrot.lane.b32.xlu1 %v3419_v0, %s3518_s1  ;;  %3425 = vrot.lane.b32.xlu2 %v3424_v18, %s3518_s1  ;;  %v2751_v18 = vld [vmem:[%s4760_s3 + $0xb0] sm:$0xf] }
 0x198   :  { %v3401_v1 = vpop.permute.xlu2 %3400 }
 0x199   :  { %v3403_v27 = vunpack.i.h.bf16 %v3401_v1  ;;  %v3402_v3 = vunpack.i.l.bf16 %v3401_v1 }
 0x19b   :  { %v646_v9 = vsel %vm645_vm13, %v3402_v3, %v3403_v27  ;;  %v3261_v3 = vld [vmem:[%s4760_s3 + $0xb4] sm:$0xf0] }
 0x19c   :  { %v3838_v13 = vmax.f32 %v575_v19, %v646_v9  ;;  %v2783_v19 = vld [vmem:[%s4760_s3 + $0xf0] sm:$0xf]  ;;  %v2752_v32 = vor.u32 %v3261_v3, %v2751_v18  ;;  %v3297_v18 = vld [vmem:[%s4760_s3 + $0x1d4] sm:$0xf0] }
 0x1b8   :  { %v3828_v2 = vpop.permute.xlu2 %3410 }
 0x1b9   :  { %v3413_v4 = vunpack.i.h.bf16 %v3828_v2  ;;  %v3412_v41 = vunpack.i.l.bf16 %v3828_v2 }
 0x1bb   :  { %v651_v55 = vsel %vm645_vm13, %v3412_v41, %v3413_v4 }
 0x1bc   :  { %v3840_v52 = vmax.f32 %v582_v30, %v651_v55  ;;  %v2696_v55 = vor.u32 %v3247_v59, %v2695_v36  ;;  %v2680_v36 = vor.u32 %v3243_v48, %v2679_v25  ;;  %v3248_v48 = vld [vmem:[%s4760_s3 + $0x54] sm:$0xf] }
 0x1be   :  { %1299 = vmatpush.bf16.msrb.mxu2 %v2696_v55 }
 0x1c8   :  { %v3406_v7 = vpop.permute.xlu1 %3405 }
 0x1c9   :  { %v3408_v5 = vunpack.i.h.bf16 %v3406_v7  ;;  %v3407_v10 = vunpack.i.l.bf16 %v3406_v7  ;;  %v3285_v7 = vld [vmem:[%s4760_s3 + $0x174] sm:$0xf0] }
 0x1cb   :  { %v647_v12 = vsel %vm645_vm13, %v3403_v27, %v3407_v10  ;;  %v650_v37 = vsel %vm645_vm13, %v3408_v5, %v3412_v41  ;;  %v3416_v43 = vpop.permute.xlu0 %3415  ;;  %v2760_v27 = vor.u32 %v3263_v58, %v2759_v21  ;;  %v2847_v41 = vld [vmem:[%s4760_s3 + $0x170] sm:$0xf]  ;;  %v2744_v58 = vor.u32 %v3259_v39, %v2743_v33  ;;  %v2663_v33 = vld [vmem:[%s4760_s3] sm:$0xf] }
 0x1cc   :  { %v3844_v22 = vmax.f32 %v576_v20, %v647_v12  ;;  %v3848_v23 = vmax.f32 %v581_v29, %v650_v37  ;;  %v3269_v20 = vld [vmem:[%s4760_s3 + $0xf4] sm:$0xf0]  ;;  %v609_v29 = vunpack.c.l.bf16 %v3858_v15  ;;  %v3903_v51 = vunpack.i.h.bf16 %v3416_v43  ;;  %v2857_v15 = vld [vmem:[%s4760_s3 + $0x188] sm:$0xf0] }
 0x1cd   :  { %v2784_v30 = vor.u32 %v3269_v20, %v2783_v19  ;;  %v3905_v53 = vunpack.i.l.bf16 %v3416_v43  ;;  %v2848_v5 = vor.u32 %v3285_v7, %v2847_v41  ;;  %v3245_v19 = vld [vmem:[%s4760_s3 + $0x34] sm:$0xf0]  ;;  %v2671_v41 = vld [vmem:[%s4760_s3 + $0x10] sm:$0xf]  ;;  %v2664_v39 = vor.u32 %v3239_v35, %v2663_v33  ;;  %v3307_v33 = vld [vmem:[%s4760_s3 + $0x224] sm:$0xf0] }
 0x1ce   :  { %v3434_v24 = vpack.i.bf16 %v3840_v52, %v3848_v23  ;;  %v3429_v28 = vpack.i.bf16 %v3844_v22, %v3838_v13  ;;  %v3444_v40 = vpack.i.bf16 %v614_v16, %v609_v29  ;;  %v652_v2 = vsel %vm645_vm13, %v3413_v4, %v3903_v51  ;;  %v2911_v4 = vld [vmem:[%s4760_s3 + $0x1f0] sm:$0xf]  ;;  %v3241_v7 = vld [vmem:[%s4760_s3 + $0x14] sm:$0xf0] }
 0x1cf   :  { %1310 = vmatpush.bf16.msra.mxu3 %v2784_v30  ;;  %v648_v1 = vsel %vm645_vm13, %v3407_v10, %v3905_v53  ;;  %v3301_v10 = vld [vmem:[%s4760_s3 + $0x1f4] sm:$0xf0]  ;;  %v3955_v31 = vmax.f32 %v583_v45, %v652_v2  ;;  %1324 = vmatpush.bf16.msrb.mxu0 %v2848_v5  ;;  %v3279_v2 = vld [vmem:[%s4760_s3 + $0x144] sm:$0xf0] }
 0x1d0   :  { %3435 = vrot.lane.b32.xlu1 %v3434_v24, %s3519_s17  ;;  %3430 = vrot.lane.b32.xlu0 %v3429_v28, %s3519_s17  ;;  %v2687_v28 = vld [vmem:[%s4760_s3 + $0x30] sm:$0xf]  ;;  %v2912_v20 = vor.u32 %v3301_v10, %v2911_v4  ;;  %v3951_v30 = vmax.f32 %v577_v38, %v648_v1  ;;  %v2823_v1 = vld [vmem:[%s4760_s3 + $0x140] sm:$0xf] }
 0x1d1   :  { %v2688_v47 = vor.u32 %v3245_v19, %v2687_v28  ;;  %v2887_v4 = vld [vmem:[%s4760_s3 + $0x1c0] sm:$0xf]  ;;  %v3295_v10 = vld [vmem:[%s4760_s3 + $0x1c4] sm:$0xf0]  ;;  %v2824_v19 = vor.u32 %v3279_v2, %v2823_v1  ;;  %v3242_v2 = vld [vmem:[%s4760_s3 + $0x24] sm:$0xf] }
 0x1d2   :  { %1338 = vmatpush.bf16.msra.mxu1 %v2912_v20  ;;  %v2672_v20 = vor.u32 %v3241_v7, %v2671_v41  ;;  %v2815_v41 = vld [vmem:[%s4760_s3 + $0x130] sm:$0xf]  ;;  %v3277_v7 = vld [vmem:[%s4760_s3 + $0x134] sm:$0xf0] }
 0x1d3   :  { %v3426_v50 = vpop.permute.xlu2 %3425  ;;  %1311 = vmatpush.bf16.msra.mxu3 %v2776_v6  ;;  %1325 = vmatpush.bf16.msrb.mxu0 %v2840_v17 }
 0x1d4   :  { %v3427_v0 = vunpack.i.l.bf16 %v3426_v50  ;;  %v3428_v12 = vunpack.i.h.bf16 %v3426_v50  ;;  %1300 = vmatpush.bf16.msrb.mxu2 %v2688_v47  ;;  %v3315_v47 = vld [vmem:[%s4760_s3 + $0x264] sm:$0xf0] }
 0x1d6   :  { %v710_v26 = vmax.f32 %v683_v63, %v3427_v0  ;;  %v3998_v50 = vmax.f32 %v685_v57, %v3428_v12  ;;  %v1122_v57 = vunpack.c.l.b16 %v3994_v49 }
 0x1d7   :  { %1312 = vmatpush.bf16.msra.mxu3 %v2768_v54  ;;  %v2831_v54 = vld [vmem:[%s4760_s3 + $0x150] sm:$0xf] }
 0x1d8   :  { %3445 = vrot.lane.b32.xlu0 %v3444_v40, %s3518_s1  ;;  %v3299_v40 = vld [vmem:[%s4760_s3 + $0x1e4] sm:$0xf0]  ;;  %v2832_v59 = vor.u32 %v3281_v56, %v2831_v54  ;;  %1301 = vmatpush.bf16.msrb.mxu2 %v2680_v36  ;;  %v1202_v34 = vpack.c.b16 %v1122_v57, %v1122_v57  ;;  %v3313_v54 = vld [vmem:[%s4760_s3 + $0x254] sm:$0xf0]  ;;  %v2951_v57 = vld [vmem:[%s4760_s3 + $0x240] sm:$0xf] }
 0x1da   :  { %1326 = vmatpush.bf16.msrb.mxu0 %v2832_v59  ;;  %v3311_v59 = vld [vmem:[%s4760_s3 + $0x244] sm:$0xf0] }
 0x1db   :  { %1313 = vmatpush.bf16.msra.mxu3 %v2760_v27  ;;  %v3439_v27 = vpack.i.bf16 %v3955_v31, %v3951_v30 }
 0x1dc   :  { %1302 = vmatpush.bf16.msrb.mxu2 %v2672_v20 }
 0x1dd   :  { %3440 = vrot.lane.b32.xlu2 %v3439_v27, %s3519_s17  ;;  %v2681_v27 = vld [vmem:[%s4760_s3 + $0x28] sm:$0xf0] }
 0x1de   :  { %1327 = vmatpush.bf16.msrb.mxu0 %v2824_v19  ;;  %v2871_v19 = vld [vmem:[%s4760_s3 + $0x1a0] sm:$0xf] }
 0x1df   :  { %1314 = vmatpush.bf16.msra.mxu3 %v2752_v32  ;;  %v2721_v32 = vld [vmem:[%s4760_s3 + $0x78] sm:$0xf0] }
 0x1e0   :  { %1303 = vmatpush.bf16.msrb.mxu2 %v2664_v39  ;;  %v3238_v39 = vld [vmem:[%s4760_s3 + $0x4] sm:$0xf] }
 0x1e3   :  { %1315 = vmatpush.bf16.msra.mxu3 %v2744_v58  ;;  %v2697_v58 = vld [vmem:[%s4760_s3 + $0x48] sm:$0xf0] }
 0x1eb   :  { %v3421_v9 = vpop.permute.xlu1 %3420 }
 0x1ec   :  { %v3423_v37 = vunpack.i.h.bf16 %v3421_v9  ;;  %v3422_v24 = vunpack.i.l.bf16 %v3421_v9 }
 0x1ee   :  { %v700_v38 = vsel %vm645_vm13, %v3903_v51, %v3423_v37  ;;  %v698_v42 = vsel %vm645_vm13, %v3905_v53, %v3422_v24  ;;  %v699_v45 = vsel %vm645_vm13, %v3422_v24, %v3427_v0  ;;  %v701_v63 = vsel %vm645_vm13, %v3423_v37, %v3428_v12  ;;  %v2895_v0 = vld [vmem:[%s4760_s3 + $0x1d0] sm:$0xf]  ;;  %v2727_v12 = vld [vmem:[%s4760_s3 + $0x80] sm:$0xf]  ;;  %v3255_v37 = vld [vmem:[%s4760_s3 + $0x84] sm:$0xf0] }
 0x1ef   :  { %v711_v6 = vmax.f32 %v3796_v44, %v700_v38  ;;  %v708_v43 = vmax.f32 %v3787_v8, %v698_v42  ;;  %v709_v46 = vmax.f32 %v682_v61, %v699_v45  ;;  %v2904_v61 = vor.u32 %v3299_v40, %v2903_v11  ;;  %v3250_v11 = vld [vmem:[%s4760_s3 + $0x64] sm:$0xf]  ;;  %v2713_v40 = vld [vmem:[%s4760_s3 + $0x68] sm:$0xf0] }
 0x1f0   :  { %v712_v21 = vmax.f32 %v684_v62, %v701_v63  ;;  %v3257_v62 = vld [vmem:[%s4760_s3 + $0x94] sm:$0xf0]  ;;  %v2896_v9 = vor.u32 %v3297_v18, %v2895_v0  ;;  %v3520_v24 = vmov 65535   ;;  %v2888_v38 = vor.u32 %v3295_v10, %v2887_v4  ;;  %v2943_v4 = vld [vmem:[%s4760_s3 + $0x230] sm:$0xf] }
 0x1f1   :  { %1339 = vmatpush.bf16.msra.mxu1 %v2904_v61  ;;  %v3449_v3 = vpack.i.bf16 %v710_v26, %v709_v46  ;;  %v3459_v55 = vpack.i.bf16 %v711_v6, %v708_v43  ;;  %v2736_v5 = vor.u32 %v3257_v62, %v2735_v60  ;;  %v1288_v28 = vsel %vm1286_vm14, 4294967295, %v3520_v24  ;;  %v3252_v26 = vld [vmem:[%s4760_s3 + $0x74] sm:$0xf]  ;;  %v2967_v46 = vld [vmem:[%s4760_s3 + $0x260] sm:$0xf] }
 0x1f2   :  { %v2728_v42 = vor.u32 %v3255_v37, %v2727_v12  ;;  %v4064_v45 = vsel %vm1287_vm15, %v1288_v28, 0  ;;  %v2724_v63 = vor.u32 %v3252_v26, %v2721_v32  ;;  %v3454_v6 = vpack.i.bf16 %v3998_v50, %v712_v21  ;;  %v2705_v50 = vld [vmem:[%s4760_s3 + $0x58] sm:$0xf0]  ;;  %v2959_v61 = vld [vmem:[%s4760_s3 + $0x250] sm:$0xf] }
 0x1f3   :  { %3450 = vrot.lane.b32.xlu1 %v3449_v3, %s3519_s17  ;;  %3460 = vrot.lane.b32.xlu0 %v3459_v55, %s3519_s17  ;;  %v1291_v43 = vand.u32 %v4064_v45, %v1202_v34  ;;  %v2716_v25 = vor.u32 %v3250_v11, %v2713_v40  ;;  %v2968_v17 = vor.u32 %v3315_v47, %v2967_v46  ;;  %v3246_v21 = vld [vmem:[%s4760_s3 + $0x44] sm:$0xf]  ;;  %v3244_v60 = vld [vmem:[%s4760_s3 + $0x34] sm:$0xf]  ;;  %vm1941_vm15 = vcmask 965632  }
 0x1f4   :  { %1316 = vmatpush.bf16.msra.mxu3 %v2736_v5  ;;  %3455 = vrot.lane.b32.xlu2 %v3454_v6, %s3519_s17  ;;  %v2708_v56 = vor.u32 %v3248_v48, %v2705_v50  ;;  %v2960_v36 = vor.u32 %v3313_v54, %v2959_v61  ;;  %v2700_v0 = vor.u32 %v3246_v21, %v2697_v58  ;;  %v2689_v62 = vld [vmem:[%s4760_s3 + $0x38] sm:$0xf0]  ;;  %v3293_v5 = vld [vmem:[%s4760_s3 + $0x1b4] sm:$0xf0]  ;;  %v2807_v24 = vld [vmem:[%s4760_s3 + $0x120] sm:$0xf] }
 0x1f5   :  { %1340 = vmatpush.bf16.msra.mxu1 %v2896_v9  ;;  %1352 = vmatpush.bf16.msra.mxu2 %v1291_v43  ;;  %v2952_v18 = vor.u32 %v3311_v59, %v2951_v57  ;;  %v2692_v1 = vor.u32 %v3244_v60, %v2689_v62  ;;  %v2684_v3 = vor.u32 %v3242_v2, %v2681_v27  ;;  %v2879_v9 = vld [vmem:[%s4760_s3 + $0x1b0] sm:$0xf]  ;;  %v3309_v10 = vld [vmem:[%s4760_s3 + $0x234] sm:$0xf0]  ;;  %v3275_v28 = vld [vmem:[%s4760_s3 + $0x124] sm:$0xf0] }
 0x1f6   :  { %v2816_v55 = vor.u32 %v3277_v7, %v2815_v41  ;;  %v2880_v12 = vor.u32 %v3293_v5, %v2879_v9  ;;  %v2944_v37 = vor.u32 %v3309_v10, %v2943_v4  ;;  %v2808_v20 = vor.u32 %v3275_v28, %v2807_v24  ;;  %v3291_v26 = vld [vmem:[%s4760_s3 + $0x1a4] sm:$0xf0]  ;;  %v2935_v32 = vld [vmem:[%s4760_s3 + $0x220] sm:$0xf]  ;;  %v2665_v11 = vld [vmem:[%s4760_s3 + $0x8] sm:$0xf0] }
 0x1f7   :  { %v2872_v35 = vor.u32 %v3291_v26, %v2871_v19  ;;  %v2936_v34 = vor.u32 %v3307_v33, %v2935_v32  ;;  %v2668_v40 = vor.u32 %v3238_v39, %v2665_v11  ;;  %v2799_v6 = vld [vmem:[%s4760_s3 + $0x110] sm:$0xf]  ;;  %v3273_v43 = vld [vmem:[%s4760_s3 + $0x114] sm:$0xf0]  ;;  %v2791_v54 = vld [vmem:[%s4760_s3 + $0x100] sm:$0xf] }
 0x1f8   :  { %1317 = vmatpush.bf16.msra.mxu3 %v2728_v42  ;;  %1328 = vmatpush.bf16.msrb.mxu0 %v2816_v55  ;;  %v2673_v42 = vld [vmem:[%s4760_s3 + $0x18] sm:$0xf0]  ;;  %v2863_v46 = vld [vmem:[%s4760_s3 + $0x190] sm:$0xf]  ;;  %v2800_v47 = vor.u32 %v3273_v43, %v2799_v6  ;;  %v3305_v50 = vld [vmem:[%s4760_s3 + $0x214] sm:$0xf0] }
 0x1f9   :  { %1341 = vmatpush.bf16.msra.mxu1 %v2888_v38  ;;  %1353 = vmatpush.bf16.msra.mxu2 %v2968_v17  ;;  %v3240_v38 = vld [vmem:[%s4760_s3 + $0x14] sm:$0xf]  ;;  %v2927_v48 = vld [vmem:[%s4760_s3 + $0x210] sm:$0xf]  ;;  %v2855_v21 = vld [vmem:[%s4760_s3 + $0x180] sm:$0xf] }
 0x1fa   :  { %v2928_v61 = vor.u32 %v3305_v50, %v2927_v48  ;;  %v2919_v57 = vld [vmem:[%s4760_s3 + $0x200] sm:$0xf]  ;;  %v3303_v59 = vld [vmem:[%s4760_s3 + $0x204] sm:$0xf0]  ;;  %v3268_v60 = vld [vmem:[%s4760_s3 + $0xf4] sm:$0xf] }
 0x1fb   :  { %v2785_v62 = vld [vmem:[%s4760_s3 + $0xf8] sm:$0xf0]  ;;  %v3266_v41 = vld [vmem:[%s4760_s3 + $0xe4] sm:$0xf]  ;;  %v2777_v7 = vld [vmem:[%s4760_s3 + $0xe8] sm:$0xf0] }
 0x1fc   :  { %1366 = vmatpush.bf16.msrb.mxu3 %v2724_v63  ;;  %v2676_v63 = vor.u32 %v3240_v38, %v2673_v42  ;;  %1329 = vmatpush.bf16.msrb.mxu0 %v2808_v20  ;;  %v2788_v2 = vor.u32 %v3268_v60, %v2785_v62  ;;  %v2849_v27 = vld [vmem:[%s4760_s3 + $0x178] sm:$0xf0]  ;;  %v3282_v9 = vld [vmem:[%s4760_s3 + $0x164] sm:$0xf]  ;;  %v2841_v55 = vld [vmem:[%s4760_s3 + $0x168] sm:$0xf0]  ;;  %v2780_v5 = vor.u32 %v3266_v41, %v2777_v7  ;;  %v1123_v20 = vunpack.c.h.b16 %v3994_v49 }
 0x1fd   :  { %1354 = vmatpush.bf16.msra.mxu2 %v2960_v36  ;;  %1342 = vmatpush.bf16.msra.mxu1 %v2880_v12  ;;  %v3287_v36 = vld [vmem:[%s4760_s3 + $0x184] sm:$0xf0]  ;;  %v2844_v4 = vor.u32 %v3282_v9, %v2841_v55  ;;  %v3264_v10 = vld [vmem:[%s4760_s3 + $0xd4] sm:$0xf]  ;;  %v2769_v12 = vld [vmem:[%s4760_s3 + $0xd8] sm:$0xf0] }
 0x1fe   :  { %v2772_v24 = vor.u32 %v3264_v10, %v2769_v12  ;;  %v2833_v28 = vld [vmem:[%s4760_s3 + $0x158] sm:$0xf0]  ;;  %v3262_v26 = vld [vmem:[%s4760_s3 + $0xc4] sm:$0xf]  ;;  %v2761_v32 = vld [vmem:[%s4760_s3 + $0xc8] sm:$0xf0]  ;;  %v1203_v48 = vpack.c.b16 %v1123_v20, %v1123_v20 }
 0x1ff   :  { %v3278_v33 = vld [vmem:[%s4760_s3 + $0x144] sm:$0xf]  ;;  %v2764_v38 = vor.u32 %v3262_v26, %v2761_v32  ;;  %v2825_v49 = vld [vmem:[%s4760_s3 + $0x148] sm:$0xf0]  ;;  %v2913_v6 = vld [vmem:[%s4760_s3 + $0x1f8] sm:$0xf0] }
 0x200   :  { %1367 = vmatpush.bf16.msrb.mxu3 %v2716_v25  ;;  %v3289_v25 = vld [vmem:[%s4760_s3 + $0x194] sm:$0xf0]  ;;  %1330 = vmatpush.bf16.msrb.mxu0 %v2800_v47  ;;  %v2828_v43 = vor.u32 %v3278_v33, %v2825_v49  ;;  %v3260_v50 = vld [vmem:[%s4760_s3 + $0xb4] sm:$0xf]  ;;  %v3258_v60 = vld [vmem:[%s4760_s3 + $0xa4] sm:$0xf]  ;;  %v1294_v9 = vand.u32 %v4064_v45, %v1203_v48 }
 0x201   :  { %1355 = vmatpush.bf16.msra.mxu2 %v2952_v18  ;;  %1343 = vmatpush.bf16.msra.mxu1 %v2872_v35  ;;  %v2864_v17 = vor.u32 %v3289_v25, %v2863_v46  ;;  %v2920_v18 = vor.u32 %v3303_v59, %v2919_v57  ;;  %v3298_v59 = vld [vmem:[%s4760_s3 + $0x1e4] sm:$0xf]  ;;  %v3256_v45 = vld [vmem:[%s4760_s3 + $0x94] sm:$0xf]  ;;  %v2961_v32 = vld [vmem:[%s4760_s3 + $0x258] sm:$0xf0] }
 0x202   :  { %v3314_v55 = vld [vmem:[%s4760_s3 + $0x264] sm:$0xf]  ;;  %v3312_v26 = vld [vmem:[%s4760_s3 + $0x254] sm:$0xf] }
 0x203   :  { %v3254_v49 = vld [vmem:[%s4760_s3 + $0x84] sm:$0xf] }
 0x204   :  { %1368 = vmatpush.bf16.msrb.mxu3 %v2708_v56  ;;  %v3271_v56 = vld [vmem:[%s4760_s3 + $0x104] sm:$0xf0] }
 0x205   :  { %1356 = vmatpush.bf16.msra.mxu2 %v2944_v37  ;;  %v2792_v58 = vor.u32 %v3271_v56, %v2791_v54  ;;  %1344 = vmatpush.bf16.msra.mxu1 %v2864_v17  ;;  %v3280_v37 = vld [vmem:[%s4760_s3 + $0x154] sm:$0xf]  ;;  %v2753_v17 = vld [vmem:[%s4760_s3 + $0xb8] sm:$0xf0] }
 0x206   :  { %v2836_v19 = vor.u32 %v3280_v37, %v2833_v28  ;;  %v2737_v37 = vld [vmem:[%s4760_s3 + $0x98] sm:$0xf0]  ;;  %v3272_v28 = vld [vmem:[%s4760_s3 + $0x114] sm:$0xf] }
 0x207   :  { %1331 = vmatpush.bf16.msrb.mxu0 %v2792_v58  ;;  %v2740_v33 = vor.u32 %v3256_v45, %v2737_v37 }
 0x208   :  { %1369 = vmatpush.bf16.msrb.mxu3 %v2700_v0  ;;  %v2856_v0 = vor.u32 %v3287_v36, %v2855_v21  ;;  %v2817_v36 = vld [vmem:[%s4760_s3 + $0x138] sm:$0xf0] }
 0x209   :  { %1357 = vmatpush.bf16.msra.mxu2 %v2936_v34 }
 0x20a   :  { %1345 = vmatpush.bf16.msra.mxu1 %v2856_v0  ;;  %v2756_v0 = vor.u32 %v3260_v50, %v2753_v17  ;;  %v3292_v50 = vld [vmem:[%s4760_s3 + $0x1b4] sm:$0xf]  ;;  %v2881_v17 = vld [vmem:[%s4760_s3 + $0x1b8] sm:$0xf0] }
 0x20b   :  { %1380 = vmatpush.bf16.msra.mxu0 %v2788_v2  ;;  %v2905_v2 = vld [vmem:[%s4760_s3 + $0x1e8] sm:$0xf0] }
 0x20c   :  { %1370 = vmatpush.bf16.msrb.mxu3 %v2692_v1  ;;  %v3284_v1 = vld [vmem:[%s4760_s3 + $0x174] sm:$0xf] }
 0x20d   :  { %1358 = vmatpush.bf16.msra.mxu2 %v2928_v61  ;;  %v3276_v61 = vld [vmem:[%s4760_s3 + $0x134] sm:$0xf] }
 0x20f   :  { %1381 = vmatpush.bf16.msra.mxu0 %v2780_v5  ;;  %v2969_v5 = vld [vmem:[%s4760_s3 + $0x268] sm:$0xf0] }
 0x210   :  { %1371 = vmatpush.bf16.msrb.mxu3 %v2684_v3  ;;  %v2852_v3 = vor.u32 %v3284_v1, %v2849_v27  ;;  %v3274_v27 = vld [vmem:[%s4760_s3 + $0x124] sm:$0xf]  ;;  %v2972_v20 = vor.u32 %v3314_v55, %v2969_v5  ;;  %v3288_v5 = vld [vmem:[%s4760_s3 + $0x194] sm:$0xf] }
 0x211   :  { %1359 = vmatpush.bf16.msra.mxu2 %v2920_v18  ;;  %v2820_v18 = vor.u32 %v3276_v61, %v2817_v36  ;;  %v3308_v36 = vld [vmem:[%s4760_s3 + $0x234] sm:$0xf] }
 0x212   :  { %1394 = vmatpush.bf16.msrb.mxu1 %v2852_v3  ;;  %v2809_v3 = vld [vmem:[%s4760_s3 + $0x128] sm:$0xf0] }
 0x213   :  { %1382 = vmatpush.bf16.msra.mxu0 %v2772_v24  ;;  %v2812_v12 = vor.u32 %v3274_v27, %v2809_v3  ;;  %v2897_v24 = vld [vmem:[%s4760_s3 + $0x1d8] sm:$0xf0]  ;;  %v2937_v27 = vld [vmem:[%s4760_s3 + $0x228] sm:$0xf0] }
 0x214   :  { %1372 = vmatpush.bf16.msrb.mxu3 %v2676_v63 }
 0x216   :  { %1395 = vmatpush.bf16.msrb.mxu1 %v2844_v4 }
 0x217   :  { %1383 = vmatpush.bf16.msra.mxu0 %v2764_v38 }
 0x218   :  { %1373 = vmatpush.bf16.msrb.mxu3 %v2668_v40  ;;  %v3300_v40 = vld [vmem:[%s4760_s3 + $0x1f4] sm:$0xf] }
 0x219   :  { %v2916_v57 = vor.u32 %v3300_v40, %v2913_v6  ;;  %v2964_v40 = vor.u32 %v3312_v26, %v2961_v32 }
 0x21a   :  { %1396 = vmatpush.bf16.msrb.mxu1 %v2836_v19  ;;  %v2801_v19 = vld [vmem:[%s4760_s3 + $0x118] sm:$0xf0] }
 0x21b   :  { %1384 = vmatpush.bf16.msra.mxu0 %v2756_v0  ;;  %v2804_v38 = vor.u32 %v3272_v28, %v2801_v19  ;;  %v3290_v0 = vld [vmem:[%s4760_s3 + $0x1a4] sm:$0xf] }
 0x21e   :  { %1397 = vmatpush.bf16.msrb.mxu1 %v2828_v43  ;;  %v3310_v43 = vld [vmem:[%s4760_s3 + $0x244] sm:$0xf] }
 0x222   :  { %1398 = vmatpush.bf16.msrb.mxu1 %v2820_v18  ;;  %v2873_v18 = vld [vmem:[%s4760_s3 + $0x1a8] sm:$0xf0] }
 0x226   :  { %1399 = vmatpush.bf16.msrb.mxu1 %v2812_v12 }
 0x22a   :  { %1400 = vmatpush.bf16.msrb.mxu1 %v2804_v38 }
 0x237   :  { %v4256_v46 = vpop.permute.xlu2 %3440 }
 0x238   :  { %v3443_v54 = vunpack.i.h.bf16 %v4256_v46  ;;  %v3442_v56 = vunpack.i.l.bf16 %v4256_v46  ;;  %v2921_v46 = vld [vmem:[%s4760_s3 + $0x208] sm:$0xf0] }
 0x242   :  { %v3436_v35 = vpop.permute.xlu1 %3435  ;;  %v3431_v34 = vpop.permute.xlu0 %3430 }
 0x243   :  { %v3438_v42 = vunpack.i.h.bf16 %v3436_v35  ;;  %v3437_v63 = vunpack.i.l.bf16 %v3436_v35  ;;  %v3433_v39 = vunpack.i.h.bf16 %v3431_v34  ;;  %v3432_v11 = vunpack.i.l.bf16 %v3431_v34  ;;  %v3294_v34 = vld [vmem:[%s4760_s3 + $0x1c4] sm:$0xf] }
 0x245   :  { %v778_v47 = vsel %vm772_vm1, %v3437_v63, %v3438_v42  ;;  %v773_v25 = vsel %vm772_vm1, %v3432_v11, %v3433_v39  ;;  %v774_v62 = vsel %vm772_vm1, %v3433_v39, %v3442_v56  ;;  %v779_v1 = vsel %vm772_vm1, %v3438_v42, %v3443_v54  ;;  %v2729_v42 = vld [vmem:[%s4760_s3 + $0x88] sm:$0xf0]  ;;  %v3270_v39 = vld [vmem:[%s4760_s3 + $0x104] sm:$0xf] }
 0x246   :  { %v793_v21 = vmax.f32 %v3838_v13, %v773_v25  ;;  %v798_v58 = vmax.f32 %v3848_v23, %v778_v47  ;;  %v2745_v13 = vld [vmem:[%s4760_s3 + $0xa8] sm:$0xf0]  ;;  %v794_v41 = vmax.f32 %v3844_v22, %v774_v62  ;;  %v799_v7 = vmax.f32 %v3840_v52, %v779_v1  ;;  %v3296_v52 = vld [vmem:[%s4760_s3 + $0x1d4] sm:$0xf] }
 0x247   :  { %v2748_v4 = vor.u32 %v3258_v60, %v2745_v13  ;;  %v2908_v22 = vor.u32 %v3298_v59, %v2905_v2  ;;  %v2900_v35 = vor.u32 %v3296_v52, %v2897_v24  ;;  %v2889_v63 = vld [vmem:[%s4760_s3 + $0x1c8] sm:$0xf0]  ;;  %v2732_v6 = vor.u32 %v3254_v49, %v2729_v42  ;;  %v3306_v2 = vld [vmem:[%s4760_s3 + $0x224] sm:$0xf] }
 0x248   :  { %v4285_v23 = vpack.c.bf16 %v798_v58, %v793_v21  ;;  %v4312_v10 = vpack.c.bf16 %v799_v7, %v794_v41  ;;  %v2793_v11 = vld [vmem:[%s4760_s3 + $0x108] sm:$0xf0]  ;;  %v2892_v25 = vor.u32 %v3294_v34, %v2889_v63  ;;  %v2884_v59 = vor.u32 %v3292_v50, %v2881_v17  ;;  %v3304_v7 = vld [vmem:[%s4760_s3 + $0x214] sm:$0xf] }
 0x249   :  { %1385 = vmatpush.bf16.msra.mxu0 %v2748_v4  ;;  %v2953_v47 = vld [vmem:[%s4760_s3 + $0x248] sm:$0xf0]  ;;  %v2796_v48 = vor.u32 %v3270_v39, %v2793_v11  ;;  %v2876_v41 = vor.u32 %v3290_v0, %v2873_v18  ;;  %v2940_v55 = vor.u32 %v3306_v2, %v2937_v27  ;;  %v2865_v4 = vld [vmem:[%s4760_s3 + $0x198] sm:$0xf0] }
 0x24a   :  { %1304 = vmatmul.bf16.vlgmr.msrb.gmra.mxu2 %v4285_v23  ;;  %1318 = vmatmul.bf16.vlgmr.msra.gmra.mxu3 %v4312_v10  ;;  %v3446_v21 = vpop.permute.xlu0 %3445  ;;  %v2956_v58 = vor.u32 %v3310_v43, %v2953_v47 }
 0x24b   :  { %1408 = vmatpush.bf16.msrb.mxu2 %v2916_v57  ;;  %1422 = vmatpush.bf16.msra.mxu3 %v1294_v9  ;;  %v2945_v57 = vld [vmem:[%s4760_s3 + $0x238] sm:$0xf0]  ;;  %v3448_v62 = vunpack.i.h.bf16 %v3446_v21  ;;  %v3447_v1 = vunpack.i.l.bf16 %v3446_v21 }
 0x24c   :  { %1401 = vmatpush.bf16.msrb.mxu1 %v2796_v48  ;;  %v2948_v3 = vor.u32 %v3308_v36, %v2945_v57  ;;  %v2929_v9 = vld [vmem:[%s4760_s3 + $0x218] sm:$0xf0] }
 0x24d   :  { %1386 = vmatpush.bf16.msra.mxu0 %v2740_v33  ;;  %v653_v52 = vsel %vm645_vm13, %v3903_v51, %v3448_v62  ;;  %v649_v12 = vsel %vm645_vm13, %v3905_v53, %v3447_v1  ;;  %v673_v37 = vmax.f32 %v614_v16, %v3448_v62  ;;  %v668_v26 = vmax.f32 %v609_v29, %v3447_v1  ;;  %v3286_v16 = vld [vmem:[%s4760_s3 + $0x184] sm:$0xf] }
 0x24e   :  { %v3456_v61 = vpop.permute.xlu2 %3455  ;;  %v2868_v33 = vor.u32 %v3288_v5, %v2865_v4  ;;  %v672_v53 = vmax.f32 %v3796_v44, %v653_v52 }
 0x24f   :  { %1409 = vmatpush.bf16.msrb.mxu2 %v2908_v22  ;;  %1423 = vmatpush.bf16.msra.mxu3 %v2972_v20  ;;  %v3458_v60 = vunpack.i.h.bf16 %v3456_v61  ;;  %v3457_v13 = vunpack.i.l.bf16 %v3456_v61  ;;  %v2932_v20 = vor.u32 %v3304_v7, %v2929_v9 }
 0x251   :  { %1387 = vmatpush.bf16.msra.mxu0 %v2732_v6  ;;  %v782_v22 = vsel %vm772_vm1, %v3457_v13, %v3458_v60 }
 0x253   :  { %1410 = vmatpush.bf16.msrb.mxu2 %v2900_v35  ;;  %1424 = vmatpush.bf16.msra.mxu3 %v2964_v40  ;;  %v802_v35 = vmax.f32 %v673_v37, %v782_v22 }
 0x257   :  { %1411 = vmatpush.bf16.msrb.mxu2 %v2892_v25  ;;  %1425 = vmatpush.bf16.msra.mxu3 %v2956_v58 }
 0x25a   :  { %1374 = vmatmul.bf16.vlgmr.msrb.gmra.mxu3 %v4285_v23  ;;  %v667_v23 = vmax.f32 %v3787_v8, %v649_v12 }
 0x25b   :  { %1412 = vmatpush.bf16.msrb.mxu2 %v2884_v59  ;;  %1426 = vmatpush.bf16.msra.mxu3 %v2948_v3 }
 0x25f   :  { %1413 = vmatpush.bf16.msrb.mxu2 %v2876_v41  ;;  %1427 = vmatpush.bf16.msra.mxu3 %v2940_v55 }
 0x263   :  { %1414 = vmatpush.bf16.msrb.mxu2 %v2868_v33  ;;  %1428 = vmatpush.bf16.msra.mxu3 %v2932_v20  ;;  %v1620_v33 = vld [vmem:[%s4761_s5 + $0x10] sm:$0xff] }
 0x265   :  { %v3451_v45 = vpop.permute.xlu1 %3450  ;;  %v3461_v19 = vpop.permute.xlu0 %3460 }
 0x266   :  { %v3453_v24 = vunpack.i.h.bf16 %v3451_v45  ;;  %v3452_v28 = vunpack.i.l.bf16 %v3451_v45  ;;  %v3463_v32 = vunpack.i.h.bf16 %v3461_v19  ;;  %v3462_v51 = vunpack.i.l.bf16 %v3461_v19 }
 0x268   :  { %v777_v14 = vsel %vm772_vm1, %v3452_v28, %v3453_v24  ;;  %v780_v34 = vsel %vm772_vm1, %v3443_v54, %v3463_v32  ;;  %v781_v44 = vsel %vm772_vm1, %v3463_v32, %v3457_v13  ;;  %v775_v8 = vsel %vm772_vm1, %v3442_v56, %v3462_v51  ;;  %v3302_v54 = vld [vmem:[%s4760_s3 + $0x204] sm:$0xf]  ;;  %s3521_s3 = smov 106  }
 0x269   :  { %v797_v29 = vmax.f32 %v668_v26, %v777_v14  ;;  %v800_v38 = vmax.f32 %v3955_v31, %v780_v34  ;;  %v776_v49 = vsel %vm772_vm1, %v3462_v51, %v3452_v28  ;;  %v795_v42 = vmax.f32 %v3951_v30, %v775_v8  ;;  %v1618_v51 = vld [vmem:[%s4761_s5] sm:$0xff] }
 0x26a   :  { %v801_v63 = vmax.f32 %v672_v53, %v781_v44  ;;  %v796_v11 = vmax.f32 %v667_v23, %v776_v49  ;;  %v2860_v56 = vor.u32 %v3286_v16, %v2857_v15  ;;  %v2924_v30 = vor.u32 %v3302_v54, %v2921_v46  ;;  %v1619_v53 = vld [vmem:[%s4761_s5 + $0x8] sm:$0xff] }
 0x26b   :  { %v807_v39 = vpack.c.bf16 %v802_v35, %v797_v29  ;;  %v805_v40 = vpack.c.bf16 %v800_v38, %v795_v42  ;;  %vm2039_vm1 = vcmask 261120  }
 0x26c   :  { %v806_v31 = vpack.c.bf16 %v801_v63, %v796_v11  ;;  %1415 = vmatpush.bf16.msrb.mxu2 %v2860_v56  ;;  %1429 = vmatpush.bf16.msra.mxu3 %v2924_v30 }
 0x26d   :  { %2973 = vmatmul.msk.bf16.vlgmr.msra.gmra.mxu2 %vm1282_vm2, %v807_v39  ;;  %1332 = vmatmul.bf16.vlgmr.msrb.gmra.mxu0 %v805_v40 }
 0x26e   :  { %1346 = vmatmul.bf16.vlgmr.msra.gmra.mxu1 %v806_v31 }
 0x26f   :  { %2974 = vmatmul.msk.bf16.vlgmr.msra.gmra.mxu3 %vm1282_vm2, %v807_v39 }
 0x27d   :  { %1416 = vmatmul.bf16.vlgmr.msrb.gmra.mxu2 %v806_v31  ;;  %1388 = vmatmul.bf16.vlgmr.msra.gmra.mxu0 %v4312_v10 }
 0x27e   :  { %1402 = vmatmul.bf16.vlgmr.msrb.gmra.mxu1 %v805_v40 }
 0x2cd   :  { %v1319_v6 = vpop.f32.mrf.mxu3  ;;  %v1305_v43 = vpop.f32.mrf.mxu2 }
 0x2ce   :  { %v1320_v59 = vadd.f32 %v1319_v6, %v1305_v43 }
 0x2d5   :  { %v1321_v47 = vpop.f32.mrf.mxu3  ;;  %v1307_v25 = vpop.f32.mrf.mxu2 }
 0x2d6   :  { %v1322_v3 = vadd.f32 %v1321_v47, %v1307_v25 }
 0x2dd   :  { %v1375_v17 = vpop.f32.mrf.mxu3 }
 0x2e5   :  { %v1377_v36 = vpop.f32.mrf.mxu3 }
 0x2ea   :  { %v1333_v48 = vpop.f32.mrf.mxu0 }
 0x2eb   :  { %v1347_v50 = vpop.f32.mrf.mxu1  ;;  %v1334_v13 = vadd.f32 %v1333_v48, %v1320_v59 }
 0x2ed   :  { %v1348_v2 = vadd.f32 %v1347_v50, %v1334_v13 }
 0x2f0   :  { %v1361_v61 = vpop.f32.mrf.mxu2 }
 0x2f1   :  { %v1362_v41 = vadd.f32 %v1361_v61, %v1348_v2 }
 0x2f2   :  { %v1335_v21 = vpop.f32.mrf.mxu0  ;;  %v1431_v10 = vpop.f32.mrf.mxu3 }
 0x2f3   :  { %v1349_v58 = vpop.f32.mrf.mxu1  ;;  %v1336_v5 = vadd.f32 %v1335_v21, %v1322_v3 }
 0x2f5   :  { %v1350_v45 = vadd.f32 %v1349_v58, %v1336_v5 }
 0x2f8   :  { %v1363_v57 = vpop.f32.mrf.mxu2 }
 0x2f9   :  { %v1364_v28 = vadd.f32 %v1363_v57, %v1350_v45 }
 0x2fa   :  { %v1389_v0 = vpop.f32.mrf.mxu0  ;;  %v1433_v24 = vpop.f32.mrf.mxu3 }
 0x2fb   :  { %v1390_v18 = vadd.f32 %v1389_v0, %v1375_v17  ;;  %v1403_v60 = vpop.f32.mrf.mxu1 }
 0x2fd   :  { %v1404_v62 = vadd.f32 %v1403_v60, %v1390_v18 }
 0x300   :  { %v1417_v1 = vpop.f32.mrf.mxu2 }
 0x301   :  { %v1418_v27 = vadd.f32 %v1417_v1, %v1404_v62 }
 0x302   :  { %v1391_v9 = vpop.f32.mrf.mxu0 }
 0x303   :  { %v1432_v7 = vadd.f32 %v1431_v10, %v1418_v27  ;;  %v1392_v55 = vadd.f32 %v1391_v9, %v1377_v36  ;;  %v1405_v22 = vpop.f32.mrf.mxu1 }
 0x305   :  { %v1436_v4 = vpack.c.bf16 %v1432_v7, %v1362_v41  ;;  %v1406_v52 = vadd.f32 %v1405_v22, %v1392_v55 }
 0x307   :  { %1440 = vst.msk [vmem:[#allocation4] sm:$0xff] %vm1439_vm4, %v1436_v4 }
 0x308   :  { %v1419_v12 = vpop.f32.mrf.mxu2 }
 0x309   :  { %v1420_v37 = vadd.f32 %v1419_v12, %v1406_v52 }
 0x30b   :  { %v1434_v19 = vadd.f32 %v1433_v24, %v1420_v37 }
 0x30d   :  { %v1437_v20 = vpack.c.bf16 %v1434_v19, %v1364_v28 }
 0x30e   :  { %v1562_v26 = vld [vmem:[#allocation4] sm:$0xff] }
 0x30f   :  { %1441 = vst.msk [vmem:[#allocation4 + $0x8] sm:$0xff] %vm1439_vm4, %v1437_v20  ;;  %1566 = vrot.lane.b32.xlu1 %v1562_v26, %s3521_s3  ;;  %1549 = vrot.lane.b32.xlu0 %v1562_v26, %s3522_s15  ;;  %vm2067_vm4 = vcmask 778752  }
 0x310   :  { %1533 = vrot.lane.b32.xlu2 %v1562_v26, %s3516_s12 }
 0x316   :  { %v1563_v32 = vld [vmem:[#allocation4 + $0x8] sm:$0xff] }
 0x317   :  { %1516 = vrot.lane.b32.xlu1 %v1562_v26, %s3523_s2  ;;  %1499 = vrot.lane.b32.xlu0 %v1562_v26, %s3524_s16 }
 0x318   :  { %1568 = vrot.lane.b32.xlu2 %v1563_v32, %s3521_s3 }
 0x31f   :  { %1551 = vrot.lane.b32.xlu1 %v1563_v32, %s3522_s15  ;;  %1535 = vrot.lane.b32.xlu0 %v1563_v32, %s3516_s12 }
 0x320   :  { %1518 = vrot.lane.b32.xlu2 %v1563_v32, %s3523_s2  ;;  %s3529_s2 = smov 64  }
 0x327   :  { %1501 = vrot.lane.b32.xlu1 %v1563_v32, %s3524_s16  ;;  %1484 = vrot.lane.b32.xlu0 %v1563_v32, %s3525_s18 }
 0x328   :  { %1482 = vrot.lane.b32.xlu2 %v1562_v26, %s3525_s18 }
 0x32f   :  { %1465 = vrot.lane.b32.xlu1 %v1562_v26, %s3526_s19  ;;  %1446 = vrot.lane.b32.xlu0 %v1562_v26, %s3518_s1 }
 0x330   :  { %1467 = vrot.lane.b32.xlu2 %v1563_v32, %s3526_s19 }
 0x337   :  { %1585 = vrot.lane.b32.xlu0 %v1563_v32, %s3527_s20  ;;  %1448 = vrot.lane.b32.xlu1 %v1563_v32, %s3518_s1 }
 0x338   :  { %1583 = vrot.lane.b32.xlu2 %v1562_v26, %s3527_s20 }
 0x33f   :  { %1624 = vperm.xlu0 %3397, %v1618_v51   ;;  %1634 = vperm.xlu1 %3398, %v1620_v33  }
 0x347   :  { %1629 = vperm.xlu1 %3398, %v1619_v53  }
 0x36a   :  { %v1534_v35 = vpop.permute.xlu2 %1533 }
 0x36b   :  { %v1537_v14 = vrot.slane %v1534_v35, 4 }
 0x36d   :  { %v1539_v16 = vsel %vm58_vm10, %v1534_v35, %v1537_v14 }
 0x36e   :  { %1543 = vst.msk [vmem:[#allocation5 + $0x50] sm:$0xff] %vm4452_vm6, %v1539_v16 }
 0x372   :  { %v1569_v15 = vpop.permute.xlu2 %1568 }
 0x373   :  { %v1571_v29 = vrot.slane %v1569_v15, 4 }
 0x375   :  { %v1574_v34 = vsel %vm1572_vm7, %v1569_v15, %v1571_v29  ;;  %v3033_v19 = vld [vmem:[#allocation5 + $0x50] sm:$0xf]  ;;  %v3330_v20 = vld [vmem:[#allocation5 + $0x54] sm:$0xf] }
 0x376   :  { %1578 = vst.msk [vmem:[#allocation5 + $0x78] sm:$0xff] %vm4452_vm6, %v1574_v34 }
 0x37a   :  { %v1519_v44 = vpop.permute.xlu2 %1518 }
 0x37b   :  { %v1521_v8 = vrot.slane %v1519_v44, 4 }
 0x37d   :  { %v1524_v38 = vsel %vm1522_vm8, %v1519_v44, %v1521_v8  ;;  %v3335_v48 = vld [vmem:[#allocation5 + $0x74] sm:$0xf0]  ;;  %v3051_v58 = vld [vmem:[#allocation5 + $0x78] sm:$0xf0] }
 0x37e   :  { %1528 = vst.msk [vmem:[#allocation5 + $0x48] sm:$0xff] %vm4452_vm6, %v1524_v38 }
 0x381   :  { %v1567_v49 = vpop.permute.xlu1 %1566  ;;  %v1550_v42 = vpop.permute.xlu0 %1549 }
 0x382   :  { %v1570_v63 = vrot.slane %v1567_v49, 4  ;;  %v1553_v39 = vrot.slane %v1550_v42, 4  ;;  %v1483_v11 = vpop.permute.xlu2 %1482 }
 0x383   :  { %v1486_v54 = vrot.slane %v1483_v11, 4 }
 0x384   :  { %v1573_v46 = vsel %vm1572_vm7, %v1567_v49, %v1570_v63  ;;  %v1556_v56 = vsel %vm1555_vm0, %v1550_v42, %v1553_v39 }
 0x385   :  { %1577 = vst.msk [vmem:[#allocation5 + $0x70] sm:$0xff] %vm4452_vm6, %v1573_v46  ;;  %v1489_v40 = vsel %vm1488_vm9, %v1483_v11, %v1486_v54  ;;  %v3329_v34 = vld [vmem:[#allocation5 + $0x44] sm:$0xf0]  ;;  %v3027_v44 = vld [vmem:[#allocation5 + $0x48] sm:$0xf0] }
 0x386   :  { %1560 = vst.msk [vmem:[#allocation5 + $0x60] sm:$0xff] %vm4452_vm6, %v1556_v56 }
 0x387   :  { %1493 = vst.msk [vmem:[#allocation5 + $0x20] sm:$0xff] %vm4452_vm6, %v1489_v40 }
 0x389   :  { %v1517_v31 = vpop.permute.xlu1 %1516  ;;  %v1500_v30 = vpop.permute.xlu0 %1499 }
 0x38a   :  { %v1520_v6 = vrot.slane %v1517_v31, 4  ;;  %v1503_v43 = vrot.slane %v1500_v30, 4  ;;  %v1468_v47 = vpop.permute.xlu2 %1467 }
 0x38b   :  { %v1470_v25 = vrot.slane %v1468_v47, 4 }
 0x38c   :  { %v1523_v50 = vsel %vm1522_vm8, %v1517_v31, %v1520_v6  ;;  %v1506_v17 = vsel %vm1282_vm2, %v1500_v30, %v1503_v43  ;;  %v3049_v61 = vld [vmem:[#allocation5 + $0x70] sm:$0xf]  ;;  %v3334_v21 = vld [vmem:[#allocation5 + $0x74] sm:$0xf]  ;;  %v1621_v43 = vld [vmem:[%s4761_s5 + $0x18] sm:$0xff] }
 0x38d   :  { %1527 = vst.msk [vmem:[#allocation5 + $0x40] sm:$0xff] %vm4452_vm6, %v1523_v50  ;;  %v1473_v36 = vsel %vm1471_vm11, %v1468_v47, %v1470_v25  ;;  %v3050_v57 = vor.u32 %v3335_v48, %v3049_v61  ;;  %v3054_v59 = vor.u32 %v3334_v21, %v3051_v58  ;;  %v3041_v55 = vld [vmem:[#allocation5 + $0x60] sm:$0xf]  ;;  %v3332_v52 = vld [vmem:[#allocation5 + $0x64] sm:$0xf]  ;;  %1639 = vperm.xlu2 %3464, %v1621_v43  }
 0x38e   :  { %1510 = vst.msk [vmem:[#allocation5 + $0x30] sm:$0xff] %vm4452_vm6, %v1506_v17  ;;  %v3009_v48 = vld [vmem:[#allocation5 + $0x20] sm:$0xf]  ;;  %v3324_v50 = vld [vmem:[#allocation5 + $0x24] sm:$0xf] }
 0x38f   :  { %1477 = vst.msk [vmem:[#allocation5 + $0x18] sm:$0xff] %vm4452_vm6, %v1473_v36  ;;  %1757 = vmatpush.bf16.msrb.mxu0 %v3050_v57  ;;  %1795 = vmatpush.bf16.msra.mxu2 %v3054_v59 }
 0x391   :  { %v1552_v0 = vpop.permute.xlu1 %1551  ;;  %v1536_v18 = vpop.permute.xlu0 %1535 }
 0x392   :  { %v1554_v60 = vrot.slane %v1552_v0, 4  ;;  %v1538_v13 = vrot.slane %v1536_v18, 4  ;;  %v1584_v62 = vpop.permute.xlu2 %1583 }
 0x393   :  { %v1587_v10 = vrot.slane %v1584_v62, 4 }
 0x394   :  { %v1557_v1 = vsel %vm1555_vm0, %v1552_v0, %v1554_v60  ;;  %v1540_v2 = vsel %vm58_vm10, %v1536_v18, %v1538_v13  ;;  %v3025_v14 = vld [vmem:[#allocation5 + $0x40] sm:$0xf]  ;;  %v3328_v16 = vld [vmem:[#allocation5 + $0x44] sm:$0xf]  ;;  %v3317_v60 = vld [vmem:[%s4762_s4 + $0x4] sm:$0xf0] }
 0x395   :  { %1561 = vst.msk [vmem:[#allocation5 + $0x68] sm:$0xff] %vm4452_vm6, %v1557_v1  ;;  %v1590_v27 = vsel %vm1589_vm12, %v1584_v62, %v1587_v10  ;;  %v3026_v8 = vor.u32 %v3329_v34, %v3025_v14  ;;  %v3030_v38 = vor.u32 %v3328_v16, %v3027_v44  ;;  %v3017_v63 = vld [vmem:[#allocation5 + $0x30] sm:$0xf]  ;;  %v3326_v39 = vld [vmem:[#allocation5 + $0x34] sm:$0xf]  ;;  %vm1750_vm10 = vcmask 130048  }
 0x396   :  { %1544 = vst.msk [vmem:[#allocation5 + $0x58] sm:$0xff] %vm4452_vm6, %v1540_v2  ;;  %v3323_v36 = vld [vmem:[#allocation5 + $0x14] sm:$0xf0]  ;;  %v3003_v57 = vld [vmem:[#allocation5 + $0x18] sm:$0xf0] }
 0x397   :  { %1594 = vst.msk [vmem:[#allocation5 + $0x80] sm:$0xff] %vm4452_vm6, %v1590_v27  ;;  %v2977_v18 = vld [vmem:[%s4762_s4] sm:$0xf]  ;;  %v3316_v13 = vld [vmem:[%s4762_s4 + $0x4] sm:$0xf] }
 0x398   :  { %v2979_v1 = vld [vmem:[%s4762_s4 + $0x8] sm:$0xf0] }
 0x399   :  { %v1502_v3 = vpop.permute.xlu1 %1501  ;;  %v1485_v41 = vpop.permute.xlu0 %1484 }
 0x39a   :  { %v1504_v7 = vrot.slane %v1502_v3, 4  ;;  %v1487_v9 = vrot.slane %v1485_v41, 4 }
 0x39c   :  { %v1507_v5 = vsel %vm1282_vm2, %v1502_v3, %v1504_v7  ;;  %v1490_v4 = vsel %vm1488_vm9, %v1485_v41, %v1487_v9  ;;  %v3333_v22 = vld [vmem:[#allocation5 + $0x64] sm:$0xf0]  ;;  %v3043_v12 = vld [vmem:[#allocation5 + $0x68] sm:$0xf0]  ;;  %vm2045_vm2 = vcmask 253952  }
 0x39d   :  { %1511 = vst.msk [vmem:[#allocation5 + $0x38] sm:$0xff] %vm4452_vm6, %v1507_v5  ;;  %v3042_v45 = vor.u32 %v3333_v22, %v3041_v55  ;;  %v3046_v37 = vor.u32 %v3332_v52, %v3043_v12  ;;  %v3331_v24 = vld [vmem:[#allocation5 + $0x54] sm:$0xf0]  ;;  %v3035_v28 = vld [vmem:[#allocation5 + $0x58] sm:$0xf0]  ;;  %v2982_v52 = vor.u32 %v3316_v13, %v2979_v1  ;;  %v2978_v12 = vor.u32 %v3317_v60, %v2977_v18 }
 0x39e   :  { %1494 = vst.msk [vmem:[#allocation5 + $0x28] sm:$0xff] %vm4452_vm6, %v1490_v4  ;;  %v3034_v51 = vor.u32 %v3331_v24, %v3033_v19  ;;  %v3038_v33 = vor.u32 %v3330_v20, %v3035_v28  ;;  %v3057_v62 = vld [vmem:[#allocation5 + $0x80] sm:$0xf]  ;;  %v3336_v10 = vld [vmem:[#allocation5 + $0x84] sm:$0xf] }
 0x39f   :  { %1758 = vmatpush.bf16.msrb.mxu0 %v3042_v45  ;;  %1796 = vmatpush.bf16.msra.mxu2 %v3046_v37  ;;  %v3318_v45 = vld [vmem:[%s4762_s4 + $0x14] sm:$0xf]  ;;  %v2987_v37 = vld [vmem:[%s4762_s4 + $0x18] sm:$0xf0]  ;;  %v2985_v24 = vld [vmem:[%s4762_s4 + $0x10] sm:$0xf] }
 0x3a0   :  { %v3319_v28 = vld [vmem:[%s4762_s4 + $0x14] sm:$0xf0]  ;;  %v2990_v19 = vor.u32 %v3318_v45, %v2987_v37  ;;  %s3528_s4 = smov 118  }
 0x3a1   :  { %v1466_v26 = vpop.permute.xlu1 %1465  ;;  %v1447_v32 = vpop.permute.xlu0 %1446  ;;  %v2986_v20 = vor.u32 %v3319_v28, %v2985_v24 }
 0x3a2   :  { %v1469_v53 = vrot.slane %v1466_v26, 4  ;;  %v1450_v35 = vrot.slane %v1447_v32, 4 }
 0x3a3   :  { %1759 = vmatpush.bf16.msrb.mxu0 %v3034_v51  ;;  %1797 = vmatpush.bf16.msra.mxu2 %v3038_v33 }
 0x3a4   :  { %v1472_v15 = vsel %vm1471_vm11, %v1466_v26, %v1469_v53  ;;  %v1453_v29 = vsel %vm645_vm13, %v1447_v32, %v1450_v35  ;;  %v3327_v49 = vld [vmem:[#allocation5 + $0x34] sm:$0xf0]  ;;  %v3019_v42 = vld [vmem:[#allocation5 + $0x38] sm:$0xf0] }
 0x3a5   :  { %1476 = vst.msk [vmem:[#allocation5 + $0x10] sm:$0xff] %vm4452_vm6, %v1472_v15  ;;  %v3018_v46 = vor.u32 %v3327_v49, %v3017_v63  ;;  %v3022_v56 = vor.u32 %v3326_v39, %v3019_v42  ;;  %v3325_v30 = vld [vmem:[#allocation5 + $0x24] sm:$0xf0]  ;;  %v3011_v6 = vld [vmem:[#allocation5 + $0x28] sm:$0xf0] }
 0x3a6   :  { %1459 = vst.msk [vmem:[#allocation5] sm:$0xff] %vm4452_vm6, %v1453_v29  ;;  %v3010_v17 = vor.u32 %v3325_v30, %v3009_v48  ;;  %v3014_v61 = vor.u32 %v3324_v50, %v3011_v6 }
 0x3a7   :  { %1760 = vmatpush.bf16.msrb.mxu0 %v3026_v8  ;;  %1798 = vmatpush.bf16.msra.mxu2 %v3030_v38 }
 0x3a9   :  { %v1586_v11 = vpop.permute.xlu0 %1585  ;;  %v1449_v54 = vpop.permute.xlu1 %1448 }
 0x3aa   :  { %v1588_v40 = vrot.slane %v1586_v11, 4  ;;  %v1451_v31 = vrot.slane %v1449_v54, 4 }
 0x3ab   :  { %1761 = vmatpush.bf16.msrb.mxu0 %v3018_v46  ;;  %1799 = vmatpush.bf16.msra.mxu2 %v3022_v56 }
 0x3ac   :  { %v1591_v47 = vsel %vm1589_vm12, %v1586_v11, %v1588_v40  ;;  %v1454_v25 = vsel %vm645_vm13, %v1449_v54, %v1451_v31  ;;  %v3001_v21 = vld [vmem:[#allocation5 + $0x10] sm:$0xf]  ;;  %v3322_v58 = vld [vmem:[#allocation5 + $0x14] sm:$0xf] }
 0x3ad   :  { %1595 = vst.msk [vmem:[#allocation5 + $0x88] sm:$0xff] %vm4452_vm6, %v1591_v47  ;;  %v3002_v59 = vor.u32 %v3323_v36, %v3001_v21  ;;  %v3006_v0 = vor.u32 %v3322_v58, %v3003_v57  ;;  %v2993_v2 = vld [vmem:[#allocation5] sm:$0xf]  ;;  %v3320_v9 = vld [vmem:[#allocation5 + $0x4] sm:$0xf] }
 0x3ae   :  { %1460 = vst.msk [vmem:[#allocation5 + $0x8] sm:$0xff] %vm4452_vm6, %v1454_v25 }
 0x3af   :  { %1762 = vmatpush.bf16.msrb.mxu0 %v3010_v17  ;;  %1800 = vmatpush.bf16.msra.mxu2 %v3014_v61 }
 0x3b1   :  { %v1635_v26 = vpop.permute.xlu1 %1634  ;;  %v1625_v33 = vpop.permute.xlu0 %1624 }
 0x3b3   :  { %1763 = vmatpush.bf16.msrb.mxu0 %v3002_v59  ;;  %1801 = vmatpush.bf16.msra.mxu2 %v3006_v0 }
 0x3b4   :  { %v3337_v27 = vld [vmem:[#allocation5 + $0x84] sm:$0xf0]  ;;  %v3059_v3 = vld [vmem:[#allocation5 + $0x88] sm:$0xf0] }
 0x3b5   :  { %v3321_v41 = vld [vmem:[#allocation5 + $0x4] sm:$0xf0]  ;;  %v3058_v7 = vor.u32 %v3337_v27, %v3057_v62  ;;  %v2995_v55 = vld [vmem:[#allocation5 + $0x8] sm:$0xf0]  ;;  %v3062_v5 = vor.u32 %v3336_v10, %v3059_v3 }
 0x3b6   :  { %v2994_v4 = vor.u32 %v3321_v41, %v2993_v2  ;;  %v2998_v22 = vor.u32 %v3320_v9, %v2995_v55 }
 0x3b7   :  { %1783 = vmatpush.bf16.msra.mxu1 %v3058_v7  ;;  %1821 = vmatpush.bf16.msrb.mxu3 %v3062_v5 }
 0x3b8   :  { %1764 = vmatpush.bf16.msrb.mxu0 %v2994_v4  ;;  %1802 = vmatpush.bf16.msra.mxu2 %v2998_v22 }
 0x3b9   :  { %v1630_v44 = vpop.permute.xlu1 %1629 }
 0x3ba   :  { %3063 = vmatmul.msk.bf16.vlgmr.msra.gmra.mxu1 %vm1750_vm10, %v2982_v52  ;;  %3065 = vmatmul.msk.bf16.vlgmr.msrb.gmra.mxu3 %vm1750_vm10, %v2982_v52 }
 0x3bb   :  { %1765 = vmatmul.bf16.vlgmr.msrb.gmra.mxu0 %v2978_v12  ;;  %1803 = vmatmul.bf16.vlgmr.msra.gmra.mxu2 %v2978_v12 }
 0x3ca   :  { %3064 = vmatmul.msk.bf16.gmra.mxu1 %vm1750_vm10, %v2990_v19  ;;  %3066 = vmatmul.msk.bf16.gmra.mxu3 %vm1750_vm10, %v2990_v19 }
 0x3cb   :  { %1770 = vmatmul.bf16.gmra.mxu0 %v2986_v20  ;;  %1808 = vmatmul.bf16.gmra.mxu2 %v2986_v20 }
 0x3e7   :  { %v1640_v36 = vpop.permute.xlu2 %1639 }
 0x437   :  { %v1785_v51 = vpop.f32.mrf.mxu1 }
 0x438   :  { %v1766_v32 = vpop.f32.mrf.mxu0 }
 0x439   :  { %v1767_v53 = vadd.f32 %v1766_v32, %v1625_v33 }
 0x43b   :  { %v1786_v16 = vadd.f32 %v1785_v51, %v1767_v53 }
 0x43d   :  { %v1823_v35 = vpop.f32.mrf.mxu3  ;;  %v1833_v38 = vmax.f32 %v1786_v16, 0.0 }
 0x43e   :  { %v1804_v14 = vpop.f32.mrf.mxu2 }
 0x43f   :  { %v1805_v15 = vadd.f32 %v1804_v14, %v1625_v33  ;;  %v1787_v8 = vpop.f32.mrf.mxu1 }
 0x440   :  { %v1768_v29 = vpop.f32.mrf.mxu0 }
 0x441   :  { %v1824_v34 = vadd.f32 %v1823_v35, %v1805_v15  ;;  %v1769_v42 = vadd.f32 %v1768_v29, %v1630_v44 }
 0x443   :  { %v1834_v49 = vmax.f32 %v1824_v34, 0.0  ;;  %v1788_v54 = vadd.f32 %v1787_v8, %v1769_v42 }
 0x445   :  { %v1841_v63 = vpack.c.bf16 %v1834_v49, %v1833_v38  ;;  %v1825_v39 = vpop.f32.mrf.mxu3  ;;  %v1835_v31 = vmax.f32 %v1788_v54, 0.0 }
 0x446   :  { %v1806_v11 = vpop.f32.mrf.mxu2 }
 0x447   :  { %1845 = vst.msk [vmem:[#allocation6] sm:$0xff] %vm4452_vm6, %v1841_v63  ;;  %v1807_v46 = vadd.f32 %v1806_v11, %v1630_v44  ;;  %v1790_v43 = vpop.f32.mrf.mxu1 }
 0x448   :  { %v1771_v56 = vpop.f32.mrf.mxu0 }
 0x449   :  { %v1826_v40 = vadd.f32 %v1825_v39, %v1807_v46  ;;  %v1772_v6 = vadd.f32 %v1771_v56, %v1635_v26 }
 0x44b   :  { %v1836_v30 = vmax.f32 %v1826_v40, 0.0  ;;  %v1791_v17 = vadd.f32 %v1790_v43, %v1772_v6 }
 0x44d   :  { %v1842_v47 = vpack.c.bf16 %v1836_v30, %v1835_v31  ;;  %v1828_v48 = vpop.f32.mrf.mxu3  ;;  %v1837_v18 = vmax.f32 %v1791_v17, 0.0 }
 0x44e   :  { %v1809_v25 = vpop.f32.mrf.mxu2  ;;  %v1849_v50 = vld [vmem:[#allocation6] sm:$0xff] }
 0x44f   :  { %1846 = vst.msk [vmem:[#allocation6 + $0x8] sm:$0xff] %vm4452_vm6, %v1842_v47  ;;  %v1810_v61 = vadd.f32 %v1809_v25, %v1635_v26  ;;  %v1853_v21 = vunpack.c.l.bf16 %v1849_v50  ;;  %v1854_v58 = vunpack.c.h.bf16 %v1849_v50  ;;  %v1792_v10 = vpop.f32.mrf.mxu1 }
 0x450   :  { %v1773_v57 = vpop.f32.mrf.mxu0 }
 0x451   :  { %v1829_v59 = vadd.f32 %v1828_v48, %v1810_v61  ;;  %v3475_v0 = vpack.i.bf16 %v1854_v58, %v1853_v21  ;;  %v1774_v13 = vadd.f32 %v1773_v57, %v1640_v36 }
 0x453   :  { %v1838_v60 = vmax.f32 %v1829_v59, 0.0  ;;  %3476 = vrot.lane.b32.xlu1 %v3475_v0, %s3518_s1  ;;  %v1793_v2 = vadd.f32 %v1792_v10, %v1774_v13 }
 0x455   :  { %v1843_v62 = vpack.c.bf16 %v1838_v60, %v1837_v18  ;;  %v1830_v3 = vpop.f32.mrf.mxu3  ;;  %v1839_v7 = vmax.f32 %v1793_v2, 0.0 }
 0x456   :  { %v1811_v1 = vpop.f32.mrf.mxu2  ;;  %v1850_v12 = vld [vmem:[#allocation6 + $0x8] sm:$0xff] }
 0x457   :  { %1847 = vst.msk [vmem:[#allocation6 + $0x10] sm:$0xff] %vm4452_vm6, %v1843_v62  ;;  %v1812_v27 = vadd.f32 %v1811_v1, %v1640_v36  ;;  %v1855_v45 = vunpack.c.l.bf16 %v1850_v12  ;;  %v1856_v37 = vunpack.c.h.bf16 %v1850_v12 }
 0x459   :  { %v1831_v41 = vadd.f32 %v1830_v3, %v1812_v27  ;;  %v3480_v26 = vpack.i.bf16 %v1856_v37, %v1855_v45 }
 0x45b   :  { %v1840_v9 = vmax.f32 %v1831_v41, 0.0 }
 0x45d   :  { %v1844_v55 = vpack.c.bf16 %v1840_v9, %v1839_v7 }
 0x45e   :  { %v1851_v5 = vld [vmem:[#allocation6 + $0x10] sm:$0xff] }
 0x45f   :  { %1848 = vst.msk [vmem:[#allocation6 + $0x18] sm:$0xff] %vm4452_vm6, %v1844_v55  ;;  %v1857_v4 = vunpack.c.l.bf16 %v1851_v5  ;;  %v1858_v22 = vunpack.c.h.bf16 %v1851_v5  ;;  %vm2549_vm6 = vcmask 1024  }
 0x461   :  { %v3465_v52 = vpack.i.bf16 %v1858_v22, %v1857_v4 }
 0x463   :  { %3466 = vrot.lane.b32.xlu2 %v3465_v52, %s3518_s1 }
 0x466   :  { %v1852_v24 = vld [vmem:[#allocation6 + $0x18] sm:$0xff] }
 0x467   :  { %v1859_v28 = vunpack.c.l.bf16 %v1852_v24  ;;  %v1860_v19 = vunpack.c.h.bf16 %v1852_v24  ;;  %v3071_v24 = vld [vmem:[%s4763_s6 + $0x8] sm:$0xf0] }
 0x469   :  { %v3470_v20 = vpack.i.bf16 %v1860_v19, %v1859_v28 }
 0x46b   :  { %3471 = vrot.lane.b32.xlu0 %v3470_v20, %s3518_s1  ;;  %3481 = vrot.lane.b32.xlu2 %v3480_v26, %s3518_s1 }
 0x4bd   :  { %v3467_v32 = vpop.permute.xlu2 %3466 }
 0x4be   :  { %v3469_v49 = vunpack.i.h.bf16 %v3467_v32  ;;  %v3468_v42 = vunpack.i.l.bf16 %v3467_v32  ;;  %v3340_v32 = vld [vmem:[%s4763_s6 + $0x14] sm:$0xf] }
 0x4c0   :  { %v1887_v63 = vsel %vm645_vm13, %v3468_v42, %v3469_v49  ;;  %v1902_v39 = vmax.f32 %v1858_v22, %v3469_v49 }
 0x4c1   :  { %v1901_v11 = vmax.f32 %v1857_v4, %v1887_v63 }
 0x4c5   :  { %v3482_v23 = vpop.permute.xlu2 %3481  ;;  %v3477_v51 = vpop.permute.xlu1 %3476 }
 0x4c6   :  { %v3484_v33 = vunpack.i.h.bf16 %v3482_v23  ;;  %v3483_v53 = vunpack.i.l.bf16 %v3482_v23  ;;  %v3479_v35 = vunpack.i.h.bf16 %v3477_v51  ;;  %v3478_v14 = vunpack.i.l.bf16 %v3477_v51  ;;  %v3079_v23 = vld [vmem:[%s4763_s6 + $0x18] sm:$0xf0]  ;;  %v3077_v51 = vld [vmem:[%s4763_s6 + $0x10] sm:$0xf] }
 0x4c8   :  { %v1900_v16 = vmax.f32 %v1856_v37, %v3484_v33  ;;  %v1886_v15 = vsel %vm645_vm13, %v3483_v53, %v3484_v33  ;;  %v1898_v29 = vmax.f32 %v1854_v58, %v3479_v35  ;;  %v1885_v34 = vsel %vm645_vm13, %v3478_v14, %v3479_v35  ;;  %v3338_v37 = vld [vmem:[%s4763_s6 + $0x4] sm:$0xf]  ;;  %v3341_v33 = vld [vmem:[%s4763_s6 + $0x14] sm:$0xf0] }
 0x4c9   :  { %v1899_v44 = vmax.f32 %v1855_v45, %v1886_v15  ;;  %v1897_v8 = vmax.f32 %v1853_v21, %v1885_v34  ;;  %v3074_v20 = vor.u32 %v3338_v37, %v3071_v24  ;;  %v3082_v53 = vor.u32 %v3340_v32, %v3079_v23  ;;  %v3349_v24 = vld [vmem:[%s4765_s7 + $0x38] sm:$0xff]  ;;  %v3356_v32 = vld [vmem:[%s4765_s7 + $0x70] sm:$0xff] }
 0x4ca   :  { %v3495_v38 = vpack.i.bf16 %v1900_v16, %v1898_v29  ;;  %v3078_v35 = vor.u32 %v3341_v33, %v3077_v51  ;;  %2483 = vmatpush.bf16.msra.mxu0 %v3349_v24  ;;  %v3364_v23 = vld [vmem:[%s4765_s7 + $0xb0] sm:$0xff] }
 0x4cb   :  { %v3500_v47 = vpack.i.bf16 %v1899_v44, %v1897_v8  ;;  %v3372_v51 = vld [vmem:[%s4765_s7 + $0xf0] sm:$0xff] }
 0x4cc   :  { %3496 = vrot.lane.b32.xlu2 %v3495_v38, %s3528_s4 }
 0x4dd   :  { %v3472_v54 = vpop.permute.xlu0 %3471 }
 0x4de   :  { %v3474_v46 = vunpack.i.h.bf16 %v3472_v54  ;;  %v3473_v56 = vunpack.i.l.bf16 %v3472_v54 }
 0x4e0   :  { %v1904_v40 = vmax.f32 %v1860_v19, %v3474_v46  ;;  %v1888_v31 = vsel %vm645_vm13, %v3473_v56, %v3474_v46  ;;  %vm1988_vm13 = vcmask 498688   ;;  %v3339_v19 = vld [vmem:[%s4763_s6 + $0x4] sm:$0xf0] }
 0x4e1   :  { %v1903_v30 = vmax.f32 %v1859_v28, %v1888_v31  ;;  %v3069_v28 = vld [vmem:[%s4763_s6] sm:$0xf]  ;;  %s3530_s6 = smov 32  }
 0x4e2   :  { %v3485_v6 = vpack.i.bf16 %v1904_v40, %v1902_v39  ;;  %v3070_v26 = vor.u32 %v3339_v19, %v3069_v28  ;;  %v3357_v28 = vld [vmem:[%s4765_s7 + $0x78] sm:$0xff] }
 0x4e3   :  { %v3490_v43 = vpack.i.bf16 %v1903_v30, %v1901_v11  ;;  %v3365_v19 = vld [vmem:[%s4765_s7 + $0xb8] sm:$0xff]  ;;  %2496 = vmatpush.bf16.msrb.mxu2 %v3357_v28 }
 0x4e4   :  { %3486 = vrot.lane.b32.xlu0 %v3485_v6, %s3528_s4 }
 0x4e5   :  { %3491 = vrot.lane.b32.xlu1 %v3490_v43, %s3528_s4 }
 0x4e7   :  { %2497 = vmatpush.bf16.msrb.mxu2 %v3356_v32 }
 0x4ec   :  { %3501 = vrot.lane.b32.xlu0 %v3500_v47, %s3528_s4 }
 0x526   :  { %v3497_v25 = vpop.permute.xlu2 %3496 }
 0x527   :  { %v3499_v36 = vunpack.i.h.bf16 %v3497_v25  ;;  %v3498_v57 = vunpack.i.l.bf16 %v3497_v25 }
 0x529   :  { %v1957_v2 = vmax.f32 %v1900_v16, %v3499_v36  ;;  %v1955_v27 = vmax.f32 %v1898_v29, %v3498_v57 }
 0x52b   :  { %v1963_v4 = vpack.c.bf16 %v1957_v2, %v1955_v27 }
 0x52d   :  { %v1996_v45 = vsel %vm1988_vm13, %v1963_v4, 0 }
 0x556   :  { %v3487_v48 = vpop.permute.xlu0 %3486 }
 0x557   :  { %v3492_v50 = vpop.permute.xlu1 %3491  ;;  %v3489_v17 = vunpack.i.h.bf16 %v3487_v48  ;;  %v3488_v61 = vunpack.i.l.bf16 %v3487_v48 }
 0x558   :  { %v3494_v21 = vunpack.i.h.bf16 %v3492_v50  ;;  %v3493_v58 = vunpack.i.l.bf16 %v3492_v50 }
 0x559   :  { %v1961_v59 = vmax.f32 %v1904_v40, %v3489_v17  ;;  %v1959_v0 = vmax.f32 %v1902_v39, %v3488_v61 }
 0x55a   :  { %v1945_v18 = vsel %vm1941_vm15, %v3494_v21, %v3489_v17  ;;  %v1944_v60 = vsel %vm1941_vm15, %v3493_v58, %v3488_v61 }
 0x55b   :  { %v1960_v13 = vmax.f32 %v1903_v30, %v1945_v18  ;;  %v1958_v62 = vmax.f32 %v1901_v11, %v1944_v60  ;;  %v1965_v10 = vpack.c.bf16 %v1961_v59, %v1959_v0 }
 0x55d   :  { %v1964_v1 = vpack.c.bf16 %v1960_v13, %v1958_v62  ;;  %v1999_v3 = vsel %vm1988_vm13, %v1965_v10, 0 }
 0x55e   :  { %2026 = vmatpush.bf16.xpose.msra.mxu3 %v1999_v3  ;;  %v3502_v41 = vpop.permute.xlu0 %3501 }
 0x55f   :  { %2007 = vmatpush.bf16.xpose.msrb.mxu1 %v1964_v1  ;;  %v3504_v7 = vunpack.i.h.bf16 %v3502_v41  ;;  %v3503_v9 = vunpack.i.l.bf16 %v3502_v41 }
 0x561   :  { %v1943_v55 = vsel %vm1941_vm15, %v3504_v7, %v3499_v36  ;;  %v1942_v5 = vsel %vm1941_vm15, %v3503_v9, %v3498_v57 }
 0x562   :  { %v1954_v22 = vmax.f32 %v1897_v8, %v1942_v5  ;;  %v1956_v52 = vmax.f32 %v1899_v44, %v1943_v55 }
 0x564   :  { %v1962_v12 = vpack.c.bf16 %v1956_v52, %v1954_v22 }
 0x566   :  { %2027 = vmatpush.bf16.xpose.msra.mxu3 %v1996_v45 }
 0x567   :  { %2008 = vmatpush.bf16.xpose.msrb.mxu1 %v1962_v12 }
 0x56d   :  { %3083 = vmatmul.msk.bf16.vlgmr.msra.gmra.mxu3 %vm1988_vm13, %v3074_v20  ;;  %v3373_v20 = vld [vmem:[%s4765_s7 + $0xf8] sm:$0xff] }
 0x56e   :  { %2009 = vmatmul.bf16.vlgmr.msrb.gmra.mxu1 %v3070_v26  ;;  %v3348_v26 = vld [vmem:[%s4765_s7 + $0x30] sm:$0xff]  ;;  %2522 = vmatpush.bf16.msrb.mxu3 %v3373_v20 }
 0x56f   :  { %2509 = vmatpush.bf16.msra.mxu1 %v3365_v19  ;;  %2484 = vmatpush.bf16.msra.mxu0 %v3348_v26  ;;  %v3506_v26 = vld [vmem:[%s4766_s9] ss:$0 sm:$0xff] }
 0x572   :  { %2523 = vmatpush.bf16.msrb.mxu3 %v3372_v51 }
 0x573   :  { %2510 = vmatpush.bf16.msra.mxu1 %v3364_v23 }
 0x57d   :  { %3084 = vmatmul.msk.bf16.gmra.mxu3 %vm1988_vm13, %v3082_v53 }
 0x57e   :  { %2014 = vmatmul.bf16.gmra.mxu1 %v3078_v35 }
 0x5eb   :  { %v2010_v14 = vpop.f32.mrf.mxu1 }
 0x5f0   :  { %v2029_v16 = vpop.f32.mrf.mxu3 }
 0x5f1   :  { %v2030_v15 = vadd.f32 %v2029_v16, %v2010_v14  ;;  %v3347_v14 = vld [vmem:[%s4765_s7 + $0x28] sm:$0xff] }
 0x5f2   :  { %v3355_v16 = vld [vmem:[%s4765_s7 + $0x68] sm:$0xff]  ;;  %2485 = vmatpush.bf16.msra.mxu0 %v3347_v14 }
 0x5f3   :  { %2040 = vst.msk [vmem:[#allocation7] sm:$0xff] %vm2039_vm1, %v2030_v15  ;;  %v2012_v29 = vpop.f32.mrf.mxu1  ;;  %v3363_v15 = vld [vmem:[%s4765_s7 + $0xa8] sm:$0xff]  ;;  %2498 = vmatpush.bf16.msrb.mxu2 %v3355_v16 }
 0x5f4   :  { %2511 = vmatpush.bf16.msra.mxu1 %v3363_v15 }
 0x5f8   :  { %v2031_v34 = vpop.f32.mrf.mxu3 }
 0x5f9   :  { %v2032_v44 = vadd.f32 %v2031_v34, %v2012_v29  ;;  %v3371_v29 = vld [vmem:[%s4765_s7 + $0xe8] sm:$0xff]  ;;  %v3346_v34 = vld [vmem:[%s4765_s7 + $0x20] sm:$0xff] }
 0x5fa   :  { %v2104_v8 = vld [vmem:[#allocation7 + $0x6] sm:$0x1]  ;;  %v2092_v38 = vld [vmem:[#allocation7 + $0x5] sm:$0x1]  ;;  %v2049_v49 = vld [vmem:[#allocation7 + $0x1] sm:$0x1]  ;;  %2524 = vmatpush.bf16.msrb.mxu3 %v3371_v29  ;;  %2486 = vmatpush.bf16.msra.mxu0 %v3346_v34 }
 0x5fb   :  { %2106 = vrot.lane.b32.xlu2 %v2104_v8, %s3529_s2  ;;  %2094 = vrot.lane.b32.xlu0 %v2092_v38, %s3530_s6  ;;  %2041 = vst.msk [vmem:[#allocation7 + $0x8] sm:$0xff] %vm2039_vm1, %v2032_v44  ;;  %v2015_v42 = vpop.f32.mrf.mxu1  ;;  %v2088_v63 = vld [vmem:[#allocation7 + $0x4] sm:$0x1]  ;;  %v2044_v39 = vld [vmem:[#allocation7] sm:$0x1]  ;;  %v3354_v44 = vld [vmem:[%s4765_s7 + $0x60] sm:$0xff] }
 0x5fc   :  { %2051 = vrot.lane.b32.xlu1 %v2049_v49, %s3530_s6  ;;  %2089 = vst.msk [vmem:[#allocation8 + $0x2] sm:$0x1] %vm2045_vm2, %v2088_v63  ;;  %v2075_v46 = vld [vmem:[#allocation7 + $0x3] sm:$0x1]  ;;  %v2062_v56 = vld [vmem:[#allocation7 + $0x2] sm:$0x1]  ;;  %2499 = vmatpush.bf16.msrb.mxu2 %v3354_v44 }
 0x5fd   :  { %2046 = vst.msk [vmem:[#allocation8] sm:$0x1] %vm2045_vm2, %v2044_v39  ;;  %v2116_v40 = vld [vmem:[#allocation7 + $0x7] sm:$0x1]  ;;  %v3362_v8 = vld [vmem:[%s4765_s7 + $0xa0] sm:$0xff]  ;;  %v3345_v39 = vld [vmem:[%s4765_s7 + $0x18] sm:$0xff] }
 0x5fe   :  { %v3370_v38 = vld [vmem:[%s4765_s7 + $0xe0] sm:$0xff]  ;;  %2512 = vmatpush.bf16.msra.mxu1 %v3362_v8  ;;  %2487 = vmatpush.bf16.msra.mxu0 %v3345_v39 }
 0x5ff   :  { %2525 = vmatpush.bf16.msrb.mxu3 %v3370_v38 }
 0x600   :  { %v2034_v11 = vpop.f32.mrf.mxu3 }
 0x601   :  { %v2035_v54 = vadd.f32 %v2034_v11, %v2015_v42  ;;  %v3353_v11 = vld [vmem:[%s4765_s7 + $0x58] sm:$0xff] }
 0x602   :  { %v2128_v31 = vld [vmem:[#allocation7 + $0x8] sm:$0x1]  ;;  %v2168_v30 = vld [vmem:[#allocation7 + $0xc] sm:$0x1]  ;;  %v2184_v25 = vld [vmem:[#allocation7 + $0xe] sm:$0x1]  ;;  %2500 = vmatpush.bf16.msrb.mxu2 %v3353_v11 }
 0x603   :  { %2077 = vrot.lane.b32.xlu2 %v2075_v46, %s3512_s25  ;;  %2064 = vrot.lane.b32.xlu0 %v2062_v56, %s3529_s2  ;;  %2042 = vst.msk [vmem:[#allocation7 + $0x10] sm:$0xff] %vm2039_vm1, %v2035_v54  ;;  %v2017_v6 = vpop.f32.mrf.mxu1  ;;  %v2132_v48 = vld [vmem:[#allocation7 + $0x9] sm:$0x1]  ;;  %v2172_v50 = vld [vmem:[#allocation7 + $0xd] sm:$0x1] }
 0x604   :  { %2118 = vrot.lane.b32.xlu1 %v2116_v40, %s3512_s25  ;;  %2129 = vst.msk [vmem:[#allocation8 + $0x4] sm:$0x1] %vm2045_vm2, %v2128_v31  ;;  %v2156_v58 = vld [vmem:[#allocation7 + $0xb] sm:$0x1]  ;;  %v2144_v36 = vld [vmem:[#allocation7 + $0xa] sm:$0x1] }
 0x605   :  { %2169 = vst.msk [vmem:[#allocation8 + $0x6] sm:$0x1] %vm2045_vm2, %v2168_v30  ;;  %v2196_v3 = vld [vmem:[#allocation7 + $0xf] sm:$0x1]  ;;  %v3344_v30 = vld [vmem:[%s4765_s7 + $0x10] sm:$0xff] }
 0x606   :  { %v3361_v54 = vld [vmem:[%s4765_s7 + $0x98] sm:$0xff]  ;;  %2488 = vmatpush.bf16.msra.mxu0 %v3344_v30 }
 0x607   :  { %v3369_v46 = vld [vmem:[%s4765_s7 + $0xd8] sm:$0xff]  ;;  %2513 = vmatpush.bf16.msra.mxu1 %v3361_v54 }
 0x608   :  { %v2036_v43 = vpop.f32.mrf.mxu3  ;;  %2526 = vmatpush.bf16.msrb.mxu3 %v3369_v46 }
 0x609   :  { %v2037_v47 = vadd.f32 %v2036_v43, %v2017_v6  ;;  %v3352_v6 = vld [vmem:[%s4765_s7 + $0x50] sm:$0xff] }
 0x60a   :  { %v2047_v17 = vld [vmem:[#allocation7 + $0x10] sm:$0x1]  ;;  %v2090_v61 = vld [vmem:[#allocation7 + $0x14] sm:$0x1]  ;;  %v2056_v21 = vld [vmem:[#allocation7 + $0x11] sm:$0x1]  ;;  %2501 = vmatpush.bf16.msrb.mxu2 %v3352_v6 }
 0x60b   :  { %2186 = vrot.lane.b32.xlu0 %v2184_v25, %s3529_s2  ;;  %2134 = vrot.lane.b32.xlu2 %v2132_v48, %s3530_s6  ;;  %2043 = vst.msk [vmem:[#allocation7 + $0x18] sm:$0xff] %vm2039_vm1, %v2037_v47  ;;  %v2110_v0 = vld [vmem:[#allocation7 + $0x16] sm:$0x1]  ;;  %v2122_v18 = vld [vmem:[#allocation7 + $0x17] sm:$0x1]  ;;  %v3360_v43 = vld [vmem:[%s4765_s7 + $0x90] sm:$0xff] }
 0x60c   :  { %2174 = vrot.lane.b32.xlu1 %v2172_v50, %s3530_s6  ;;  %2048 = vst.msk [vmem:[#allocation8 + $0x1] sm:$0x1] %vm2045_vm2, %v2047_v17  ;;  %v2098_v60 = vld [vmem:[#allocation7 + $0x15] sm:$0x1]  ;;  %v2082_v13 = vld [vmem:[#allocation7 + $0x13] sm:$0x1]  ;;  %2514 = vmatpush.bf16.msra.mxu1 %v3360_v43 }
 0x60d   :  { %2091 = vst.msk [vmem:[#allocation8 + $0x3] sm:$0x1] %vm2045_vm2, %v2090_v61  ;;  %v2069_v10 = vld [vmem:[#allocation7 + $0x12] sm:$0x1]  ;;  %v3368_v47 = vld [vmem:[%s4765_s7 + $0xd0] sm:$0xff]  ;;  %v3343_v25 = vld [vmem:[%s4765_s7 + $0x8] sm:$0xff] }
 0x60e   :  { %v3351_v48 = vld [vmem:[%s4765_s7 + $0x48] sm:$0xff]  ;;  %2527 = vmatpush.bf16.msrb.mxu3 %v3368_v47  ;;  %2489 = vmatpush.bf16.msra.mxu0 %v3343_v25  ;;  %v3342_v61 = vld [vmem:[%s4765_s7] sm:$0xff] }
 0x60f   :  { %v3359_v50 = vld [vmem:[%s4765_s7 + $0x88] sm:$0xff]  ;;  %2502 = vmatpush.bf16.msrb.mxu2 %v3351_v48 }
 0x610   :  { %v3367_v17 = vld [vmem:[%s4765_s7 + $0xc8] sm:$0xff]  ;;  %2515 = vmatpush.bf16.msra.mxu1 %v3359_v50 }
 0x612   :  { %v2170_v57 = vld [vmem:[#allocation7 + $0x1c] sm:$0x1]  ;;  %v2130_v59 = vld [vmem:[#allocation7 + $0x18] sm:$0x1]  ;;  %v2178_v62 = vld [vmem:[#allocation7 + $0x1d] sm:$0x1]  ;;  %2528 = vmatpush.bf16.msrb.mxu3 %v3367_v17  ;;  %2490 = vmatpush.bf16.msra.mxu0 %v3342_v61 }
 0x613   :  { %2158 = vrot.lane.b32.xlu0 %v2156_v58, %s3512_s25  ;;  %2058 = vrot.lane.b32.xlu2 %v2056_v21, %s3530_s6  ;;  %2171 = vst.msk [vmem:[#allocation8 + $0x7] sm:$0x1] %vm2045_vm2, %v2170_v57  ;;  %v2150_v1 = vld [vmem:[#allocation7 + $0x1a] sm:$0x1]  ;;  %v2138_v2 = vld [vmem:[#allocation7 + $0x19] sm:$0x1] }
 0x614   :  { %2146 = vrot.lane.b32.xlu1 %v2144_v36, %s3529_s2  ;;  %2131 = vst.msk [vmem:[#allocation8 + $0x5] sm:$0x1] %vm2045_vm2, %v2130_v59  ;;  %v2190_v27 = vld [vmem:[#allocation7 + $0x1e] sm:$0x1]  ;;  %v2202_v41 = vld [vmem:[#allocation7 + $0x1f] sm:$0x1] }
 0x615   :  { %v2162_v7 = vld [vmem:[#allocation7 + $0x1b] sm:$0x1]  ;;  %v3350_v21 = vld [vmem:[%s4765_s7 + $0x40] sm:$0xff] }
 0x616   :  { %v3358_v36 = vld [vmem:[%s4765_s7 + $0x80] sm:$0xff]  ;;  %2503 = vmatpush.bf16.msrb.mxu2 %v3350_v21 }
 0x617   :  { %v3366_v57 = vld [vmem:[%s4765_s7 + $0xc0] sm:$0xff]  ;;  %2516 = vmatpush.bf16.msra.mxu1 %v3358_v36 }
 0x618   :  { %2529 = vmatpush.bf16.msrb.mxu3 %v3366_v57 }
 0x61b   :  { %2112 = vrot.lane.b32.xlu0 %v2110_v0, %s3529_s2  ;;  %2124 = vrot.lane.b32.xlu2 %v2122_v18, %s3512_s25 }
 0x61c   :  { %2100 = vrot.lane.b32.xlu1 %v2098_v60, %s3530_s6 }
 0x623   :  { %2084 = vrot.lane.b32.xlu0 %v2082_v13, %s3512_s25  ;;  %2180 = vrot.lane.b32.xlu2 %v2178_v62, %s3530_s6 }
 0x624   :  { %2071 = vrot.lane.b32.xlu1 %v2069_v10, %s3529_s2 }
 0x62b   :  { %2152 = vrot.lane.b32.xlu2 %v2150_v1, %s3529_s2  ;;  %2140 = vrot.lane.b32.xlu0 %v2138_v2, %s3530_s6 }
 0x62c   :  { %2192 = vrot.lane.b32.xlu1 %v2190_v27, %s3529_s2 }
 0x633   :  { %2198 = vrot.lane.b32.xlu2 %v2196_v3, %s3512_s25  ;;  %2204 = vrot.lane.b32.xlu0 %v2202_v41, %s3512_s25 }
 0x634   :  { %2164 = vrot.lane.b32.xlu1 %v2162_v7, %s3512_s25 }
 0x655   :  { %v2107_v9 = vpop.permute.xlu2 %2106 }
 0x65d   :  { %v2078_v55 = vpop.permute.xlu2 %2077 }
 0x665   :  { %v2135_v5 = vpop.permute.xlu2 %2134 }
 0x666   :  { %2137 = vst.msk [vmem:[#allocation8 + $0x4] sm:$0x1] %vm2054_vm3, %v2135_v5 }
 0x66d   :  { %v2095_v4 = vpop.permute.xlu0 %2094  ;;  %v2059_v22 = vpop.permute.xlu2 %2058 }
 0x66e   :  { %2097 = vst.msk [vmem:[#allocation8 + $0x2] sm:$0x1] %vm2054_vm3, %v2095_v4  ;;  %v2052_v52 = vpop.permute.xlu1 %2051  ;;  %v3505_v4 = vld [vmem:[%s4764_s8] ss:$0 sm:$0xff] }
 0x66f   :  { %2055 = vst.msk [vmem:[#allocation8] sm:$0x1] %vm2054_vm3, %v2052_v52 }
 0x670   :  { %2061 = vst.msk [vmem:[#allocation8 + $0x1] sm:$0x1] %vm2054_vm3, %v2059_v22 }
 0x671   :  { %2109 = vst.msk [vmem:[#allocation8 + $0x2] sm:$0x1] %vm2067_vm4, %v2107_v9 }
 0x675   :  { %v2065_v12 = vpop.permute.xlu0 %2064  ;;  %v4626_v45 = vpop.permute.xlu2 %2124 }
 0x676   :  { %2068 = vst.msk [vmem:[#allocation8] sm:$0x1] %vm2067_vm4, %v2065_v12  ;;  %v2119_v37 = vpop.permute.xlu1 %2118 }
 0x677   :  { %2081 = vst.msk [vmem:[#allocation8] sm:$0x1] %vm2080_vm5, %v2078_v55  ;;  %v16_v55 = vstv %s4767_s10 }
 0x678   :  { %2121 = vst.msk [vmem:[#allocation8 + $0x2] sm:$0x1] %vm2080_vm5, %v2119_v37 }
 0x679   :  { %17 = vst [vmem:[#allocation9] sm:$0x1] %v16_v55 }
 0x67d   :  { %v2187_v33 = vpop.permute.xlu0 %2186  ;;  %v2181_v53 = vpop.permute.xlu2 %2180 }
 0x67e   :  { %v2175_v35 = vpop.permute.xlu1 %2174  ;;  %2183 = vst.msk [vmem:[#allocation8 + $0x7] sm:$0x1] %vm2054_vm3, %v2181_v53 }
 0x67f   :  { %2177 = vst.msk [vmem:[#allocation8 + $0x6] sm:$0x1] %vm2054_vm3, %v2175_v35 }
 0x680   :  { %2189 = vst.msk [vmem:[#allocation8 + $0x6] sm:$0x1] %vm2067_vm4, %v2187_v33  ;;  %v3507_v35 = vld [vmem:[#allocation9] ss:$0 sm:$0xff] }
 0x685   :  { %v2159_v49 = vpop.permute.xlu0 %2158  ;;  %v2153_v42 = vpop.permute.xlu2 %2152 }
 0x686   :  { %v2147_v63 = vpop.permute.xlu1 %2146 }
 0x687   :  { %2149 = vst.msk [vmem:[#allocation8 + $0x4] sm:$0x1] %vm2067_vm4, %v2147_v63 }
 0x688   :  { %2161 = vst.msk [vmem:[#allocation8 + $0x4] sm:$0x1] %vm2080_vm5, %v2159_v49 }
 0x68d   :  { %v2113_v56 = vpop.permute.xlu0 %2112  ;;  %v2199_v40 = vpop.permute.xlu2 %2198 }
 0x68e   :  { %v2101_v31 = vpop.permute.xlu1 %2100  ;;  %2201 = vst.msk [vmem:[#allocation8 + $0x6] sm:$0x1] %vm2080_vm5, %v2199_v40 }
 0x68f   :  { %2103 = vst.msk [vmem:[#allocation8 + $0x3] sm:$0x1] %vm2054_vm3, %v2101_v31 }
 0x690   :  { %2115 = vst.msk [vmem:[#allocation8 + $0x3] sm:$0x1] %vm2067_vm4, %v2113_v56 }
 0x691   :  { %2127 = vst.msk [vmem:[#allocation8 + $0x3] sm:$0x1] %vm2080_vm5, %v4626_v45 }
 0x695   :  { %v2085_v58 = vpop.permute.xlu0 %2084 }
 0x696   :  { %v2072_v59 = vpop.permute.xlu1 %2071 }
 0x697   :  { %2074 = vst.msk [vmem:[#allocation8 + $0x1] sm:$0x1] %vm2067_vm4, %v2072_v59 }
 0x698   :  { %2087 = vst.msk [vmem:[#allocation8 + $0x1] sm:$0x1] %vm2080_vm5, %v2085_v58 }
 0x69d   :  { %v2141_v0 = vpop.permute.xlu0 %2140 }
 0x69e   :  { %v2193_v18 = vpop.permute.xlu1 %2192  ;;  %2143 = vst.msk [vmem:[#allocation8 + $0x5] sm:$0x1] %vm2054_vm3, %v2141_v0 }
 0x69f   :  { %2195 = vst.msk [vmem:[#allocation8 + $0x7] sm:$0x1] %vm2067_vm4, %v2193_v18 }
 0x6a0   :  { %2155 = vst.msk [vmem:[#allocation8 + $0x5] sm:$0x1] %vm2067_vm4, %v2153_v42 }
 0x6a5   :  { %v2205_v60 = vpop.permute.xlu0 %2204 }
 0x6a6   :  { %v2165_v13 = vpop.permute.xlu1 %2164  ;;  %2207 = vst.msk [vmem:[#allocation8 + $0x7] sm:$0x1] %vm2080_vm5, %v2205_v60 }
 0x6a7   :  { %2167 = vst.msk [vmem:[#allocation8 + $0x5] sm:$0x1] %vm2080_vm5, %v2165_v13 }
 0x6ae   :  { %v2208_v62 = vld [vmem:[#allocation8] sm:$0xff] }
 0x6af   :  { %2210 = vst [vmem:[#allocation1] ss:$4 sm:$0xff] %v2208_v62 }
 0x6b6   :  { %v2211_v10 = vld.sshfl [vmem:[#allocation1] sm:$0xff pattern:$0x73625140]  ;;  %v2212_v1 = vld.sshfl [vmem:[#allocation1 + $0x8] sm:$0xff pattern:$0x73625140] }
 0x6b7   :  { %v2219_v2 = vpack.c.bf16 %v2211_v10, %v2211_v10  ;;  %v2220_v27 = vpack.c.bf16 %v2212_v1, %v2212_v1  ;;  %v2213_v3 = vld.sshfl [vmem:[#allocation1 + $0x10] sm:$0xff pattern:$0x73625140]  ;;  %v2214_v41 = vld.sshfl [vmem:[#allocation1 + $0x18] sm:$0xff pattern:$0x73625140] }
 0x6b8   :  { %v2221_v7 = vpack.c.bf16 %v2213_v3, %v2213_v3  ;;  %v2222_v9 = vpack.c.bf16 %v2214_v41, %v2214_v41 }
 0x6b9   :  { %2491 = vmatmul.bf16.vlgmr.msra.gmra.mxu0 %v2219_v2  ;;  %2504 = vmatmul.bf16.vlgmr.msrb.gmra.mxu2 %v2220_v27 }
 0x6ba   :  { %2517 = vmatmul.bf16.vlgmr.msra.gmra.mxu1 %v2221_v7  ;;  %2530 = vmatmul.bf16.vlgmr.msrb.gmra.mxu3 %v2222_v9 }
 0x736   :  { %v2492_v5 = vpop.f32.mrf.mxu0 }
 0x737   :  { %v2518_v22 = vpop.f32.mrf.mxu1  ;;  %v2493_v52 = vadd.f32 %v3505_v4, %v2492_v5 }
 0x73c   :  { %v2505_v12 = vpop.f32.mrf.mxu2 }
 0x73d   :  { %v2506_v45 = vadd.f32 %v2505_v12, %v2493_v52  ;;  %v2531_v37 = vpop.f32.mrf.mxu3 }
 0x73e   :  { %v2494_v24 = vpop.f32.mrf.mxu0 }
 0x73f   :  { %v2519_v28 = vadd.f32 %v2518_v22, %v2506_v45  ;;  %v2520_v19 = vpop.f32.mrf.mxu1 }
 0x741   :  { %v2532_v20 = vadd.f32 %v2531_v37, %v2519_v28 }
 0x743   :  { %v2535_v32 = vmax.f32 %v2532_v20, 0.0 }
 0x744   :  { %v2507_v23 = vpop.f32.mrf.mxu2 }
 0x745   :  { %v2533_v51 = vpop.f32.mrf.mxu3  ;;  %v2540_v33 = vmul.f32 %v3506_v26, %v2535_v32 }
 0x747   :  { %v2541_v53 = vsel %vm1286_vm14, %v2540_v33, 0.0 }
 0x748   :  { %2542 = vadd.xlane.f32.xlu1 %v2541_v53 }
 0x7bb   :  { %v2543_v14 = vpop.xlane.xlu1 %2542 }
 0x7bc   :  { %v2548_v16 = vadd.f32 %v3507_v35, %v2543_v14 }
 0x7be   :  { %2550 = vst.msk [vmem:[%s4768_s11] sm:$0x3] %vm2549_vm6, %v2548_v16 }

</bundles_post_ra>
